<compile_context>
chip_gen: v5e
topology: v5e:2x2
jax: 0.10.0
libtpu: 0.0.40
codegen_flags: <defaults>
</compile_context>

<pallas_src>
import jax
import jax.numpy as jnp
from jax.experimental import pallas as pl
from jax.experimental.pallas import tpu as pltpu

# ----------------------------- model config ---------------------------------
EMBED_DIM = 32           # embed_dim
NUM_QUERIES = 8          # num_queries (small demo size; module default 4096)
N_HEADS = 4              # LearnedDownSampler n_heads
HEAD_DIM = EMBED_DIM // N_HEADS
HNQ = N_HEADS * NUM_QUERIES       # stacked (head, query) rows = 32
MAX_LENGTH = 8           # tokenizer max_length per section
VOCAB_SIZE = 128         # synthetic vocab
LN_EPS = 1e-5
ATTN_LOG_EPS = 1e-8

# ----------------------------- kernel tiling ---------------------------------
BT = 8                   # documents per grid step (sublane aligned)
S_MAX = 64               # fixed padded tokens per document (single compile)
STATS_W = 128            # lane-dense per-doc stats row: [pred, log_prob, 0...]
NEG_INF = -1e30


# --------------------------- text-side glue ----------------------------------
def split_into_sections(formatted_text: str):
    lines = formatted_text.split('\n')
    sections = []
    current_section = []
    for line in lines:
        stripped = line.strip()
        if stripped.endswith('Information:') or stripped.startswith('Last'):
            if current_section:
                sections.append('\n'.join(current_section).strip())
                current_section = []
            continue
        if stripped:
            current_section.append(stripped)
    if current_section:
        sections.append('\n'.join(current_section).strip())
    return sections


# TODO(synk): LlamaTokenizerFast has no Pallas/JAX equivalent; replaced with a
# deterministic hash tokenizer (pad id 0, truncation + padding to MAX_LENGTH).
def simple_tokenize(section: str, max_length: int):
    words = section.split()
    ids = [(sum(ord(c) for c in w) % (VOCAB_SIZE - 1)) + 1 for w in words]
    ids = ids[:max_length]
    ids = ids + [0] * (max_length - len(ids))
    return ids


def tokenize_document(formatted_text: str):
    sections = split_into_sections(formatted_text)
    if not sections:
        return None
    ids = []
    for sec in sections:
        ids.extend(simple_tokenize(sec, MAX_LENGTH))
    return ids


def prepare_batch(token_lists):
    """Pad each token list to S_MAX (id 0) and record true lengths."""
    ids, lens = [], []
    for toks in token_lists:
        toks = list(toks)
        if len(toks) > S_MAX:
            # TODO(synk): fixed-shape cap; keeps the most recent tokens like
            # truncate_limit does in the original module.
            toks = toks[-S_MAX:]
        lens.append(len(toks))
        ids.append(toks + [0] * (S_MAX - len(toks)))
    return jnp.array(ids, jnp.int32), jnp.array(lens, jnp.int32)


# ------------------------------ Pallas kernel --------------------------------
def hier_attn_kernel(ids_ref, len_ref, emb_ref, a_ref, wvo_ref, vecs_ref,
                     ds_ref, stats_ref):
    # ids_ref  : (BT*S_MAX, 1) int32  token ids (doc-major)
    # len_ref  : (BT, 1)       int32  true (unpadded) token count per doc
    # emb_ref  : (V, E)        f32    embedding table (VMEM resident)
    # a_ref    : (H*Nq, E)     f32    folded ((queries@Wq+bq)*scale)@Wk_h^T (head-major rows)
    # wvo_ref  : (H*E, E)      f32    folded Wv_h@Wo_h stacked along the contraction dim
    # vecs_ref : (8, E)        f32    row0=bv@Wo+bo, row1=ln_g, row2=ln_b, row3=reg_w, row4[0]=reg_b
    # ds_ref   : (BT*Nq, E)    f32    downsampled outputs (doc-major rows)
    # stats_ref: (BT, 128)     f32    lane0 = pred, lane1 = log_prob
    ids = ids_ref[...]
    vecs = vecs_ref[...]

    # --- fused embedding lookup: one-hot (BT*S, V) @ table (V, E) on the MXU ---
    onehot = (jax.lax.broadcasted_iota(jnp.int32, (BT * S_MAX, VOCAB_SIZE), 1)
              == ids).astype(jnp.float32)
    x_flat = jnp.dot(onehot, emb_ref[...],
                     preferred_element_type=jnp.float32)          # (BT*S, E)
    x_docs = x_flat.reshape(BT, S_MAX, EMBED_DIM)                 # (BT, S, E)

    # --- all-head scores in one batched contraction: (BT, HNq, S) ---
    a_b = jnp.broadcast_to(a_ref[...], (BT, HNQ, EMBED_DIM))
    scores = jax.lax.dot_general(a_b, x_docs, (((2,), (2,)), ((0,), (0,))),
                                 preferred_element_type=jnp.float32)

    # --- mask positions past each document's true length ---
    lens = len_ref[...]                                           # (BT, 1) int32
    pos = jax.lax.broadcasted_iota(jnp.int32, (BT, 1, S_MAX), 2)
    valid = pos < lens.reshape(BT, 1, 1)                          # (BT, 1, S)
    scores = jnp.where(valid, scores, NEG_INF)

    # --- softmax over the token (lane) axis; masked lanes get exactly 0 weight ---
    smax = jnp.max(scores, axis=-1, keepdims=True)
    e = jnp.exp(scores - smax)
    denom = jnp.sum(e, axis=-1, keepdims=True)
    p = e * pl.reciprocal(denom, approx=True)                     # (BT, HNq, S)

    # --- per-doc, all-head context: (BT, HNq, S) @ (BT, S, E) -> (BT, HNq, E) ---
    ctx = jax.lax.dot_general(p, x_docs, (((2,), (1,)), ((0,), (0,))),
                              preferred_element_type=jnp.float32)

    # --- concat heads along lanes -> (BT*Nq, H*E)=(64,128), then ONE 128-deep
    #     contraction with the folded value/output projection ---
    ctx_cat = jnp.concatenate(
        [ctx[:, h * NUM_QUERIES:(h + 1) * NUM_QUERIES, :] for h in range(N_HEADS)],
        axis=-1)                                                  # (BT, Nq, H*E)
    ctx2 = ctx_cat.reshape(BT * NUM_QUERIES, N_HEADS * EMBED_DIM)
    attn = jnp.dot(ctx2, wvo_ref[...], preferred_element_type=jnp.float32)
    attn = attn + vecs[0:1, :]                                    # + (bv@Wo + bo)
    # TODO(synk): attention dropout (p=0.1, training mode) is stochastic;
    # implemented with inference (no-dropout) semantics.

    # --- LayerNorm over embed dim ---
    mu = jnp.mean(attn, axis=-1, keepdims=True)
    var = jnp.mean((attn - mu) ** 2, axis=-1, keepdims=True)
    ln = (attn - mu) * jax.lax.rsqrt(var + LN_EPS)
    ln = ln * vecs[1:2, :] + vecs[2:3, :]                         # (BT*Nq, E)
    ds_ref[...] = ln

    # --- RL log-prob: mean over (Nq, valid tokens) of log(head-avg attn + eps) ---
    attn_avg = p[:, 0:NUM_QUERIES, :]
    for h in range(1, N_HEADS):
        attn_avg = attn_avg + p[:, h * NUM_QUERIES:(h + 1) * NUM_QUERIES, :]
    attn_avg = attn_avg * (1.0 / N_HEADS)                         # (BT, Nq, S)
    log_terms = jnp.where(valid, jnp.log(attn_avg + ATTN_LOG_EPS), 0.0)
    lp_sum = jnp.sum(jnp.sum(log_terms, axis=-1), axis=-1, keepdims=True)  # (BT,1)
    lp = lp_sum / (NUM_QUERIES * lens.astype(jnp.float32))

    # --- mean pool over queries (block-diag averaging matmul) + regression head ---
    rq = jax.lax.broadcasted_iota(jnp.int32, (BT, BT * NUM_QUERIES), 0)
    cq = jax.lax.broadcasted_iota(jnp.int32, (BT, BT * NUM_QUERIES), 1)
    in_doc = (cq >= rq * NUM_QUERIES) & (cq < (rq + 1) * NUM_QUERIES)
    pool_m = jnp.where(in_doc, 1.0 / NUM_QUERIES, 0.0)
    pooled = jnp.dot(pool_m, ln, preferred_element_type=jnp.float32)       # (BT, E)
    pred = jnp.sum(pooled * vecs[3:4, :], axis=-1, keepdims=True) + vecs[4:5, 0:1]

    # --- lane-dense stats tile: lane0 = pred, lane1 = log_prob ---
    lane = jax.lax.broadcasted_iota(jnp.int32, (BT, STATS_W), 1)
    stats_ref[...] = jnp.where(lane == 0, pred, 0.0) + jnp.where(lane == 1, lp, 0.0)


# ------------------------------ wrapper ---------------------------------------
def pallas_downsampler(ids_batch, lengths, packed, emb_table):
    """ids_batch: (B, S_MAX) int32 zero-padded; lengths: (B,) int32 true lengths.
    Returns (downsampled (B, Nq, E), pred (B,), log_prob (B,))."""
    B, S = ids_batch.shape
    assert S == S_MAX
    steps = -(-B // BT)
    steps += steps % 2            # even #steps -> both v7x TensorCores get work
    steps = max(steps, 2)
    Bp = steps * BT
    if Bp != B:
        ids_batch = jnp.concatenate(
            [ids_batch, jnp.zeros((Bp - B, S_MAX), jnp.int32)], axis=0)
        lengths = jnp.concatenate(
            [lengths, jnp.full((Bp - B,), S_MAX, jnp.int32)], axis=0)
    ids_flat = ids_batch.reshape(Bp * S_MAX, 1)
    lens2 = lengths.reshape(Bp, 1)

    ds_flat, stats = pl.pallas_call(
        hier_attn_kernel,
        out_shape=(jax.ShapeDtypeStruct((Bp * NUM_QUERIES, EMBED_DIM), jnp.float32),
                   jax.ShapeDtypeStruct((Bp, STATS_W), jnp.float32)),
        grid=(steps,),
        in_specs=[
            pl.BlockSpec((BT * S_MAX, 1), lambda b: (b, 0)),                  # token ids
            pl.BlockSpec((BT, 1), lambda b: (b, 0)),                          # doc lengths
            pl.BlockSpec((VOCAB_SIZE, EMBED_DIM), lambda b: (0, 0)),          # emb table
            pl.BlockSpec((HNQ, EMBED_DIM), lambda b: (0, 0)),                 # folded Q.K^T
            pl.BlockSpec((N_HEADS * EMBED_DIM, EMBED_DIM), lambda b: (0, 0)), # folded V.O
            pl.BlockSpec((8, EMBED_DIM), lambda b: (0, 0)),                   # packed vecs
        ],
        out_specs=(
            pl.BlockSpec((BT * NUM_QUERIES, EMBED_DIM), lambda b: (b, 0)),
            pl.BlockSpec((BT, STATS_W), lambda b: (b, 0)),
        ),
        compiler_params=pltpu.CompilerParams(dimension_semantics=("parallel",)),
    )(ids_flat, lens2, emb_table, packed["a"], packed["wvo"], packed["vecs"])

    ds = ds_flat.reshape(Bp, NUM_QUERIES, EMBED_DIM)[:B]
    pred = stats[:B, 0]
    logp = stats[:B, 1]
    return ds, pred, logp


# ---------------------- params + one-time weight folding ---------------------
def init_params(key):
    ks = jax.random.split(key, 12)
    s = 0.02
    params = {
        "queries": jax.random.normal(ks[0], (NUM_QUERIES, EMBED_DIM), jnp.float32),
        "wq": s * jax.random.normal(ks[1], (EMBED_DIM, EMBED_DIM), jnp.float32),
        "bq": jnp.zeros((1, EMBED_DIM), jnp.float32),
        "wk": s * jax.random.normal(ks[2], (EMBED_DIM, EMBED_DIM), jnp.float32),
        "bk": jnp.zeros((1, EMBED_DIM), jnp.float32),
        "wv": s * jax.random.normal(ks[3], (EMBED_DIM, EMBED_DIM), jnp.float32),
        "bv": jnp.zeros((1, EMBED_DIM), jnp.float32),
        "wo": s * jax.random.normal(ks[4], (EMBED_DIM, EMBED_DIM), jnp.float32),
        "bo": jnp.zeros((1, EMBED_DIM), jnp.float32),
        "ln_g": jnp.ones((1, EMBED_DIM), jnp.float32),
        "ln_b": jnp.zeros((1, EMBED_DIM), jnp.float32),
        "reg_w": s * jax.random.normal(ks[5], (EMBED_DIM, 1), jnp.float32),
        "reg_b": jnp.zeros((1, 1), jnp.float32),
    }
    emb_table = 0.1 * jax.random.normal(ks[6], (VOCAB_SIZE, EMBED_DIM), jnp.float32)
    return params, emb_table


def pack_params(params):
    """One-time (init-side) folding of the attention projections per head."""
    hd = HEAD_DIM
    scale = 1.0 / float(hd) ** 0.5
    q = (params["queries"] @ params["wq"] + params["bq"]) * scale      # (Nq, E)
    a_rows, wvo_rows = [], []
    for h in range(N_HEADS):
        sl = slice(h * hd, (h + 1) * hd)
        a_rows.append(q[:, sl] @ params["wk"][:, sl].T)                # (Nq, E)
        wvo_rows.append(params["wv"][:, sl] @ params["wo"][sl, :])     # (E, E)
    vecs = jnp.zeros((8, EMBED_DIM), jnp.float32)
    vecs = vecs.at[0].set((params["bv"] @ params["wo"] + params["bo"])[0])
    vecs = vecs.at[1].set(params["ln_g"][0])
    vecs = vecs.at[2].set(params["ln_b"][0])
    vecs = vecs.at[3].set(params["reg_w"][:, 0])
    vecs = vecs.at[4, 0].set(params["reg_b"][0, 0])
    return {"a": jnp.concatenate(a_rows, axis=0),       # (H*Nq, E) head-major rows
            "wvo": jnp.concatenate(wvo_rows, axis=0),   # (H*E, E)  stacked contraction
            "vecs": vecs}                               # (8, E)


# ------------------------- pure-JAX reference (check) ------------------------
def ref_downsampler(x, params):
    q = params["queries"] @ params["wq"] + params["bq"]
    k = x @ params["wk"] + params["bk"]
    v = x @ params["wv"] + params["bv"]
    nq, e = q.shape
    s_len = x.shape[0]
    hd = e // N_HEADS
    scale = 1.0 / float(hd) ** 0.5
    attn_sum = jnp.zeros((nq, s_len), jnp.float32)
    ctx_heads = []
    for h in range(N_HEADS):
        qh = q[:, h * hd:(h + 1) * hd] * scale
        kh = k[:, h * hd:(h + 1) * hd]
        vh = v[:, h * hd:(h + 1) * hd]
        p = jax.nn.softmax(qh @ kh.T, axis=-1)
        attn_sum = attn_sum + p
        ctx_heads.append(p @ vh)
    ctx = jnp.concatenate(ctx_heads, axis=-1)
    attn_out = ctx @ params["wo"] + params["bo"]
    mu = jnp.mean(attn_out, axis=-1, keepdims=True)
    var = jnp.mean((attn_out - mu) ** 2, axis=-1, keepdims=True)
    ln = (attn_out - mu) * jax.lax.rsqrt(var + LN_EPS) * params["ln_g"] + params["ln_b"]
    lp = jnp.mean(jnp.log(attn_sum / N_HEADS + ATTN_LOG_EPS))
    pooled = jnp.mean(ln, axis=0, keepdims=True)
    pred = pooled @ params["reg_w"] + params["reg_b"]
    return ln, pred, lp


# ----------------------------- full forward ----------------------------------
def hierarchical_attention_rl_forward(formatted_text, params, packed, emb_table,
                                      truncate_limit=None):
    ids = tokenize_document(formatted_text)
    if ids is None:
        dummy = jnp.zeros((1, EMBED_DIM), jnp.float32)
        pred = (dummy @ params["reg_w"] + params["reg_b"]).reshape(1,)
        return dummy, pred, jnp.float32(0.0)
    if truncate_limit is not None and len(ids) > truncate_limit:
        ids = ids[-truncate_limit:]
    ids_arr, lens = prepare_batch([ids])
    ds, pred, logp = pallas_downsampler(ids_arr, lens, packed, emb_table)
    return ds[0:1], pred[0:1], logp[0]


# --------------------------------- main ---------------------------------------
if __name__ == "__main__":
    key = jax.random.PRNGKey(0)
    params, emb_table = init_params(key)
    packed = pack_params(params)

    text_a = (
        "Patient Information:\n"
        "age forty two with hypertension\n"
        "takes daily medication\n"
        "Visit Information:\n"
        "complained of mild headache\n"
        "blood pressure slightly elevated\n"
        "Last Notes:\n"
        "follow up in two weeks\n"
        "recommended rest and hydration\n"
    )
    text_b = (
        "Patient Information:\n"
        "age sixty five with diabetes\n"
        "uses insulin every morning\n"
        "Visit Information:\n"
        "reported blurry vision lately\n"
        "glucose levels moderately high\n"
        "Last Notes:\n"
        "schedule eye exam next month\n"
        "adjust insulin dose carefully\n"
    )

    # --- single-document forward (module semantics: one formatted_text) ---
    ds, pred, logp = hierarchical_attention_rl_forward(text_a, params, packed, emb_table)
    jax.block_until_ready((ds, pred, logp))
    assert ds.shape == (1, NUM_QUERIES, EMBED_DIM)
    assert pred.shape == (1,)
    assert logp.shape == ()

    # correctness vs. pure-JAX reference of the original (unfolded, unpadded) math.
    # tolerance 5e-3: only divergence source is the EUP approx reciprocal.
    tol = dict(rtol=5e-3, atol=5e-3)
    toks_a = tokenize_document(text_a)
    ids_a = jnp.array(toks_a, jnp.int32)
    ref_ds, ref_pred, ref_lp = ref_downsampler(emb_table[ids_a], params)
    assert jnp.allclose(ds[0], ref_ds, **tol)
    assert jnp.allclose(pred[0], ref_pred[0, 0], **tol)
    assert jnp.allclose(logp, ref_lp, **tol)

    # --- batched path: many documents per grid step ---
    toks_b = tokenize_document(text_b)
    ids_b = jnp.array(toks_b, jnp.int32)
    batch_ids, batch_lens = prepare_batch([toks_a, toks_b])        # (2, 64), (2,)
    ds_b, pred_b, logp_b = pallas_downsampler(batch_ids, batch_lens, packed, emb_table)
    jax.block_until_ready((ds_b, pred_b, logp_b))
    for i, toks in enumerate([ids_a, ids_b]):
        r_ds, r_pred, r_lp = ref_downsampler(emb_table[toks], params)
        assert jnp.allclose(ds_b[i], r_ds, **tol)
        assert jnp.allclose(pred_b[i], r_pred[0, 0], **tol)
        assert jnp.allclose(logp_b[i], r_lp, **tol)

    print("KERNEL_OK")
</pallas_src>

<mosaic_0001>
module attributes {stable_mosaic.version = 11 : i64} {
  func.func @hier_attn_kernel(%arg0: i32, %arg1: memref<512x1xi32, #tpu.memory_space<vmem>>, %arg2: memref<8x1xi32, #tpu.memory_space<vmem>>, %arg3: memref<128x32xf32, #tpu.memory_space<vmem>>, %arg4: memref<32x32xf32, #tpu.memory_space<vmem>>, %arg5: memref<128x32xf32, #tpu.memory_space<vmem>>, %arg6: memref<8x32xf32, #tpu.memory_space<vmem>>, %arg7: memref<64x32xf32, #tpu.memory_space<vmem>>, %arg8: memref<8x128xf32, #tpu.memory_space<vmem>>) attributes {dimension_semantics = [#tpu.dimension_semantics<parallel>], iteration_bounds = array<i64: 2>, scalar_prefetch = 0 : i64, scratch_operands = 0 : i64, tpu.core_type = #tpu.core_type<tc>, window_params = [{transform_indices = @transform_0, window_bounds = array<i64: 512, 1>}, {transform_indices = @transform_1, window_bounds = array<i64: 8, 1>}, {pipeline_mode = #tpu.pipeline_mode<synchronous>, transform_indices = @transform_2, window_bounds = array<i64: 128, 32>}, {pipeline_mode = #tpu.pipeline_mode<synchronous>, transform_indices = @transform_3, window_bounds = array<i64: 32, 32>}, {pipeline_mode = #tpu.pipeline_mode<synchronous>, transform_indices = @transform_4, window_bounds = array<i64: 128, 32>}, {pipeline_mode = #tpu.pipeline_mode<synchronous>, transform_indices = @transform_5, window_bounds = array<i64: 8, 32>}, {transform_indices = @transform_6, window_bounds = array<i64: 64, 32>}, {transform_indices = @transform_7, window_bounds = array<i64: 8, 128>}]} {
    %c0 = arith.constant 0 : index
    %c0_0 = arith.constant 0 : index
    %0 = vector.load %arg1[%c0, %c0_0] : memref<512x1xi32, #tpu.memory_space<vmem>>, vector<512x1xi32>
    %c0_1 = arith.constant 0 : index
    %c0_2 = arith.constant 0 : index
    %1 = vector.load %arg6[%c0_1, %c0_2] : memref<8x32xf32, #tpu.memory_space<vmem>>, vector<8x32xf32>
    %2 = tpu.iota {dimensions = array<i32: 1>} : vector<512x128xi32>
    %3 = vector.broadcast %0 : vector<512x1xi32> to vector<512x128xi32>
    %4 = arith.cmpi eq, %2, %3 : vector<512x128xi32>
    %5 = arith.extui %4 : vector<512x128xi1> to vector<512x128xi32>
    %6 = arith.sitofp %5 : vector<512x128xi32> to vector<512x128xf32>
    %c0_3 = arith.constant 0 : index
    %c0_4 = arith.constant 0 : index
    %7 = vector.load %arg3[%c0_3, %c0_4] : memref<128x32xf32, #tpu.memory_space<vmem>>, vector<128x32xf32>
    %cst = arith.constant dense<0.000000e+00> : vector<512x32xf32>
    %8 = tpu.matmul %6, %7, %cst {dimension_numbers = #tpu.dot_dimension_numbers<[1], [0], [0], [1], [0, 0, 1, 1], [], []>} : vector<512x128xf32>, vector<128x32xf32>, vector<512x32xf32> -> vector<512x32xf32>
    %9 = vector.shape_cast %8 : vector<512x32xf32> to vector<8x64x32xf32>
    %c0_5 = arith.constant 0 : index
    %c0_6 = arith.constant 0 : index
    %10 = vector.load %arg4[%c0_5, %c0_6] : memref<32x32xf32, #tpu.memory_space<vmem>>, vector<32x32xf32>
    %11 = vector.shape_cast %10 : vector<32x32xf32> to vector<1x32x32xf32>
    %12 = vector.broadcast %11 : vector<1x32x32xf32> to vector<8x32x32xf32>
    %cst_7 = arith.constant dense<0.000000e+00> : vector<8x32x64xf32>
    %13 = tpu.matmul %12, %9, %cst_7 {dimension_numbers = #tpu.dot_dimension_numbers<[2], [2], [1], [1], [0, 0, 0, 1, 1, 1], [0], [0]>} : vector<8x32x32xf32>, vector<8x64x32xf32>, vector<8x32x64xf32> -> vector<8x32x64xf32>
    %c0_8 = arith.constant 0 : index
    %c0_9 = arith.constant 0 : index
    %14 = vector.load %arg2[%c0_8, %c0_9] : memref<8x1xi32, #tpu.memory_space<vmem>>, vector<8x1xi32>
    %15 = tpu.iota {dimensions = array<i32: 2>} : vector<8x1x64xi32>
    %16 = vector.shape_cast %14 : vector<8x1xi32> to vector<8x1x1xi32>
    %17 = vector.broadcast %16 : vector<8x1x1xi32> to vector<8x1x64xi32>
    %18 = arith.cmpi slt, %15, %17 : vector<8x1x64xi32>
    %cst_10 = arith.constant -1.000000e+30 : f32
    %19 = vector.shape_cast %18 : vector<8x1x64xi1> to vector<8x1x64xi1>
    %20 = vector.broadcast %19 : vector<8x1x64xi1> to vector<8x32x64xi1>
    %21 = vector.broadcast %cst_10 : f32 to vector<8x32x64xf32>
    %22 = arith.select %20, %13, %21 : vector<8x32x64xi1>, vector<8x32x64xf32>
    %cst_11 = arith.constant dense<0xFF800000> : vector<8x32xf32>
    %23 = vector.multi_reduction <maximumf>, %22, %cst_11 [2] : vector<8x32x64xf32> to vector<8x32xf32>
    %24 = vector.shape_cast %23 : vector<8x32xf32> to vector<8x32x1xf32>
    %25 = vector.broadcast %24 : vector<8x32x1xf32> to vector<8x32x64xf32>
    %26 = arith.subf %22, %25 : vector<8x32x64xf32>
    %27 = math.exp %26 : vector<8x32x64xf32>
    %cst_12 = arith.constant dense<0.000000e+00> : vector<8x32xf32>
    %28 = vector.multi_reduction <add>, %27, %cst_12 [2] : vector<8x32x64xf32> to vector<8x32xf32>
    %29 = vector.shape_cast %28 : vector<8x32xf32> to vector<8x32x1xf32>
    %30 = tpu.reciprocal %29 {approx = true} : vector<8x32x1xf32> -> vector<8x32x1xf32>
    %31 = vector.broadcast %30 : vector<8x32x1xf32> to vector<8x32x64xf32>
    %32 = arith.mulf %27, %31 : vector<8x32x64xf32>
    %cst_13 = arith.constant dense<0.000000e+00> : vector<8x32x32xf32>
    %33 = tpu.matmul %32, %9, %cst_13 {dimension_numbers = #tpu.dot_dimension_numbers<[2], [1], [1], [2], [0, 0, 0, 1, 1, 2], [0], [0]>} : vector<8x32x64xf32>, vector<8x64x32xf32>, vector<8x32x32xf32> -> vector<8x32x32xf32>
    %34 = vector.extract_strided_slice %33 {offsets = [0, 0, 0], sizes = [8, 8, 32], strides = [1, 1, 1]} : vector<8x32x32xf32> to vector<8x8x32xf32>
    %35 = vector.extract_strided_slice %33 {offsets = [0, 8, 0], sizes = [8, 8, 32], strides = [1, 1, 1]} : vector<8x32x32xf32> to vector<8x8x32xf32>
    %36 = vector.extract_strided_slice %33 {offsets = [0, 16, 0], sizes = [8, 8, 32], strides = [1, 1, 1]} : vector<8x32x32xf32> to vector<8x8x32xf32>
    %37 = vector.extract_strided_slice %33 {offsets = [0, 24, 0], sizes = [8, 8, 32], strides = [1, 1, 1]} : vector<8x32x32xf32> to vector<8x8x32xf32>
    %38 = tpu.concatenate %34, %35, %36, %37 in 2 : vector<8x8x32xf32>, vector<8x8x32xf32>, vector<8x8x32xf32>, vector<8x8x32xf32> -> vector<8x8x128xf32>
    %39 = vector.shape_cast %38 : vector<8x8x128xf32> to vector<64x128xf32>
    %c0_14 = arith.constant 0 : index
    %c0_15 = arith.constant 0 : index
    %40 = vector.load %arg5[%c0_14, %c0_15] : memref<128x32xf32, #tpu.memory_space<vmem>>, vector<128x32xf32>
    %cst_16 = arith.constant dense<0.000000e+00> : vector<64x32xf32>
    %41 = tpu.matmul %39, %40, %cst_16 {dimension_numbers = #tpu.dot_dimension_numbers<[1], [0], [0], [1], [0, 0, 1, 1], [], []>} : vector<64x128xf32>, vector<128x32xf32>, vector<64x32xf32> -> vector<64x32xf32>
    %42 = vector.extract_strided_slice %1 {offsets = [0, 0], sizes = [1, 32], strides = [1, 1]} : vector<8x32xf32> to vector<1x32xf32>
    %43 = vector.broadcast %42 : vector<1x32xf32> to vector<64x32xf32>
    %44 = arith.addf %41, %43 : vector<64x32xf32>
    %cst_17 = arith.constant dense<0.000000e+00> : vector<64xf32>
    %45 = vector.multi_reduction <add>, %44, %cst_17 [1] : vector<64x32xf32> to vector<64xf32>
    %46 = vector.shape_cast %45 : vector<64xf32> to vector<64x1xf32>
    %cst_18 = arith.constant 3.200000e+01 : f32
    %47 = vector.broadcast %cst_18 : f32 to vector<64x1xf32>
    %48 = arith.divf %46, %47 : vector<64x1xf32>
    %49 = vector.broadcast %48 : vector<64x1xf32> to vector<64x32xf32>
    %50 = arith.subf %44, %49 : vector<64x32xf32>
    %51 = arith.mulf %50, %50 : vector<64x32xf32>
    %cst_19 = arith.constant dense<0.000000e+00> : vector<64xf32>
    %52 = vector.multi_reduction <add>, %51, %cst_19 [1] : vector<64x32xf32> to vector<64xf32>
    %53 = vector.shape_cast %52 : vector<64xf32> to vector<64x1xf32>
    %cst_20 = arith.constant 3.200000e+01 : f32
    %54 = vector.broadcast %cst_20 : f32 to vector<64x1xf32>
    %55 = arith.divf %53, %54 : vector<64x1xf32>
    %56 = vector.broadcast %48 : vector<64x1xf32> to vector<64x32xf32>
    %57 = arith.subf %44, %56 : vector<64x32xf32>
    %cst_21 = arith.constant 9.99999974E-6 : f32
    %58 = vector.broadcast %cst_21 : f32 to vector<64x1xf32>
    %59 = arith.addf %55, %58 : vector<64x1xf32>
    %60 = math.rsqrt %59 : vector<64x1xf32>
    %61 = vector.broadcast %60 : vector<64x1xf32> to vector<64x32xf32>
    %62 = arith.mulf %57, %61 : vector<64x32xf32>
    %63 = vector.extract_strided_slice %1 {offsets = [1, 0], sizes = [1, 32], strides = [1, 1]} : vector<8x32xf32> to vector<1x32xf32>
    %64 = vector.broadcast %63 : vector<1x32xf32> to vector<64x32xf32>
    %65 = arith.mulf %62, %64 : vector<64x32xf32>
    %66 = vector.extract_strided_slice %1 {offsets = [2, 0], sizes = [1, 32], strides = [1, 1]} : vector<8x32xf32> to vector<1x32xf32>
    %67 = vector.broadcast %66 : vector<1x32xf32> to vector<64x32xf32>
    %68 = arith.addf %65, %67 : vector<64x32xf32>
    %c0_22 = arith.constant 0 : index
    %c0_23 = arith.constant 0 : index
    %69 = vector.load %arg7[%c0_22, %c0_23] : memref<64x32xf32, #tpu.memory_space<vmem>>, vector<64x32xf32>
    tpu.vector_store %arg7[%c0_22, %c0_23], %68 {strides = array<i32>} : memref<64x32xf32, #tpu.memory_space<vmem>>, vector<64x32xf32>,
    %70 = vector.extract_strided_slice %32 {offsets = [0, 0, 0], sizes = [8, 8, 64], strides = [1, 1, 1]} : vector<8x32x64xf32> to vector<8x8x64xf32>
    %71 = vector.extract_strided_slice %32 {offsets = [0, 8, 0], sizes = [8, 8, 64], strides = [1, 1, 1]} : vector<8x32x64xf32> to vector<8x8x64xf32>
    %72 = arith.addf %70, %71 : vector<8x8x64xf32>
    %73 = vector.extract_strided_slice %32 {offsets = [0, 16, 0], sizes = [8, 8, 64], strides = [1, 1, 1]} : vector<8x32x64xf32> to vector<8x8x64xf32>
    %74 = arith.addf %72, %73 : vector<8x8x64xf32>
    %75 = vector.extract_strided_slice %32 {offsets = [0, 24, 0], sizes = [8, 8, 64], strides = [1, 1, 1]} : vector<8x32x64xf32> to vector<8x8x64xf32>
    %76 = arith.addf %74, %75 : vector<8x8x64xf32>
    %cst_24 = arith.constant 2.500000e-01 : f32
    %77 = vector.broadcast %cst_24 : f32 to vector<8x8x64xf32>
    %78 = arith.mulf %76, %77 : vector<8x8x64xf32>
    %cst_25 = arith.constant 9.99999993E-9 : f32
    %79 = vector.broadcast %cst_25 : f32 to vector<8x8x64xf32>
    %80 = arith.addf %78, %79 : vector<8x8x64xf32>
    %81 = math.log %80 : vector<8x8x64xf32>
    %cst_26 = arith.constant 0.000000e+00 : f32
    %82 = vector.shape_cast %18 : vector<8x1x64xi1> to vector<8x1x64xi1>
    %83 = vector.broadcast %82 : vector<8x1x64xi1> to vector<8x8x64xi1>
    %84 = vector.broadcast %cst_26 : f32 to vector<8x8x64xf32>
    %85 = arith.select %83, %81, %84 : vector<8x8x64xi1>, vector<8x8x64xf32>
    %cst_27 = arith.constant dense<0.000000e+00> : vector<8x8xf32>
    %86 = vector.multi_reduction <add>, %85, %cst_27 [2] : vector<8x8x64xf32> to vector<8x8xf32>
    %cst_28 = arith.constant dense<0.000000e+00> : vector<8xf32>
    %87 = vector.multi_reduction <add>, %86, %cst_28 [1] : vector<8x8xf32> to vector<8xf32>
    %88 = vector.shape_cast %87 : vector<8xf32> to vector<8x1xf32>
    %89 = arith.sitofp %14 : vector<8x1xi32> to vector<8x1xf32>
    %cst_29 = arith.constant 8.000000e+00 : f32
    %90 = vector.broadcast %cst_29 : f32 to vector<8x1xf32>
    %91 = arith.mulf %90, %89 : vector<8x1xf32>
    %92 = arith.divf %88, %91 : vector<8x1xf32>
    %93 = tpu.iota {dimensions = array<i32: 0>} : vector<8x64xi32>
    %94 = tpu.iota {dimensions = array<i32: 1>} : vector<8x64xi32>
    %c8_i32 = arith.constant 8 : i32
    %95 = vector.broadcast %c8_i32 : i32 to vector<8x64xi32>
    %96 = arith.muli %93, %95 : vector<8x64xi32>
    %97 = arith.cmpi sge, %94, %96 : vector<8x64xi32>
    %c1_i32 = arith.constant 1 : i32
    %98 = vector.broadcast %c1_i32 : i32 to vector<8x64xi32>
    %99 = arith.addi %93, %98 : vector<8x64xi32>
    %c8_i32_30 = arith.constant 8 : i32
    %100 = vector.broadcast %c8_i32_30 : i32 to vector<8x64xi32>
    %101 = arith.muli %99, %100 : vector<8x64xi32>
    %102 = arith.cmpi slt, %94, %101 : vector<8x64xi32>
    %103 = arith.andi %97, %102 : vector<8x64xi1>
    %cst_31 = arith.constant 1.250000e-01 : f32
    %cst_32 = arith.constant 0.000000e+00 : f32
    %104 = vector.broadcast %cst_31 : f32 to vector<8x64xf32>
    %105 = vector.broadcast %cst_32 : f32 to vector<8x64xf32>
    %106 = arith.select %103, %104, %105 : vector<8x64xi1>, vector<8x64xf32>
    %cst_33 = arith.constant dense<0.000000e+00> : vector<8x32xf32>
    %107 = tpu.matmul %106, %68, %cst_33 {dimension_numbers = #tpu.dot_dimension_numbers<[1], [0], [0], [1], [0, 0, 1, 1], [], []>} : vector<8x64xf32>, vector<64x32xf32>, vector<8x32xf32> -> vector<8x32xf32>
    %108 = vector.extract_strided_slice %1 {offsets = [3, 0], sizes = [1, 32], strides = [1, 1]} : vector<8x32xf32> to vector<1x32xf32>
    %109 = vector.broadcast %108 : vector<1x32xf32> to vector<8x32xf32>
    %110 = arith.mulf %107, %109 : vector<8x32xf32>
    %cst_34 = arith.constant dense<0.000000e+00> : vector<8xf32>
    %111 = vector.multi_reduction <add>, %110, %cst_34 [1] : vector<8x32xf32> to vector<8xf32>
    %112 = vector.shape_cast %111 : vector<8xf32> to vector<8x1xf32>
    %113 = vector.extract_strided_slice %1 {offsets = [4, 0], sizes = [1, 1], strides = [1, 1]} : vector<8x32xf32> to vector<1x1xf32>
    %114 = vector.broadcast %113 : vector<1x1xf32> to vector<8x1xf32>
    %115 = arith.addf %112, %114 : vector<8x1xf32>
    %116 = tpu.iota {dimensions = array<i32: 1>} : vector<8x128xi32>
    %c0_i32 = arith.constant 0 : i32
    %117 = vector.broadcast %c0_i32 : i32 to vector<8x128xi32>
    %118 = arith.cmpi eq, %116, %117 : vector<8x128xi32>
    %cst_35 = arith.constant 0.000000e+00 : f32
    %119 = vector.shape_cast %115 : vector<8x1xf32> to vector<8x1xf32>
    %120 = vector.broadcast %119 : vector<8x1xf32> to vector<8x128xf32>
    %121 = vector.broadcast %cst_35 : f32 to vector<8x128xf32>
    %122 = arith.select %118, %120, %121 : vector<8x128xi1>, vector<8x128xf32>
    %c1_i32_36 = arith.constant 1 : i32
    %123 = vector.broadcast %c1_i32_36 : i32 to vector<8x128xi32>
    %124 = arith.cmpi eq, %116, %123 : vector<8x128xi32>
    %cst_37 = arith.constant 0.000000e+00 : f32
    %125 = vector.shape_cast %92 : vector<8x1xf32> to vector<8x1xf32>
    %126 = vector.broadcast %125 : vector<8x1xf32> to vector<8x128xf32>
    %127 = vector.broadcast %cst_37 : f32 to vector<8x128xf32>
    %128 = arith.select %124, %126, %127 : vector<8x128xi1>, vector<8x128xf32>
    %129 = arith.addf %122, %128 : vector<8x128xf32>
    %c0_38 = arith.constant 0 : index
    %c0_39 = arith.constant 0 : index
    %130 = vector.load %arg8[%c0_38, %c0_39] : memref<8x128xf32, #tpu.memory_space<vmem>>, vector<8x128xf32>
    tpu.vector_store %arg8[%c0_38, %c0_39], %129 {strides = array<i32>} : memref<8x128xf32, #tpu.memory_space<vmem>>, vector<8x128xf32>,
    return
  }
  func.func @transform_0(%arg0: i32) -> (i32, i32) {
    %c0_i32 = arith.constant 0 : i32
    %c0_i32_0 = arith.constant 0 : i32
    return %arg0, %c0_i32 : i32, i32
  }
  func.func @transform_1(%arg0: i32) -> (i32, i32) {
    %c0_i32 = arith.constant 0 : i32
    %c0_i32_0 = arith.constant 0 : i32
    return %arg0, %c0_i32 : i32, i32
  }
  func.func @transform_2(%arg0: i32) -> (i32, i32) {
    %c0_i32 = arith.constant 0 : i32
    %c0_i32_0 = arith.constant 0 : i32
    %c0_i32_1 = arith.constant 0 : i32
    return %c0_i32, %c0_i32_0 : i32, i32
  }
  func.func @transform_3(%arg0: i32) -> (i32, i32) {
    %c0_i32 = arith.constant 0 : i32
    %c0_i32_0 = arith.constant 0 : i32
    %c0_i32_1 = arith.constant 0 : i32
    return %c0_i32, %c0_i32_0 : i32, i32
  }
  func.func @transform_4(%arg0: i32) -> (i32, i32) {
    %c0_i32 = arith.constant 0 : i32
    %c0_i32_0 = arith.constant 0 : i32
    %c0_i32_1 = arith.constant 0 : i32
    return %c0_i32, %c0_i32_0 : i32, i32
  }
  func.func @transform_5(%arg0: i32) -> (i32, i32) {
    %c0_i32 = arith.constant 0 : i32
    %c0_i32_0 = arith.constant 0 : i32
    %c0_i32_1 = arith.constant 0 : i32
    return %c0_i32, %c0_i32_0 : i32, i32
  }
  func.func @transform_6(%arg0: i32) -> (i32, i32) {
    %c0_i32 = arith.constant 0 : i32
    %c0_i32_0 = arith.constant 0 : i32
    return %arg0, %c0_i32 : i32, i32
  }
  func.func @transform_7(%arg0: i32) -> (i32, i32) {
    %c0_i32 = arith.constant 0 : i32
    %c0_i32_0 = arith.constant 0 : i32
    return %arg0, %c0_i32 : i32, i32
  }
}

</mosaic_0001>

<bundles_post_ra>
// kernel: tpu_custom_call.1
= control target key start
LH: loop header
LB: loop body
LE: loop exit
PB: predicated region body
PF: predicated region fallthrough
CT: control target
= control target key end

     0   :  { %13 = vsyncpa [#allocation3], 0  ;;  %s5211_s0 = inlined_call_operand.vmem [shape: s32[1024,1], index: 0, kind: input, shape index: {}]   ;;  %s5212_s1 = inlined_call_operand.vmem [shape: s32[16,1], index: 1, kind: input, shape index: {}]   ;;  %s5213_s2 = inlined_call_operand.vmem [shape: f32[128,32], index: 2, kind: input, shape index: {}]   ;;  %s5214_s3 = inlined_call_operand.vmem [shape: f32[32,32], index: 3, kind: input, shape index: {}]   ;;  %s5215_s4 = inlined_call_operand.vmem [shape: f32[128,32], index: 4, kind: input, shape index: {}]   ;;  %s5216_s5 = inlined_call_operand.vmem [shape: f32[8,32], index: 5, kind: input, shape index: {}]   ;;  %s5217_s6 = inlined_call_operand.vmem [shape: f32[128,32], index: 6, kind: output, shape index: {0}]   ;;  %s5218_s7 = inlined_call_operand.hbm [shape: f32[16,128], index: 7, kind: output, shape index: {1}]  }
   0x1   :  { %15 = vsyncpa [#allocation3 + $0x1], 0  ;;  %s3582_s24 = smov 0   ;;  %s3584_s25 = smov 0  }
   0x2   :  { %s3586_s26 = smov 0   ;;  %s3588_s27 = smov 0  }
   0x3 LB: > { %s3603_s28 = sadd.s32 4294967295, %s3533_s27   ;;  %s2908_s29 = sadd.s32 4294967294, %s3533_s27   ;;  %s3533_s27 = sphi %s3588_s27, %s5252_s27   ;;  %s3529_s26 = sphi %s3586_s26, %s5251_s26   ;;  %s3525_s25 = sphi %s3584_s25, %s5250_s25   ;;  %s3521_s24 = sphi %s3582_s24, %s5249_s24  }
   0x4   : > { %s3607_s30 = sadd.s32 1, %s3533_s27   ;;  %s190_s8 = sadd.s32 1, %s3529_s26 }
   0x5   : > { %s187_s9 = ssub.s32 %s3533_s27, %s3607_s30  ;;  %p200_p0 = scmp.ne.s32.totalorder %s3529_s26, %s3525_s25 }
   0x6   : > { %p188_p1 = scmp.eq.s32.totalorder %s187_s9, 0  ;;  %p201_p2 = scmp.eq.s32.totalorder %s3603_s28, 1 }
   0x7   : > { %p206_p3 = scmp.ne.s32.totalorder %s3525_s25, %s3521_s24  ;;  %p207_p4 = scmp.eq.s32.totalorder %s2908_s29, 1 }
   0x8   : > { %s3618_s10 = scalar_select %p188_p1, %s3529_s26, %s190_s8  }
   0x9   : > { %p3620_p5 = por %p201_p2, %p200_p0  ;;  %p3624_p6 = por %p207_p4, %p206_p3 }
   0xa   : > { %p2911_p7 = scmp.ge.s32.totalorder %s3533_s27, 1  ;;  %p253_p8 = scmp.lt.s32.totalorder %s3533_s27, 3 }
   0xc   : > { %p254_p9 = pnand %p2911_p7, %p253_p8 }
   0xe   : > { %257 = sbr.rel (%p254_p9) target bundleno = 2113 (0x841), region = 44 }
  0x13   : > { %s2913_s13 = sshll.u32 %s3603_s28, 6  ;;  %v3535_v0 = vmov 0   ;;  %v776_v22 = vld [vmem:[%s5213_s2 + $0x78] sm:$0xff]  ;;  %v775_v23 = vld [vmem:[%s5213_s2 + $0x70] sm:$0xff]  ;;  %v774_v27 = vld [vmem:[%s5213_s2 + $0x68] sm:$0xff]  ;;  %v5219_v62 = vlaneseq  ;;  %p300_p11 = scmp.lt.s32.totalorder %s3603_s28, 1 }
  0x14   : > { %3275 = vset.pattern.permute.xlu2 %v3535_v0  ;;  %3274 = vset.pattern.permute.xlu1 %v3535_v0  ;;  %p295_p10 = scmp.lt.s32.totalorder %s2913_s13, 127  ;;  %v773_v28 = vld [vmem:[%s5213_s2 + $0x60] sm:$0xff]  ;;  %v772_v29 = vld [vmem:[%s5213_s2 + $0x58] sm:$0xff]  ;;  %v771_v33 = vld [vmem:[%s5213_s2 + $0x50] sm:$0xff]  ;;  %s3537_s23 = smov 32  }
  0x15   : > { %3273 = vset.pattern.permute.xlu0 %v3535_v0  ;;  %777 = vmatpush.msra.mxu0 %v776_v22  ;;  %v770_v34 = vld [vmem:[%s5213_s2 + $0x48] sm:$0xff]  ;;  %v769_v35 = vld [vmem:[%s5213_s2 + $0x40] sm:$0xff]  ;;  %v768_v36 = vld [vmem:[%s5213_s2 + $0x38] sm:$0xff]  ;;  %s301_s29 = scalar_select %p300_p11, %s3603_s28, 1 }
  0x16   : > { %s5254_s13 = smov (!%p295_p10, %s2913_s13), 127  ;;  %3181 = vmatpush.msra.mxu3 %v776_v22  ;;  %3179 = vmatpush.msra.mxu1 %v776_v22  ;;  %v767_v40 = vld [vmem:[%s5213_s2 + $0x30] sm:$0xff]  ;;  %v766_v41 = vld [vmem:[%s5213_s2 + $0x28] sm:$0xff]  ;;  %v765_v42 = vld [vmem:[%s5213_s2 + $0x20] sm:$0xff]  ;;  %s3491_s16 = scalar_lea.hbm %s5218_s7, 16 }
  0x17   : > { %s2914_s14 = sshll.u32 %s5254_s13, 3  ;;  %3180 = vmatpush.msra.mxu2 %v776_v22  ;;  %778 = vmatpush.msra.mxu0 %v775_v23  ;;  %v764_v43 = vld [vmem:[%s5213_s2 + $0x18] sm:$0xff]  ;;  %v763_v47 = vld [vmem:[%s5213_s2 + $0x10] sm:$0xff]  ;;  %v762_v48 = vld [vmem:[%s5213_s2 + $0x8] sm:$0xff]  ;;  %s2915_s8 = sshll.u32 %s301_s29, 3 }
  0x18   : > { %s3634_s17 = scalar_lea.vmem %s5211_s0, %s2914_s14  ;;  %3184 = vmatpush.msra.mxu3 %v775_v23  ;;  %3182 = vmatpush.msra.mxu1 %v775_v23  ;;  %v761_v49 = vld [vmem:[%s5213_s2] sm:$0xff]  ;;  %s3801_s14 = scalar_lea.vmem %s5212_s1, %s2915_s8 }
  0x19   : > { %v314_v1 = vld [vmem:[%s3634_s17 + $0x20] sm:$0xff]  ;;  %v312_v2 = vld [vmem:[%s3634_s17 + $0x10] sm:$0xff]  ;;  %v315_v4 = vld [vmem:[%s3634_s17 + $0x28] sm:$0xff]  ;;  %3183 = vmatpush.msra.mxu2 %v775_v23  ;;  %779 = vmatpush.msra.mxu0 %v774_v27  ;;  %s3538_s29 = smov 64   ;;  %s3539_s8 = smov 96  }
  0x1a   : > { %v310_v3 = vld [vmem:[%s3634_s17] sm:$0xff]  ;;  %390 = vperm.xlu2 %3275, %v314_v1   ;;  %384 = vperm.xlu1 %3274, %v312_v2   ;;  %v313_v5 = vld [vmem:[%s3634_s17 + $0x18] sm:$0xff]  ;;  %v311_v6 = vld [vmem:[%s3634_s17 + $0x8] sm:$0xff]  ;;  %v3736_v2 = vand.u32 127, %v5219_v62 }
  0x1b   : > { %378 = vperm.xlu0 %3273, %v310_v3   ;;  %v318_v7 = vld [vmem:[%s3634_s17 + $0x40] sm:$0xff]  ;;  %v317_v8 = vld [vmem:[%s3634_s17 + $0x38] sm:$0xff]  ;;  %v316_v9 = vld [vmem:[%s3634_s17 + $0x30] sm:$0xff]  ;;  %3187 = vmatpush.msra.mxu3 %v774_v27 }
  0x1c   : > { %v321_v10 = vld [vmem:[%s3634_s17 + $0x58] sm:$0xff]  ;;  %v320_v11 = vld [vmem:[%s3634_s17 + $0x50] sm:$0xff]  ;;  %v319_v12 = vld [vmem:[%s3634_s17 + $0x48] sm:$0xff]  ;;  %3185 = vmatpush.msra.mxu1 %v774_v27  ;;  %3186 = vmatpush.msra.mxu2 %v774_v27 }
  0x1d   : > { %v324_v13 = vld [vmem:[%s3634_s17 + $0x70] sm:$0xff]  ;;  %v323_v14 = vld [vmem:[%s3634_s17 + $0x68] sm:$0xff]  ;;  %v322_v15 = vld [vmem:[%s3634_s17 + $0x60] sm:$0xff]  ;;  %780 = vmatpush.msra.mxu0 %v773_v28  ;;  %3190 = vmatpush.msra.mxu3 %v773_v28 }
  0x1e   : > { %v327_v16 = vld [vmem:[%s3634_s17 + $0x88] sm:$0xff]  ;;  %v326_v17 = vld [vmem:[%s3634_s17 + $0x80] sm:$0xff]  ;;  %v325_v18 = vld [vmem:[%s3634_s17 + $0x78] sm:$0xff]  ;;  %3188 = vmatpush.msra.mxu1 %v773_v28  ;;  %3189 = vmatpush.msra.mxu2 %v773_v28 }
  0x1f   : > { %v330_v19 = vld [vmem:[%s3634_s17 + $0xa0] sm:$0xff]  ;;  %v329_v20 = vld [vmem:[%s3634_s17 + $0x98] sm:$0xff]  ;;  %v328_v21 = vld [vmem:[%s3634_s17 + $0x90] sm:$0xff]  ;;  %781 = vmatpush.msra.mxu0 %v772_v29  ;;  %3193 = vmatpush.msra.mxu3 %v772_v29 }
  0x20   : > { %v360_v24 = vld [vmem:[%s3634_s17 + $0x190] sm:$0xff]  ;;  %v331_v26 = vld [vmem:[%s3634_s17 + $0xa8] sm:$0xff]  ;;  %v334_v30 = vld [vmem:[%s3634_s17 + $0xc0] sm:$0xff]  ;;  %3191 = vmatpush.msra.mxu1 %v772_v29  ;;  %3192 = vmatpush.msra.mxu2 %v772_v29 }
  0x21   : > { %v332_v25 = vld [vmem:[%s3634_s17 + $0xb0] sm:$0xff]  ;;  %v361_v31 = vld [vmem:[%s3634_s17 + $0x198] sm:$0xff]  ;;  %782 = vmatpush.msra.mxu0 %v771_v33  ;;  %3196 = vmatpush.msra.mxu3 %v771_v33  ;;  %v335_v37 = vld [vmem:[%s3634_s17 + $0xc8] sm:$0xff] }
  0x22   : > { %393 = vperm.xlu2 %3275, %v315_v4   ;;  %387 = vperm.xlu1 %3274, %v313_v5   ;;  %v333_v32 = vld [vmem:[%s3634_s17 + $0xb8] sm:$0xff]  ;;  %v362_v38 = vld [vmem:[%s3634_s17 + $0x1a0] sm:$0xff]  ;;  %v336_v44 = vld [vmem:[%s3634_s17 + $0xd0] sm:$0xff] }
  0x23   : > { %381 = vperm.xlu0 %3273, %v311_v6   ;;  %3194 = vmatpush.msra.mxu1 %v771_v33  ;;  %v345_v39 = vld [vmem:[%s3634_s17 + $0x118] sm:$0xff]  ;;  %v363_v45 = vld [vmem:[%s3634_s17 + $0x1a8] sm:$0xff]  ;;  %v346_v46 = vld [vmem:[%s3634_s17 + $0x120] sm:$0xff]  ;;  %v3536_v6 = vmov 1.0  }
  0x24   : > { %783 = vmatpush.msra.mxu0 %v770_v34  ;;  %3195 = vmatpush.msra.mxu2 %v771_v33  ;;  %v337_v50 = vld [vmem:[%s3634_s17 + $0xd8] sm:$0xff]  ;;  %v364_v51 = vld [vmem:[%s3634_s17 + $0x1b0] sm:$0xff]  ;;  %v347_v52 = vld [vmem:[%s3634_s17 + $0x128] sm:$0xff] }
  0x25   : > { %3199 = vmatpush.msra.mxu3 %v770_v34  ;;  %3197 = vmatpush.msra.mxu1 %v770_v34  ;;  %v338_v54 = vld [vmem:[%s3634_s17 + $0xe0] sm:$0xff]  ;;  %v365_v55 = vld [vmem:[%s3634_s17 + $0x1b8] sm:$0xff]  ;;  %v348_v56 = vld [vmem:[%s3634_s17 + $0x130] sm:$0xff] }
  0x26   : > { %784 = vmatpush.msra.mxu0 %v769_v35  ;;  %3198 = vmatpush.msra.mxu2 %v770_v34  ;;  %v339_v58 = vld [vmem:[%s3634_s17 + $0xe8] sm:$0xff]  ;;  %v366_v59 = vld [vmem:[%s3634_s17 + $0x1c0] sm:$0xff]  ;;  %v349_v60 = vld [vmem:[%s3634_s17 + $0x138] sm:$0xff] }
  0x27   : > { %3202 = vmatpush.msra.mxu3 %v769_v35  ;;  %3200 = vmatpush.msra.mxu1 %v769_v35  ;;  %v340_v63 = vld [vmem:[%s3634_s17 + $0xf0] sm:$0xff]  ;;  %v367_v0 = vld [vmem:[%s3634_s17 + $0x1c8] sm:$0xff]  ;;  %v350_v1 = vld [vmem:[%s3634_s17 + $0x140] sm:$0xff] }
  0x28   : > { %785 = vmatpush.msra.mxu0 %v768_v36  ;;  %3201 = vmatpush.msra.mxu2 %v769_v35  ;;  %v357_v27 = vld [vmem:[%s3634_s17 + $0x178] sm:$0xff]  ;;  %v343_v33 = vld [vmem:[%s3634_s17 + $0x108] sm:$0xff] }
  0x29   : > { %3205 = vmatpush.msra.mxu3 %v768_v36  ;;  %3203 = vmatpush.msra.mxu1 %v768_v36 }
  0x2a   : > { %402 = vperm.xlu2 %3275, %v318_v7   ;;  %399 = vperm.xlu1 %3274, %v317_v8   ;;  %v341_v7 = vld [vmem:[%s3634_s17 + $0xf8] sm:$0xff]  ;;  %v368_v8 = vld [vmem:[%s3634_s17 + $0x1d0] sm:$0xff] }
  0x2b   : > { %396 = vperm.xlu0 %3273, %v316_v9   ;;  %786 = vmatpush.msra.mxu0 %v767_v40  ;;  %v351_v9 = vld [vmem:[%s3634_s17 + $0x148] sm:$0xff] }
  0x2c   : > { %3204 = vmatpush.msra.mxu2 %v768_v36  ;;  %3208 = vmatpush.msra.mxu3 %v767_v40 }
  0x2d   : > { %787 = vmatpush.msra.mxu0 %v766_v41  ;;  %3206 = vmatpush.msra.mxu1 %v767_v40 }
  0x2e   : > { %3207 = vmatpush.msra.mxu2 %v767_v40  ;;  %3211 = vmatpush.msra.mxu3 %v766_v41  ;;  %v1427_v40 = vld [vmem:[%s3801_s14] sm:$0xff] }
  0x2f   : > { %788 = vmatpush.msra.mxu0 %v765_v42  ;;  %3209 = vmatpush.msra.mxu1 %v766_v41 }
  0x30   : > { %3210 = vmatpush.msra.mxu2 %v766_v41  ;;  %3214 = vmatpush.msra.mxu3 %v765_v42 }
  0x31   : > { %789 = vmatpush.msra.mxu0 %v764_v43  ;;  %3212 = vmatpush.msra.mxu1 %v765_v42 }
  0x32   : > { %411 = vperm.xlu2 %3275, %v321_v10   ;;  %408 = vperm.xlu1 %3274, %v320_v11  }
  0x33   : > { %405 = vperm.xlu0 %3273, %v319_v12   ;;  %790 = vmatpush.msra.mxu0 %v763_v47 }
  0x34   : > { %3213 = vmatpush.msra.mxu2 %v765_v42  ;;  %3217 = vmatpush.msra.mxu3 %v764_v43 }
  0x35   : > { %791 = vmatpush.msra.mxu0 %v762_v48  ;;  %3215 = vmatpush.msra.mxu1 %v764_v43 }
  0x36   : > { %3216 = vmatpush.msra.mxu2 %v764_v43  ;;  %3220 = vmatpush.msra.mxu3 %v763_v47 }
  0x37   : > { %792 = vmatpush.msra.mxu0 %v761_v49  ;;  %3218 = vmatpush.msra.mxu1 %v763_v47 }
  0x38   : > { %3219 = vmatpush.msra.mxu2 %v763_v47  ;;  %3223 = vmatpush.msra.mxu3 %v762_v48 }
  0x39   : > { %3221 = vmatpush.msra.mxu1 %v762_v48 }
  0x3a   : > { %420 = vperm.xlu2 %3275, %v324_v13   ;;  %417 = vperm.xlu1 %3274, %v323_v14   ;;  %v356_v13 = vld [vmem:[%s3634_s17 + $0x170] sm:$0xff]  ;;  %v369_v14 = vld [vmem:[%s3634_s17 + $0x1d8] sm:$0xff] }
  0x3b   : > { %414 = vperm.xlu0 %3273, %v322_v15   ;;  %3222 = vmatpush.msra.mxu2 %v762_v48  ;;  %v352_v15 = vld [vmem:[%s3634_s17 + $0x150] sm:$0xff] }
  0x3c   : > { %3226 = vmatpush.msra.mxu3 %v761_v49  ;;  %3224 = vmatpush.msra.mxu1 %v761_v49 }
  0x3d   : > { %3225 = vmatpush.msra.mxu2 %v761_v49  ;;  %v1433_v49 = vrot.slane %v1427_v40, 6 }
  0x42   : > { %429 = vperm.xlu2 %3275, %v327_v16   ;;  %426 = vperm.xlu1 %3274, %v326_v17  }
  0x43   : > { %423 = vperm.xlu0 %3273, %v325_v18  }
  0x4a   : > { %438 = vperm.xlu2 %3275, %v330_v19   ;;  %435 = vperm.xlu1 %3274, %v329_v20   ;;  %v342_v19 = vld [vmem:[%s3634_s17 + $0x100] sm:$0xff] }
  0x4b   : > { %432 = vperm.xlu0 %3273, %v328_v21   ;;  %v370_v20 = vld [vmem:[%s3634_s17 + $0x1e0] sm:$0xff]  ;;  %v353_v21 = vld [vmem:[%s3634_s17 + $0x158] sm:$0xff] }
  0x52   : > { %528 = vperm.xlu2 %3275, %v360_v24   ;;  %444 = vperm.xlu1 %3274, %v332_v25   ;;  %v371_v25 = vld [vmem:[%s3634_s17 + $0x1e8] sm:$0xff] }
  0x53   : > { %441 = vperm.xlu0 %3273, %v331_v26   ;;  %v354_v26 = vld [vmem:[%s3634_s17 + $0x160] sm:$0xff] }
  0x5a   : > { %450 = vperm.xlu2 %3275, %v334_v30   ;;  %531 = vperm.xlu1 %3274, %v361_v31   ;;  %v372_v31 = vld [vmem:[%s3634_s17 + $0x1f0] sm:$0xff] }
  0x5b   : > { %447 = vperm.xlu0 %3273, %v333_v32   ;;  %v355_v32 = vld [vmem:[%s3634_s17 + $0x168] sm:$0xff] }
  0x62   : > { %453 = vperm.xlu2 %3275, %v335_v37   ;;  %534 = vperm.xlu1 %3274, %v362_v38   ;;  %v358_v37 = vld [vmem:[%s3634_s17 + $0x180] sm:$0xff]  ;;  %v373_v38 = vld [vmem:[%s3634_s17 + $0x1f8] sm:$0xff] }
  0x63   : > { %483 = vperm.xlu0 %3273, %v345_v39   ;;  %v344_v39 = vld [vmem:[%s3634_s17 + $0x110] sm:$0xff] }
  0x6a   : > { %456 = vperm.xlu2 %3275, %v336_v44   ;;  %537 = vperm.xlu1 %3274, %v363_v45   ;;  %v1428_v44 = vrot.slane %v1427_v40, 1  ;;  %v359_v45 = vld [vmem:[%s3634_s17 + $0x188] sm:$0xff] }
  0x6b   : > { %486 = vperm.xlu0 %3273, %v346_v46  }
  0x72   : > { %459 = vperm.xlu2 %3275, %v337_v50   ;;  %540 = vperm.xlu1 %3274, %v364_v51   ;;  %v1430_v50 = vrot.slane %v1427_v40, 3  ;;  %v1429_v51 = vrot.slane %v1427_v40, 2 }
  0x73   : > { %489 = vperm.xlu0 %3273, %v347_v52  }
  0x74   : > { %v3720_v53 = vpop.permute.xlu2 %390 }
  0x75   : > { %vm573_vm4 = vcmp.eq.s32.totalorder %v3736_v2, %v3720_v53 }
  0x7a   : > { %462 = vperm.xlu2 %3275, %v338_v54   ;;  %543 = vperm.xlu1 %3274, %v365_v55   ;;  %v1434_v55 = vrot.slane %v1427_v40, 7 }
  0x7b   : > { %492 = vperm.xlu0 %3273, %v348_v56   ;;  %v1431_v56 = vrot.slane %v1427_v40, 4 }
  0x7c   : > { %v3725_v57 = vpop.permute.xlu2 %393 }
  0x7d   : > { %vm574_vm6 = vcmp.eq.s32.totalorder %v3736_v2, %v3725_v57 }
  0x82   : > { %465 = vperm.xlu2 %3275, %v339_v58   ;;  %546 = vperm.xlu1 %3274, %v366_v59  }
  0x83   : > { %495 = vperm.xlu0 %3273, %v349_v60   ;;  %v1432_v60 = vrot.slane %v1427_v40, 5 }
  0x84   : > { %v3730_v61 = vpop.permute.xlu2 %402 }
  0x85   : > { %vm577_vm10 = vcmp.eq.s32.totalorder %v3736_v2, %v3730_v61 }
  0x8a   : > { %468 = vperm.xlu2 %3275, %v340_v63   ;;  %549 = vperm.xlu1 %3274, %v367_v0  }
  0x8b   : > { %498 = vperm.xlu0 %3273, %v350_v1  }
  0x8c   : > { %v3738_v3 = vpop.permute.xlu2 %411  ;;  %v385_v4 = vpop.permute.xlu1 %384 }
  0x8d   : > { %v379_v5 = vpop.permute.xlu0 %378  ;;  %vm571_vm2 = vcmp.eq.s32.totalorder %v3736_v2, %v385_v4 }
  0x8e   : > { %vm569_vm0 = vcmp.eq.s32.totalorder %v3736_v2, %v379_v5 }
  0x8f   : > { %2982 = vmatmul.msk.f32.vlgmr.msra.gmra.mxu0 %vm569_vm0, %v3536_v6 }
  0x92   : > { %471 = vperm.xlu2 %3275, %v341_v7   ;;  %552 = vperm.xlu1 %3274, %v368_v8  }
  0x93   : > { %501 = vperm.xlu0 %3273, %v351_v9  }
  0x94   : > { %v3745_v10 = vpop.permute.xlu2 %420  ;;  %v388_v11 = vpop.permute.xlu1 %387 }
  0x95   : > { %v382_v12 = vpop.permute.xlu0 %381  ;;  %vm572_vm3 = vcmp.eq.s32.totalorder %v3736_v2, %v388_v11 }
  0x96   : > { %vm570_vm1 = vcmp.eq.s32.totalorder %v3736_v2, %v382_v12 }
  0x97   : > { %2983 = vmatmul.msk.f32.gmra.mxu0 %vm570_vm1, %v3536_v6 }
  0x9a   : > { %516 = vperm.xlu2 %3275, %v356_v13   ;;  %555 = vperm.xlu1 %3274, %v369_v14  }
  0x9b   : > { %504 = vperm.xlu0 %3273, %v352_v15  }
  0x9c   : > { %v3752_v16 = vpop.permute.xlu2 %429  ;;  %v3754_v17 = vpop.permute.xlu1 %399 }
  0x9d   : > { %v397_v18 = vpop.permute.xlu0 %396  ;;  %vm576_vm8 = vcmp.eq.s32.totalorder %v3736_v2, %v3754_v17 }
  0x9e   : > { %vm575_vm7 = vcmp.eq.s32.totalorder %v3736_v2, %v397_v18 }
  0x9f   : > { %2984 = vmatmul.msk.f32.gmra.mxu0 %vm571_vm2, %v3536_v6  ;;  %vm580_vm2 = vcmp.eq.s32.totalorder %v3736_v2, %v3738_v3 }
  0xa2   : > { %474 = vperm.xlu2 %3275, %v342_v19   ;;  %558 = vperm.xlu1 %3274, %v370_v20  }
  0xa3   : > { %507 = vperm.xlu0 %3273, %v353_v21  }
  0xa4   : > { %v3761_v22 = vpop.permute.xlu2 %438  ;;  %v3763_v23 = vpop.permute.xlu1 %408 }
  0xa5   : > { %v3765_v24 = vpop.permute.xlu0 %405  ;;  %vm579_vm15 = vcmp.eq.s32.totalorder %v3736_v2, %v3763_v23 }
  0xa6   : > { %vm578_vm12 = vcmp.eq.s32.totalorder %v3736_v2, %v3765_v24 }
  0xa7   : > { %2985 = vmatmul.msk.f32.gmra.mxu0 %vm572_vm3, %v3536_v6 }
  0xaa   : > { %561 = vperm.xlu2 %3275, %v371_v25   ;;  %510 = vperm.xlu1 %3274, %v354_v26  }
  0xab   : > { %519 = vperm.xlu0 %3273, %v357_v27  }
  0xac   : > { %v529_v28 = vpop.permute.xlu2 %528  ;;  %v3772_v29 = vpop.permute.xlu1 %417 }
  0xad   : > { %v3776_v30 = vpop.permute.xlu0 %414  ;;  %vm619_vm5 = vcmp.eq.s32.totalorder %v3736_v2, %v529_v28 }
  0xae   : > { %3032 = vmatmul.msk.f32.vlgmr.msra.gmra.mxu3 %vm619_vm5, %v3536_v6  ;;  %vm581_vm5 = vcmp.eq.s32.totalorder %v3736_v2, %v3776_v30 }
  0xaf   : > { %2986 = vmatmul.msk.f32.gmra.mxu0 %vm573_vm4, %v3536_v6 }
  0xb2   : > { %564 = vperm.xlu2 %3275, %v372_v31   ;;  %513 = vperm.xlu1 %3274, %v355_v32  }
  0xb3   : > { %477 = vperm.xlu0 %3273, %v343_v33  }
  0xb4   : > { %v3786_v34 = vpop.permute.xlu2 %450  ;;  %v3788_v35 = vpop.permute.xlu1 %426 }
  0xb5   : > { %v3790_v36 = vpop.permute.xlu0 %423 }
  0xb7   : > { %2987 = vmatmul.msk.f32.gmra.mxu0 %vm574_vm6, %v3536_v6 }
  0xba   : > { %522 = vperm.xlu2 %3275, %v358_v37   ;;  %567 = vperm.xlu1 %3274, %v373_v38  }
  0xbb   : > { %480 = vperm.xlu0 %3273, %v344_v39  }
  0xbc   : > { %v3804_v41 = vpop.permute.xlu2 %453  ;;  %v3806_v42 = vpop.permute.xlu1 %435 }
  0xbd   : > { %v3808_v43 = vpop.permute.xlu0 %432 }
  0xbf   : > { %2988 = vmatmul.msk.f32.gmra.mxu0 %vm575_vm7, %v3536_v6 }
  0xc2   : > { %1440 = vperm.xlu2 %3275, %v1428_v44   ;;  %1436 = vperm.xlu1 %3274, %v1427_v40   ;;  %v4006_v44 = vld [vmem:[%s5214_s3 + $0x8] sm:$0xff] }
  0xc3   : > { %525 = vperm.xlu0 %3273, %v359_v45  }
  0xc4   : > { %v3813_v46 = vpop.permute.xlu2 %456  ;;  %v3815_v47 = vpop.permute.xlu1 %444 }
  0xc5   : > { %v3817_v48 = vpop.permute.xlu0 %441 }
  0xc7   : > { %2989 = vmatmul.msk.f32.gmra.mxu0 %vm576_vm8, %v3536_v6 }
  0xca   : > { %1460 = vperm.xlu2 %3275, %v1433_v49   ;;  %1448 = vperm.xlu1 %3274, %v1430_v50   ;;  %v4032_v49 = vld [vmem:[%s5214_s3 + $0x18] sm:$0xff] }
  0xcb   : > { %1444 = vperm.xlu0 %3273, %v1429_v51  }
  0xcc   : > { %v3822_v52 = vpop.permute.xlu2 %459  ;;  %v532_v53 = vpop.permute.xlu1 %531 }
  0xcd   : > { %v3824_v54 = vpop.permute.xlu0 %447  ;;  %vm620_vm9 = vcmp.eq.s32.totalorder %v3736_v2, %v532_v53 }
  0xce   : > { %3033 = vmatmul.msk.f32.gmra.mxu3 %vm620_vm9, %v3536_v6  ;;  %vm582_vm9 = vcmp.eq.s32.totalorder %v3736_v2, %v3772_v29 }
  0xcf   : > { %2990 = vmatmul.msk.f32.gmra.mxu0 %vm577_vm10, %v3536_v6 }
  0xd2   : > { %1464 = vperm.xlu1 %3274, %v1434_v55  }
  0xd3   : > { %1452 = vperm.xlu0 %3273, %v1431_v56  }
  0xd4   : > { %v3831_v57 = vpop.permute.xlu2 %462  ;;  %v535_v58 = vpop.permute.xlu1 %534 }
  0xd5   : > { %vm621_vm11 = vcmp.eq.s32.totalorder %v3736_v2, %v535_v58  ;;  %v484_v59 = vpop.permute.xlu0 %483 }
  0xd6   : > { %vm604_vm13 = vcmp.eq.s32.totalorder %v3736_v2, %v484_v59  ;;  %3034 = vmatmul.msk.f32.gmra.mxu3 %vm621_vm11, %v3536_v6 }
  0xd7   : > { %2991 = vmatmul.msk.f32.gmra.mxu0 %vm578_vm12, %v3536_v6  ;;  %3017 = vmatmul.msk.f32.vlgmr.msra.gmra.mxu1 %vm604_vm13, %v3536_v6  ;;  %vm583_vm12 = vcmp.eq.s32.totalorder %v3736_v2, %v3745_v10 }
  0xdb   : > { %1456 = vperm.xlu0 %3273, %v1432_v60  }
  0xdc   : > { %v3840_v61 = vpop.permute.xlu2 %465  ;;  %v538_v63 = vpop.permute.xlu1 %537 }
  0xdd   : > { %vm622_vm14 = vcmp.eq.s32.totalorder %v3736_v2, %v538_v63  ;;  %v487_v0 = vpop.permute.xlu0 %486 }
  0xde   : > { %vm605_vm0 = vcmp.eq.s32.totalorder %v3736_v2, %v487_v0  ;;  %3035 = vmatmul.msk.f32.gmra.mxu3 %vm622_vm14, %v3536_v6 }
  0xdf   : > { %2992 = vmatmul.msk.f32.gmra.mxu0 %vm579_vm15, %v3536_v6  ;;  %3018 = vmatmul.msk.f32.gmra.mxu1 %vm605_vm0, %v3536_v6  ;;  %vm584_vm15 = vcmp.eq.s32.totalorder %v3736_v2, %v3790_v36 }
  0xe4   : > { %v3849_v1 = vpop.permute.xlu2 %468  ;;  %v541_v4 = vpop.permute.xlu1 %540 }
  0xe5   : > { %vm623_vm1 = vcmp.eq.s32.totalorder %v3736_v2, %v541_v4  ;;  %v490_v5 = vpop.permute.xlu0 %489 }
  0xe6   : > { %vm606_vm3 = vcmp.eq.s32.totalorder %v3736_v2, %v490_v5  ;;  %3036 = vmatmul.msk.f32.gmra.mxu3 %vm623_vm1, %v3536_v6 }
  0xe7   : > { %2993 = vmatmul.msk.f32.gmra.mxu0 %vm580_vm2, %v3536_v6  ;;  %3019 = vmatmul.msk.f32.gmra.mxu1 %vm606_vm3, %v3536_v6  ;;  %vm585_vm3 = vcmp.eq.s32.totalorder %v3736_v2, %v3788_v35 }
  0xec   : > { %v3858_v7 = vpop.permute.xlu2 %471  ;;  %v544_v8 = vpop.permute.xlu1 %543 }
  0xed   : > { %vm624_vm4 = vcmp.eq.s32.totalorder %v3736_v2, %v544_v8  ;;  %v493_v9 = vpop.permute.xlu0 %492 }
  0xee   : > { %vm607_vm6 = vcmp.eq.s32.totalorder %v3736_v2, %v493_v9  ;;  %3037 = vmatmul.msk.f32.gmra.mxu3 %vm624_vm4, %v3536_v6 }
  0xef   : > { %2994 = vmatmul.msk.f32.gmra.mxu0 %vm581_vm5, %v3536_v6  ;;  %3020 = vmatmul.msk.f32.gmra.mxu1 %vm607_vm6, %v3536_v6  ;;  %vm586_vm6 = vcmp.eq.s32.totalorder %v3736_v2, %v3752_v16 }
  0xf4   : > { %v517_v3 = vpop.permute.xlu2 %516  ;;  %v547_v11 = vpop.permute.xlu1 %546 }
  0xf5   : > { %vm615_vm7 = vcmp.eq.s32.totalorder %v3736_v2, %v517_v3  ;;  %vm625_vm8 = vcmp.eq.s32.totalorder %v3736_v2, %v547_v11  ;;  %v496_v12 = vpop.permute.xlu0 %495 }
  0xf6   : > { %vm608_vm10 = vcmp.eq.s32.totalorder %v3736_v2, %v496_v12  ;;  %3028 = vmatmul.msk.f32.vlgmr.msra.gmra.mxu2 %vm615_vm7, %v3536_v6  ;;  %3038 = vmatmul.msk.f32.gmra.mxu3 %vm625_vm8, %v3536_v6 }
  0xf7   : > { %2995 = vmatmul.msk.f32.gmra.mxu0 %vm582_vm9, %v3536_v6  ;;  %3021 = vmatmul.msk.f32.gmra.mxu1 %vm608_vm10, %v3536_v6  ;;  %vm587_vm9 = vcmp.eq.s32.totalorder %v3736_v2, %v3808_v43 }
  0xfc   : > { %v550_v13 = vpop.permute.xlu1 %549  ;;  %v3884_v18 = vpop.permute.xlu2 %474 }
  0xfd   : > { %vm626_vm11 = vcmp.eq.s32.totalorder %v3736_v2, %v550_v13  ;;  %v499_v14 = vpop.permute.xlu0 %498 }
  0xfe   : > { %vm609_vm13 = vcmp.eq.s32.totalorder %v3736_v2, %v499_v14  ;;  %3039 = vmatmul.msk.f32.gmra.mxu3 %vm626_vm11, %v3536_v6 }
  0xff   : > { %2996 = vmatmul.msk.f32.gmra.mxu0 %vm583_vm12, %v3536_v6  ;;  %3022 = vmatmul.msk.f32.gmra.mxu1 %vm609_vm13, %v3536_v6  ;;  %vm588_vm12 = vcmp.eq.s32.totalorder %v3736_v2, %v3806_v42 }
 0x104   : > { %v553_v15 = vpop.permute.xlu1 %552  ;;  %v562_v21 = vpop.permute.xlu2 %561 }
 0x105   : > { %vm627_vm14 = vcmp.eq.s32.totalorder %v3736_v2, %v553_v15  ;;  %v502_v17 = vpop.permute.xlu0 %501  ;;  %vm630_vm10 = vcmp.eq.s32.totalorder %v3736_v2, %v562_v21 }
 0x106   : > { %vm610_vm0 = vcmp.eq.s32.totalorder %v3736_v2, %v502_v17  ;;  %3040 = vmatmul.msk.f32.gmra.mxu3 %vm627_vm14, %v3536_v6 }
 0x107   : > { %2997 = vmatmul.msk.f32.gmra.mxu0 %vm584_vm15, %v3536_v6  ;;  %3023 = vmatmul.msk.f32.gmra.mxu1 %vm610_vm0, %v3536_v6  ;;  %vm589_vm0 = vcmp.eq.s32.totalorder %v3736_v2, %v3761_v22 }
 0x10c   : > { %v3892_v10 = vpop.f32.mrf.mxu0  ;;  %v556_v19 = vpop.permute.xlu1 %555 }
 0x10d   : > { %v505_v20 = vpop.permute.xlu0 %504  ;;  %vm628_vm1 = vcmp.eq.s32.totalorder %v3736_v2, %v556_v19  ;;  %v565_v26 = vpop.permute.xlu2 %564 }
 0x10e   : > { %vm611_vm2 = vcmp.eq.s32.totalorder %v3736_v2, %v505_v20  ;;  %3041 = vmatmul.msk.f32.gmra.mxu3 %vm628_vm1, %v3536_v6  ;;  %vm631_vm13 = vcmp.eq.s32.totalorder %v3736_v2, %v565_v26 }
 0x10f   : > { %2998 = vmatmul.msk.f32.gmra.mxu0 %vm585_vm3, %v3536_v6  ;;  %3024 = vmatmul.msk.f32.gmra.mxu1 %vm611_vm2, %v3536_v6  ;;  %vm590_vm2 = vcmp.eq.s32.totalorder %v3736_v2, %v3817_v48  ;;  %vm591_vm3 = vcmp.eq.s32.totalorder %v3736_v2, %v3815_v47 }
 0x114   : > { %v3901_v23 = vpop.f32.mrf.mxu0  ;;  %v559_v24 = vpop.permute.xlu1 %558 }
 0x115   : > { %v508_v25 = vpop.permute.xlu0 %507  ;;  %vm629_vm4 = vcmp.eq.s32.totalorder %v3736_v2, %v559_v24  ;;  %v523_v16 = vpop.permute.xlu2 %522 }
 0x116   : > { %vm612_vm5 = vcmp.eq.s32.totalorder %v3736_v2, %v508_v25  ;;  %3042 = vmatmul.msk.f32.gmra.mxu3 %vm629_vm4, %v3536_v6  ;;  %vm617_vm14 = vcmp.eq.s32.totalorder %v3736_v2, %v523_v16  ;;  %vm990_vm4 = vcmask 261120  }
 0x117   : > { %2999 = vmatmul.msk.f32.gmra.mxu0 %vm586_vm6, %v3536_v6  ;;  %3025 = vmatmul.msk.f32.gmra.mxu1 %vm612_vm5, %v3536_v6  ;;  %vm592_vm5 = vcmp.eq.s32.totalorder %v3736_v2, %v3824_v54  ;;  %vm593_vm6 = vcmp.eq.s32.totalorder %v3736_v2, %v3786_v34  ;;  %v3994_v34 = vld [vmem:[%s5214_s3] sm:$0xff] }
 0x11c   : > { %v3910_v27 = vpop.f32.mrf.mxu0  ;;  %v511_v28 = vpop.permute.xlu1 %510 }
 0x11d   : > { %v520_v29 = vpop.permute.xlu0 %519  ;;  %vm613_vm7 = vcmp.eq.s32.totalorder %v3736_v2, %v511_v28 }
 0x11e   : > { %vm616_vm8 = vcmp.eq.s32.totalorder %v3736_v2, %v520_v29  ;;  %3043 = vmatmul.msk.f32.gmra.mxu3 %vm630_vm10, %v3536_v6  ;;  %vm597_vm10 = vcmp.eq.s32.totalorder %v3736_v2, %v3831_v57 }
 0x11f   : > { %3000 = vmatmul.msk.f32.gmra.mxu0 %vm587_vm9, %v3536_v6  ;;  %3026 = vmatmul.msk.f32.gmra.mxu1 %vm613_vm7, %v3536_v6  ;;  %vm594_vm7 = vcmp.eq.s32.totalorder %v3736_v2, %v3804_v41  ;;  %vm596_vm9 = vcmp.eq.s32.totalorder %v3736_v2, %v3822_v52 }
 0x120   : > { %3029 = vmatmul.msk.f32.gmra.mxu2 %vm616_vm8, %v3536_v6  ;;  %vm595_vm8 = vcmp.eq.s32.totalorder %v3736_v2, %v3813_v46  ;;  %v4018_v46 = vld [vmem:[%s5214_s3 + $0x10] sm:$0xff] }
 0x124   : > { %v3921_v30 = vpop.f32.mrf.mxu0  ;;  %v514_v31 = vpop.permute.xlu1 %513 }
 0x125   : > { %v3923_v32 = vpop.permute.xlu0 %477  ;;  %vm614_vm11 = vcmp.eq.s32.totalorder %v3736_v2, %v514_v31 }
 0x126   : > { %3044 = vmatmul.msk.f32.gmra.mxu3 %vm631_vm13, %v3536_v6  ;;  %vm600_vm13 = vcmp.eq.s32.totalorder %v3736_v2, %v3858_v7 }
 0x127   : > { %3001 = vmatmul.msk.f32.gmra.mxu0 %vm588_vm12, %v3536_v6  ;;  %3027 = vmatmul.msk.f32.gmra.mxu1 %vm614_vm11, %v3536_v6  ;;  %vm598_vm11 = vcmp.eq.s32.totalorder %v3736_v2, %v3840_v61  ;;  %vm599_vm12 = vcmp.eq.s32.totalorder %v3736_v2, %v3849_v1 }
 0x128   : > { %3030 = vmatmul.msk.f32.gmra.mxu2 %vm617_vm14, %v3536_v6  ;;  %vm601_vm14 = vcmp.eq.s32.totalorder %v3736_v2, %v3884_v18 }
 0x12c   : > { %v3934_v33 = vpop.f32.mrf.mxu0  ;;  %v568_v35 = vpop.permute.xlu1 %567 }
 0x12d   : > { %v3936_v36 = vpop.permute.xlu0 %480  ;;  %vm632_vm15 = vcmp.eq.s32.totalorder %v3736_v2, %v568_v35 }
 0x12e   : > { %3045 = vmatmul.msk.f32.gmra.mxu3 %vm632_vm15, %v3536_v6  ;;  %vm602_vm15 = vcmp.eq.s32.totalorder %v3736_v2, %v3923_v32 }
 0x12f   : > { %3002 = vmatmul.msk.f32.gmra.mxu0 %vm589_vm0, %v3536_v6  ;;  %vm603_vm0 = vcmp.eq.s32.totalorder %v3736_v2, %v3936_v36 }
 0x131   : > { %v4091_v60 = vpop.f32.mrf.mxu3 }
 0x134   : > { %v3943_v37 = vpop.f32.mrf.mxu0  ;;  %v1437_v19 = vpop.permute.xlu1 %1436 }
 0x135   : > { %v526_v38 = vpop.permute.xlu0 %525  ;;  %v1438_v21 = vperm.slane %v1437_v19, 0 }
 0x136   : > { %vm618_vm1 = vcmp.eq.s32.totalorder %v3736_v2, %v526_v38 }
 0x137   : > { %3003 = vmatmul.msk.f32.gmra.mxu0 %vm590_vm2, %v3536_v6  ;;  %3031 = vmatmul.msk.f32.gmra.mxu2 %vm618_vm1, %v3536_v6  ;;  %vm1523_vm1 = vcmask 523264   ;;  %vm4162_vm2 = vcmp.lt.s32.totalorder %v3736_v2, %v1438_v21 }
 0x13c   : > { %v3950_v39 = vpop.f32.mrf.mxu0 }
 0x13f   : > { %3004 = vmatmul.msk.f32.gmra.mxu0 %vm591_vm3, %v3536_v6 }
 0x144   : > { %v3955_v22 = vpop.f32.mrf.mxu0 }
 0x145   : > { %3046 = vmatpush.xpose.msk.msrb.mxu1 %vm990_vm4, %v3955_v22 }
 0x147   : > { %3005 = vmatmul.msk.f32.gmra.mxu0 %vm592_vm5, %v3536_v6 }
 0x149   : > { %3047 = vmatpush.xpose.msk.msrb.mxu1 %vm990_vm4, %v3950_v39 }
 0x14c   : > { %v3964_v40 = vpop.f32.mrf.mxu0 }
 0x14d   : > { %3048 = vmatpush.xpose.msk.msrb.mxu1 %vm990_vm4, %v3943_v37 }
 0x14f   : > { %3006 = vmatmul.msk.f32.gmra.mxu0 %vm593_vm6, %v3536_v6 }
 0x151   : > { %3049 = vmatpush.xpose.msk.msrb.mxu1 %vm990_vm4, %v3934_v33  ;;  %v4103_v63 = vpop.f32.mrf.mxu3 }
 0x154   : > { %v3973_v42 = vpop.f32.mrf.mxu0  ;;  %v4024_v48 = vpop.f32.mrf.mxu1 }
 0x155   : > { %3050 = vmatpush.xpose.msk.msrb.mxu1 %vm990_vm4, %v3921_v30 }
 0x157   : > { %3007 = vmatmul.msk.f32.gmra.mxu0 %vm594_vm7, %v3536_v6 }
 0x159   : > { %3051 = vmatpush.xpose.msk.msrb.mxu1 %vm990_vm4, %v3910_v27  ;;  %v4115_v4 = vpop.f32.mrf.mxu3 }
 0x15c   : > { %v3982_v43 = vpop.f32.mrf.mxu0  ;;  %v4040_v51 = vpop.f32.mrf.mxu1 }
 0x15d   : > { %3052 = vmatpush.xpose.msk.msrb.mxu1 %vm990_vm4, %v3901_v23 }
 0x15f   : > { %3008 = vmatmul.msk.f32.gmra.mxu0 %vm595_vm8, %v3536_v6 }
 0x161   : > { %3053 = vmatpush.xpose.msk.msrb.mxu1 %vm990_vm4, %v3892_v10  ;;  %v4123_v8 = vpop.f32.mrf.mxu3 }
 0x164   : > { %v3996_v41 = vpop.f32.mrf.mxu0  ;;  %3054 = vmatmul.msk.f32.vlgmr.msrb.gmra.mxu1 %vm990_vm4, %v3994_v34  ;;  %v4050_v53 = vpop.f32.mrf.mxu1 }
 0x167   : > { %3009 = vmatmul.msk.f32.gmra.mxu0 %vm596_vm9, %v3536_v6 }
 0x169   : > { %v4133_v11 = vpop.f32.mrf.mxu3 }
 0x16c   : > { %v4008_v45 = vpop.f32.mrf.mxu0  ;;  %3055 = vmatmul.msk.f32.gmra.mxu1 %vm990_vm4, %v4006_v44  ;;  %v4063_v55 = vpop.f32.mrf.mxu1 }
 0x16f   : > { %3010 = vmatmul.msk.f32.gmra.mxu0 %vm597_vm10, %v3536_v6 }
 0x171   : > { %v4147_v15 = vpop.f32.mrf.mxu3 }
 0x174   : > { %v4020_v47 = vpop.f32.mrf.mxu0  ;;  %3056 = vmatmul.msk.f32.gmra.mxu1 %vm990_vm4, %v4018_v46  ;;  %v4076_v58 = vpop.f32.mrf.mxu1 }
 0x177   : > { %3011 = vmatmul.msk.f32.gmra.mxu0 %vm598_vm11, %v3536_v6  ;;  %vm2316_vm11 = vcmask 785408  }
 0x179   : > { %v4149_v17 = vpop.f32.mrf.mxu2  ;;  %v4159_v24 = vpop.f32.mrf.mxu3 }
 0x17c   : > { %v4034_v50 = vpop.f32.mrf.mxu0  ;;  %3057 = vmatmul.msk.f32.gmra.mxu1 %vm990_vm4, %v4032_v49  ;;  %v4095_v61 = vpop.f32.mrf.mxu1 }
 0x17f   : > { %3012 = vmatmul.msk.f32.gmra.mxu0 %vm599_vm12, %v3536_v6 }
 0x181   : > { %v4182_v35 = vpop.f32.mrf.mxu3 }
 0x184   : > { %v4043_v52 = vpop.f32.mrf.mxu0  ;;  %v4107_v0 = vpop.f32.mrf.mxu1 }
 0x185   : > { %3058 = vmatpush.xpose.msk.msrb.mxu2 %vm990_vm4, %v4043_v52 }
 0x187   : > { %3013 = vmatmul.msk.f32.gmra.mxu0 %vm600_vm13, %v3536_v6 }
 0x189   : > { %3059 = vmatpush.xpose.msk.msrb.mxu2 %vm990_vm4, %v4034_v50 }
 0x18c   : > { %v4054_v54 = vpop.f32.mrf.mxu0  ;;  %v4117_v5 = vpop.f32.mrf.mxu1 }
 0x18d   : > { %3060 = vmatpush.xpose.msk.msrb.mxu2 %vm990_vm4, %v4020_v47 }
 0x18f   : > { %3014 = vmatmul.msk.f32.gmra.mxu0 %vm601_vm14, %v3536_v6 }
 0x191   : > { %3061 = vmatpush.xpose.msk.msrb.mxu2 %vm990_vm4, %v4008_v45 }
 0x194   : > { %v4065_v56 = vpop.f32.mrf.mxu0  ;;  %v4127_v3 = vpop.f32.mrf.mxu1 }
 0x195   : > { %3062 = vmatpush.xpose.msk.msrb.mxu2 %vm990_vm4, %v3996_v41 }
 0x197   : > { %3015 = vmatmul.msk.f32.gmra.mxu0 %vm602_vm15, %v3536_v6 }
 0x199   : > { %3063 = vmatpush.xpose.msk.msrb.mxu2 %vm990_vm4, %v3982_v43 }
 0x19c   : > { %v4074_v57 = vpop.f32.mrf.mxu0  ;;  %v4139_v13 = vpop.f32.mrf.mxu1 }
 0x19d   : > { %3064 = vmatpush.xpose.msk.msrb.mxu2 %vm990_vm4, %v3973_v42 }
 0x19f   : > { %3016 = vmatmul.msk.f32.gmra.mxu0 %vm603_vm0, %v3536_v6 }
 0x1a1   : > { %3065 = vmatpush.xpose.msk.msrb.mxu2 %vm990_vm4, %v3964_v40 }
 0x1a3   : > { %v4166_v26 = vpop.f32.mrf.mxu2 }
 0x1a4   : > { %v4087_v59 = vpop.f32.mrf.mxu0  ;;  %3066 = vmatmul.msk.f32.vlgmr.msrb.gmra.mxu2 %vm990_vm4, %v3994_v34  ;;  %v4151_v18 = vpop.f32.mrf.mxu1 }
 0x1a5   : > { %3094 = vmatpush.xpose.msk.msra.mxu2 %vm990_vm4, %v4076_v58 }
 0x1a9   : > { %3095 = vmatpush.xpose.msk.msra.mxu2 %vm990_vm4, %v4063_v55 }
 0x1ac   : > { %v4099_v6 = vpop.f32.mrf.mxu0  ;;  %3067 = vmatmul.msk.f32.gmra.mxu2 %vm990_vm4, %v4006_v44 }
 0x1ad   : > { %3096 = vmatpush.xpose.msk.msra.mxu2 %vm990_vm4, %v4050_v53 }
 0x1b1   : > { %3097 = vmatpush.xpose.msk.msra.mxu2 %vm990_vm4, %v4040_v51 }
 0x1b4   : > { %v4111_v1 = vpop.f32.mrf.mxu0  ;;  %3068 = vmatmul.msk.f32.gmra.mxu2 %vm990_vm4, %v4018_v46 }
 0x1b5   : > { %3098 = vmatpush.xpose.msk.msra.mxu2 %vm990_vm4, %v4024_v48 }
 0x1bc   : > { %v4119_v7 = vpop.f32.mrf.mxu0  ;;  %3069 = vmatmul.msk.f32.gmra.mxu2 %vm990_vm4, %v4032_v49 }
 0x1c4   : > { %v4125_v9 = vpop.f32.mrf.mxu0 }
 0x1c5   : > { %3070 = vmatpush.xpose.msk.msrb.mxu3 %vm990_vm4, %v4125_v9 }
 0x1c9   : > { %3071 = vmatpush.xpose.msk.msrb.mxu3 %vm990_vm4, %v4119_v7 }
 0x1cc   : > { %v4135_v12 = vpop.f32.mrf.mxu0 }
 0x1cd   : > { %3072 = vmatpush.xpose.msk.msrb.mxu3 %vm990_vm4, %v4111_v1 }
 0x1d1   : > { %3073 = vmatpush.xpose.msk.msrb.mxu3 %vm990_vm4, %v4099_v6 }
 0x1d4   : > { %v4143_v14 = vpop.f32.mrf.mxu0 }
 0x1d5   : > { %3074 = vmatpush.xpose.msk.msrb.mxu3 %vm990_vm4, %v4087_v59 }
 0x1d9   : > { %3075 = vmatpush.xpose.msk.msrb.mxu3 %vm990_vm4, %v4074_v57 }
 0x1dc   : > { %v4155_v20 = vpop.f32.mrf.mxu0 }
 0x1dd   : > { %3076 = vmatpush.xpose.msk.msrb.mxu3 %vm990_vm4, %v4065_v56 }
 0x1e1   : > { %v1044_v28 = vpop.f32.mrf.mxu1  ;;  %3077 = vmatpush.xpose.msk.msrb.mxu3 %vm990_vm4, %v4054_v54 }
 0x1e2   : > { %v4172_v29 = vsel %vm4162_vm2, %v1044_v28, -1e+30 }
 0x1e3   : > { %v1524_v16 = vsel %vm1523_vm1, %v4172_v29, -inf }
 0x1e4   : > { %v875_v31 = vpop.f32.mrf.mxu0  ;;  %3078 = vmatmul.msk.f32.vlgmr.msrb.gmra.mxu3 %vm990_vm4, %v3994_v34  ;;  %1525 = vmax.xlane.f32.xlu2 %v1524_v16 }
 0x1e5   : > { %3106 = vmatpush.xpose.msk.msra.mxu3 %vm990_vm4, %v4166_v26 }
 0x1e9   : > { %3107 = vmatpush.xpose.msk.msra.mxu3 %vm990_vm4, %v4149_v17  ;;  %v1047_v32 = vpop.f32.mrf.mxu1 }
 0x1ea   : > { %v4186_v36 = vsel %vm4162_vm2, %v1047_v32, -1e+30  ;;  %v4204_v32 = vpop.f32.mrf.mxu3 }
 0x1eb   : > { %5226 = vst [vmem:[#allocation5_spill] sm:$0xff] %v4186_v36  ;;  %v1527_v38 = vsel %vm1523_vm1, %v4186_v36, -inf }
 0x1ec   : > { %v878_v19 = vpop.f32.mrf.mxu0  ;;  %3079 = vmatmul.msk.f32.gmra.mxu3 %vm990_vm4, %v4006_v44  ;;  %1528 = vmax.xlane.f32.xlu1 %v1527_v38 }
 0x1ed   : > { %3108 = vmatpush.xpose.msk.msra.mxu3 %vm990_vm4, %v4151_v18 }
 0x1f1   : > { %3109 = vmatpush.xpose.msk.msra.mxu3 %vm990_vm4, %v4139_v13  ;;  %v1050_v21 = vpop.f32.mrf.mxu1 }
 0x1f2   : > { %v4198_v28 = vsel %vm4162_vm2, %v1050_v21, -1e+30 }
 0x1f3   : > { %5227 = vst [vmem:[#allocation6_spill] sm:$0xff] %v4198_v28  ;;  %v1530_v16 = vsel %vm1523_vm1, %v4198_v28, -inf }
 0x1f4   : > { %v881_v62 = vpop.f32.mrf.mxu0  ;;  %3080 = vmatmul.msk.f32.gmra.mxu3 %vm990_vm4, %v4018_v46  ;;  %1531 = vmax.xlane.f32.xlu2 %v1530_v16  ;;  %v4220_v16 = vpop.f32.mrf.mxu3 }
 0x1f5   : > { %3110 = vmatpush.xpose.msk.msra.mxu3 %vm990_vm4, %v4127_v3 }
 0x1f9   : > { %3111 = vmatpush.xpose.msk.msra.mxu3 %vm990_vm4, %v4117_v5  ;;  %v1053_v38 = vpop.f32.mrf.mxu1 }
 0x1fa   : > { %v4212_v21 = vsel %vm4162_vm2, %v1053_v38, -1e+30 }
 0x1fb   : > { %v1533_v28 = vsel %vm1523_vm1, %v4212_v21, -inf }
 0x1fc   : > { %v884_v36 = vpop.f32.mrf.mxu0  ;;  %3081 = vmatmul.msk.f32.gmra.mxu3 %vm990_vm4, %v4032_v49  ;;  %1534 = vmax.xlane.f32.xlu1 %v1533_v28  ;;  %v4232_v28 = vpop.f32.mrf.mxu3 }
 0x1fd   : > { %3112 = vmatpush.xpose.msk.msra.mxu3 %vm990_vm4, %v4107_v0 }
 0x201   : > { %3113 = vmatpush.xpose.msk.msra.mxu3 %vm990_vm4, %v4095_v61 }
 0x204   : > { %v887_v38 = vpop.f32.mrf.mxu0  ;;  %3114 = vmatmul.msk.f32.vlgmr.msra.gmra.mxu3 %vm990_vm4, %v3994_v34 }
 0x205   : > { %1896 = vmatpush.msrb.mxu3 %v3955_v22  ;;  %3082 = vmatpush.xpose.msk.msra.mxu1 %vm990_vm4, %v887_v38 }
 0x207   : > { %1897 = vmatpush.msrb.mxu3 %v3950_v39 }
 0x209   : > { %1898 = vmatpush.msrb.mxu3 %v3943_v37  ;;  %3083 = vmatpush.xpose.msk.msra.mxu1 %vm990_vm4, %v884_v36  ;;  %v1441_v37 = vpop.permute.xlu2 %1440 }
 0x20a   : > { %v1442_v22 = vperm.slane %v1441_v37, 0 }
 0x20b   : > { %1899 = vmatpush.msrb.mxu3 %v3934_v33 }
 0x20c   : > { %v4237_v39 = vpop.f32.mrf.mxu0  ;;  %3115 = vmatmul.msk.f32.gmra.mxu3 %vm990_vm4, %v4006_v44  ;;  %vm4285_vm3 = vcmp.lt.s32.totalorder %v3736_v2, %v1442_v22 }
 0x20d   : > { %1900 = vmatpush.msrb.mxu3 %v3921_v30  ;;  %3084 = vmatpush.xpose.msk.msra.mxu1 %vm990_vm4, %v881_v62  ;;  %v4244_v30 = vpop.f32.mrf.mxu3 }
 0x20f   : > { %1901 = vmatpush.msrb.mxu3 %v3910_v27 }
 0x211   : > { %1902 = vmatpush.msrb.mxu3 %v3901_v23  ;;  %3085 = vmatpush.xpose.msk.msra.mxu1 %vm990_vm4, %v878_v19  ;;  %v4251_v23 = vpop.f32.mrf.mxu2 }
 0x213   : > { %1903 = vmatpush.msrb.mxu3 %v3892_v10 }
 0x214   : > { %v4246_v33 = vpop.f32.mrf.mxu0  ;;  %3116 = vmatmul.msk.f32.gmra.mxu3 %vm990_vm4, %v4018_v46 }
 0x215   : > { %2019 = vmatpush.msra.mxu3 %v887_v38  ;;  %3086 = vmatpush.xpose.msk.msra.mxu1 %vm990_vm4, %v875_v31  ;;  %v4257_v10 = vpop.f32.mrf.mxu3 }
 0x217   : > { %2020 = vmatpush.msra.mxu3 %v884_v36 }
 0x219   : > { %2021 = vmatpush.msra.mxu3 %v881_v62  ;;  %3087 = vmatpush.xpose.msk.msra.mxu1 %vm990_vm4, %v4155_v20  ;;  %v4268_v27 = vpop.f32.mrf.mxu2 }
 0x21b   : > { %2022 = vmatpush.msra.mxu3 %v878_v19 }
 0x21c   : > { %v4259_v62 = vpop.f32.mrf.mxu0  ;;  %3117 = vmatmul.msk.f32.gmra.mxu3 %vm990_vm4, %v4032_v49 }
 0x21d   : > { %2023 = vmatpush.msra.mxu3 %v875_v31  ;;  %3088 = vmatpush.xpose.msk.msra.mxu1 %vm990_vm4, %v4143_v14 }
 0x21e   : > { %3099 = vmatpush.xpose.msk.msra.mxu2 %vm990_vm4, %v4259_v62 }
 0x21f   : > { %2024 = vmatpush.msra.mxu3 %v4155_v20 }
 0x221   : > { %2025 = vmatpush.msra.mxu3 %v4143_v14  ;;  %3089 = vmatpush.xpose.msk.msra.mxu1 %vm990_vm4, %v4135_v12  ;;  %v4278_v14 = vpop.f32.mrf.mxu3 }
 0x222   : > { %3100 = vmatpush.xpose.msk.msra.mxu2 %vm990_vm4, %v4246_v33 }
 0x223   : > { %2026 = vmatpush.msra.mxu3 %v4135_v12 }
 0x224   : > { %3090 = vmatmul.msk.f32.vlgmr.msra.gmra.mxu1 %vm990_vm4, %v3994_v34 }
 0x225   : > { %3118 = vmatpush.xpose.msk.msrb.mxu1 %vm990_vm4, %v4147_v15 }
 0x226   : > { %3101 = vmatpush.xpose.msk.msra.mxu2 %vm990_vm4, %v4237_v39 }
 0x227   : > { %v1097_v20 = vpop.f32.mrf.mxu2 }
 0x228   : > { %v4293_v31 = vsel %vm4285_vm3, %v1097_v20, -1e+30 }
 0x229   : > { %3119 = vmatpush.xpose.msk.msrb.mxu1 %vm990_vm4, %v4133_v11  ;;  %3102 = vmatmul.msk.f32.vlgmr.msra.gmra.mxu2 %vm990_vm4, %v3994_v34  ;;  %v1536_v36 = vsel %vm1523_vm1, %v4293_v31, -inf }
 0x22a   : > { %3130 = vmatpush.xpose.msk.msrb.mxu2 %vm990_vm4, %v4278_v14  ;;  %1537 = vmax.xlane.f32.xlu0 %v1536_v36 }
 0x22c   : > { %3091 = vmatmul.msk.f32.gmra.mxu1 %vm990_vm4, %v4006_v44 }
 0x22d   : > { %3120 = vmatpush.xpose.msk.msrb.mxu1 %vm990_vm4, %v4123_v8 }
 0x22e   : > { %3131 = vmatpush.xpose.msk.msrb.mxu2 %vm990_vm4, %v4257_v10 }
 0x22f   : > { %v1100_v19 = vpop.f32.mrf.mxu2 }
 0x230   : > { %v4311_v38 = vsel %vm4285_vm3, %v1100_v19, -1e+30 }
 0x231   : > { %3121 = vmatpush.xpose.msk.msrb.mxu1 %vm990_vm4, %v4115_v4  ;;  %3103 = vmatmul.msk.f32.gmra.mxu2 %vm990_vm4, %v4006_v44  ;;  %v1539_v37 = vsel %vm1523_vm1, %v4311_v38, -inf }
 0x232   : > { %3132 = vmatpush.xpose.msk.msrb.mxu2 %vm990_vm4, %v4244_v30  ;;  %1540 = vmax.xlane.f32.xlu1 %v1539_v37 }
 0x234   : > { %3092 = vmatmul.msk.f32.gmra.mxu1 %vm990_vm4, %v4018_v46 }
 0x235   : > { %3122 = vmatpush.xpose.msk.msrb.mxu1 %vm990_vm4, %v4103_v63 }
 0x236   : > { %3133 = vmatpush.xpose.msk.msrb.mxu2 %vm990_vm4, %v4232_v28 }
 0x237   : > { %v1103_v22 = vpop.f32.mrf.mxu2 }
 0x238   : > { %v4329_v20 = vsel %vm4285_vm3, %v1103_v22, -1e+30 }
 0x239   : > { %3123 = vmatpush.xpose.msk.msrb.mxu1 %vm990_vm4, %v4091_v60  ;;  %3104 = vmatmul.msk.f32.gmra.mxu2 %vm990_vm4, %v4018_v46  ;;  %v1542_v36 = vsel %vm1523_vm1, %v4329_v20, -inf }
 0x23a   : > { %3134 = vmatpush.xpose.msk.msrb.mxu2 %vm990_vm4, %v4220_v16  ;;  %1543 = vmax.xlane.f32.xlu1 %v1542_v36 }
 0x23c   : > { %3093 = vmatmul.msk.f32.gmra.mxu1 %vm990_vm4, %v4032_v49 }
 0x23d   : > { %3124 = vmatpush.xpose.msk.msrb.mxu1 %vm990_vm4, %v4268_v27 }
 0x23e   : > { %3135 = vmatpush.xpose.msk.msrb.mxu2 %vm990_vm4, %v4204_v32 }
 0x23f   : > { %v1106_v19 = vpop.f32.mrf.mxu2 }
 0x240   : > { %v4348_v37 = vsel %vm4285_vm3, %v1106_v19, -1e+30 }
 0x241   : > { %3125 = vmatpush.xpose.msk.msrb.mxu1 %vm990_vm4, %v4251_v23  ;;  %3105 = vmatmul.msk.f32.gmra.mxu2 %vm990_vm4, %v4032_v49  ;;  %v1545_v22 = vsel %vm1523_vm1, %v4348_v37, -inf }
 0x242   : > { %3136 = vmatpush.xpose.msk.msrb.mxu2 %vm990_vm4, %v4182_v35  ;;  %1546 = vmax.xlane.f32.xlu0 %v1545_v22 }
 0x244   : > { %3126 = vmatmul.msk.f32.vlgmr.msrb.gmra.mxu1 %vm990_vm4, %v3994_v34 }
 0x245   : > { %1937 = vmatpush.msra.mxu1 %v4043_v52 }
 0x246   : > { %3137 = vmatpush.xpose.msk.msrb.mxu2 %vm990_vm4, %v4159_v24 }
 0x247   : > { %1938 = vmatpush.msra.mxu1 %v4034_v50 }
 0x249   : > { %1939 = vmatpush.msra.mxu1 %v4020_v47  ;;  %3138 = vmatmul.msk.f32.vlgmr.msrb.gmra.mxu2 %vm990_vm4, %v3994_v34  ;;  %v4378_v34 = vpop.permute.xlu2 %1460  ;;  %v1445_v47 = vpop.permute.xlu0 %1444 }
 0x24a   : > { %1978 = vmatpush.msra.mxu2 %v4125_v9  ;;  %v1446_v52 = vperm.slane %v1445_v47, 0 }
 0x24b   : > { %1940 = vmatpush.msra.mxu1 %v4008_v45  ;;  %v4373_v45 = vpop.permute.xlu1 %1448 }
 0x24c   : > { %1979 = vmatpush.msra.mxu2 %v4119_v7  ;;  %3127 = vmatmul.msk.f32.gmra.mxu1 %vm990_vm4, %v4006_v44  ;;  %vm4416_vm5 = vcmp.lt.s32.totalorder %v3736_v2, %v1446_v52 }
 0x24d   : > { %1941 = vmatpush.msra.mxu1 %v3996_v41 }
 0x24e   : > { %1980 = vmatpush.msra.mxu2 %v4111_v1 }
 0x24f   : > { %1942 = vmatpush.msra.mxu1 %v3982_v43 }
 0x250   : > { %1981 = vmatpush.msra.mxu2 %v4099_v6 }
 0x251   : > { %1943 = vmatpush.msra.mxu1 %v3973_v42  ;;  %3139 = vmatmul.msk.f32.gmra.mxu2 %vm990_vm4, %v4006_v44 }
 0x252   : > { %1982 = vmatpush.msra.mxu2 %v4087_v59  ;;  %v5233_v59 = vld [vmem:[#allocation6_spill] sm:$0xff] }
 0x253   : > { %1944 = vmatpush.msra.mxu1 %v3964_v40  ;;  %v4391_v40 = vpop.permute.xlu1 %1464 }
 0x254   : > { %1983 = vmatpush.msra.mxu2 %v4074_v57  ;;  %3128 = vmatmul.msk.f32.gmra.mxu1 %vm990_vm4, %v4018_v46 }
 0x255   : > { %2060 = vmatpush.msrb.mxu1 %v4076_v58 }
 0x256   : > { %1984 = vmatpush.msra.mxu2 %v4065_v56 }
 0x257   : > { %2061 = vmatpush.msrb.mxu1 %v4063_v55  ;;  %v1526_v42 = vpop.xlane.xlu2 %1525 }
 0x258   : > { %1985 = vmatpush.msra.mxu2 %v4054_v54  ;;  %v1620_v43 = vsub.f32 %v4172_v29, %v1526_v42 }
 0x259   : > { %2062 = vmatpush.msrb.mxu1 %v4050_v53  ;;  %3140 = vmatmul.msk.f32.gmra.mxu2 %vm990_vm4, %v4018_v46  ;;  %v5230_v46 = vld [vmem:[#allocation5_spill] sm:$0xff] }
 0x25a   : > { %2101 = vmatpush.msrb.mxu2 %v4166_v26  ;;  %v1652_v41 = vmul.f32 1.442695, %v1620_v43 }
 0x25b   : > { %2063 = vmatpush.msrb.mxu1 %v4040_v51 }
 0x25c   : > { %2102 = vmatpush.msrb.mxu2 %v4149_v17  ;;  %3306 = vpow2.f32 %v1652_v41  ;;  %3129 = vmatmul.msk.f32.gmra.mxu1 %vm990_vm4, %v4032_v49 }
 0x25d   : > { %2064 = vmatpush.msrb.mxu1 %v4024_v48 }
 0x25e   : > { %2103 = vmatpush.msrb.mxu2 %v4151_v18 }
 0x25f   : > { %2065 = vmatpush.msrb.mxu1 %v4259_v62  ;;  %v1529_v44 = vpop.xlane.xlu1 %1528 }
 0x260   : > { %2104 = vmatpush.msrb.mxu2 %v4139_v13  ;;  %v1621_v48 = vsub.f32 %v5230_v46, %v1529_v44 }
 0x261   : > { %2066 = vmatpush.msrb.mxu1 %v4246_v33  ;;  %3141 = vmatmul.msk.f32.gmra.mxu2 %vm990_vm4, %v4032_v49 }
 0x262   : > { %2105 = vmatpush.msrb.mxu2 %v4127_v3  ;;  %v4410_v50 = vpop.eup %3306  ;;  %v1654_v51 = vmul.f32 1.442695, %v1621_v48 }
 0x263   : > { %2067 = vmatpush.msrb.mxu1 %v4237_v39  ;;  %v1716_v53 = vsel %vm1523_vm1, %v4410_v50, 0.0  ;;  %v1453_v39 = vpop.permute.xlu0 %1452 }
 0x264   : > { %2106 = vmatpush.msrb.mxu2 %v4117_v5  ;;  %3308 = vpow2.f32 %v1654_v51  ;;  %1717 = vadd.xlane.f32.xlu2 %v1716_v53 }
 0x266   : > { %2107 = vmatpush.msrb.mxu2 %v4107_v0 }
 0x267   : > { %v1150_v55 = vpop.f32.mrf.mxu3  ;;  %v1532_v56 = vpop.xlane.xlu2 %1531 }
 0x268   : > { %2108 = vmatpush.msrb.mxu2 %v4095_v61  ;;  %v4422_v49 = vsel %vm4416_vm5, %v1150_v55, -1e+30  ;;  %v1622_v61 = vsub.f32 %v5233_v59, %v1532_v56 }
 0x269   : > { %v1548_v57 = vsel %vm1523_vm1, %v4422_v49, -inf }
 0x26a   : > { %v4426_v58 = vpop.eup %3308  ;;  %1549 = vmax.xlane.f32.xlu0 %v1548_v57  ;;  %v1656_v0 = vmul.f32 1.442695, %v1622_v61  ;;  %v1450_v57 = vperm.slane %v4373_v45, 0 }
 0x26b   : > { %v1719_v6 = vsel %vm1523_vm1, %v4426_v58, 0.0  ;;  %v1457_v19 = vpop.permute.xlu0 %1456 }
 0x26c   : > { %1720 = vadd.xlane.f32.xlu2 %v1719_v6  ;;  %3310 = vpow2.f32 %v1656_v0  ;;  %v1458_v43 = vperm.slane %v1457_v19, 0  ;;  %vm4484_vm7 = vcmp.lt.s32.totalorder %v3736_v2, %v1450_v57 }
 0x26e   : > { %vm4459_vm6 = vcmp.lt.s32.totalorder %v3736_v2, %v1458_v43 }
 0x26f   : > { %v1153_v1 = vpop.f32.mrf.mxu3  ;;  %v1535_v5 = vpop.xlane.xlu1 %1534 }
 0x270   : > { %v4433_v7 = vsel %vm4416_vm5, %v1153_v1, -1e+30  ;;  %v1623_v9 = vsub.f32 %v4212_v21, %v1535_v5 }
 0x271   : > { %v1551_v3 = vsel %vm1523_vm1, %v4433_v7, -inf }
 0x272   : > { %v1658_v13 = vmul.f32 1.442695, %v1623_v9  ;;  %v4438_v18 = vpop.eup %3310 }
 0x273   : > { %v1722_v21 = vsel %vm1523_vm1, %v4438_v18, 0.0 }
 0x274   : > { %1552 = vmax.xlane.f32.xlu2 %v1551_v3  ;;  %3312 = vpow2.f32 %v1658_v13  ;;  %v1454_v13 = vperm.slane %v1453_v39, 0 }
 0x276   : > { %vm4500_vm8 = vcmp.lt.s32.totalorder %v3736_v2, %v1454_v13  ;;  %v1462_v13 = vperm.slane %v4378_v34, 0 }
 0x277   : > { %v1156_v17 = vpop.f32.mrf.mxu3 }
 0x278   : > { %v4442_v26 = vsel %vm4416_vm5, %v1156_v17, -1e+30  ;;  %vm4546_vm9 = vcmp.lt.s32.totalorder %v3736_v2, %v1462_v13 }
 0x279   : > { %v1554_v29 = vsel %vm1523_vm1, %v4442_v26, -inf }
 0x27a   : > { %1555 = vmax.xlane.f32.xlu0 %v1554_v29  ;;  %v4448_v33 = vpop.eup %3312 }
 0x27b   : > { %v1725_v36 = vsel %vm1523_vm1, %v4448_v33, 0.0 }
 0x27c   : > { %1723 = vadd.xlane.f32.xlu2 %v1722_v21 }
 0x27f   : > { %v1159_v62 = vpop.f32.mrf.mxu3 }
 0x280   : > { %v4454_v22 = vsel %vm4416_vm5, %v1159_v62, -1e+30 }
 0x281   : > { %v1557_v41 = vsel %vm1523_vm1, %v4454_v22, -inf }
 0x282   : > { %1726 = vadd.xlane.f32.xlu0 %v1725_v36 }
 0x287   : > { %v1309_v42 = vpop.f32.mrf.mxu3 }
 0x288   : > { %v4465_v47 = vsel %vm4459_vm6, %v1309_v42, -1e+30 }
 0x289   : > { %v1584_v52 = vsel %vm1523_vm1, %v4465_v47, -inf }
 0x28a   : > { %1558 = vmax.xlane.f32.xlu0 %v1557_v41 }
 0x28f   : > { %v1312_v46 = vpop.f32.mrf.mxu3 }
 0x290   : > { %v4469_v48 = vsel %vm4459_vm6, %v1312_v46, -1e+30 }
 0x291   : > { %v1587_v51 = vsel %vm1523_vm1, %v4469_v48, -inf }
 0x292   : > { %1588 = vmax.xlane.f32.xlu2 %v1587_v51  ;;  %1585 = vmax.xlane.f32.xlu0 %v1584_v52 }
 0x297   : > { %v1315_v53 = vpop.f32.mrf.mxu3 }
 0x298   : > { %v4477_v55 = vsel %vm4459_vm6, %v1315_v53, -1e+30 }
 0x299   : > { %v1590_v56 = vsel %vm1523_vm1, %v4477_v55, -inf }
 0x29a   : > { %1591 = vmax.xlane.f32.xlu0 %v1590_v56 }
 0x29d   : > { %v1538_v59 = vpop.xlane.xlu0 %1537 }
 0x29e   : > { %v1624_v61 = vsub.f32 %v4293_v31, %v1538_v59 }
 0x2a0   : > { %v1660_v6 = vmul.f32 1.442695, %v1624_v61 }
 0x2a1   : > { %v1203_v1 = vpop.f32.mrf.mxu1 }
 0x2a2   : > { %3314 = vpow2.f32 %v1660_v6  ;;  %v4490_v5 = vsel %vm4484_vm7, %v1203_v1, -1e+30 }
 0x2a3   : > { %v1560_v9 = vsel %vm1523_vm1, %v4490_v5, -inf }
 0x2a4   : > { %1561 = vmax.xlane.f32.xlu0 %v1560_v9 }
 0x2a5   : > { %v1541_v45 = vpop.xlane.xlu1 %1540 }
 0x2a6   : > { %v1625_v3 = vsub.f32 %v4311_v38, %v1541_v45 }
 0x2a8   : > { %v4495_v31 = vpop.eup %3314  ;;  %v1662_v17 = vmul.f32 1.442695, %v1625_v3 }
 0x2a9   : > { %v1206_v29 = vpop.f32.mrf.mxu1  ;;  %v1728_v21 = vsel %vm1523_vm1, %v4495_v31, 0.0 }
 0x2aa   : > { %3316 = vpow2.f32 %v1662_v17  ;;  %v4513_v43 = vsel %vm4484_vm7, %v1206_v29, -1e+30 }
 0x2ab   : > { %v1563_v52 = vsel %vm1523_vm1, %v4513_v43, -inf }
 0x2ac   : > { %v1256_v36 = vpop.f32.mrf.mxu2  ;;  %1729 = vadd.xlane.f32.xlu0 %v1728_v21 }
 0x2ad   : > { %v4506_v19 = vsel %vm4500_vm8, %v1256_v36, -1e+30  ;;  %v1544_v38 = vpop.xlane.xlu1 %1543 }
 0x2ae   : > { %v1626_v39 = vsub.f32 %v4329_v20, %v1544_v38  ;;  %v1572_v42 = vsel %vm1523_vm1, %v4506_v19, -inf }
 0x2af   : > { %1573 = vmax.xlane.f32.xlu1 %v1572_v42 }
 0x2b0   : > { %v1664_v41 = vmul.f32 1.442695, %v1626_v39  ;;  %v4515_v51 = vpop.eup %3316 }
 0x2b1   : > { %v1209_v46 = vpop.f32.mrf.mxu1  ;;  %v1731_v57 = vsel %vm1523_vm1, %v4515_v51, 0.0 }
 0x2b2   : > { %3318 = vpow2.f32 %v1664_v41  ;;  %v4524_v59 = vsel %vm4484_vm7, %v1209_v46, -1e+30 }
 0x2b3   : > { %v1566_v45 = vsel %vm1523_vm1, %v4524_v59, -inf }
 0x2b4   : > { %v1259_v53 = vpop.f32.mrf.mxu2  ;;  %1564 = vmax.xlane.f32.xlu0 %v1563_v52 }
 0x2b5   : > { %v1547_v56 = vpop.xlane.xlu0 %1546  ;;  %v4543_v21 = vsel %vm4500_vm8, %v1259_v53, -1e+30 }
 0x2b6   : > { %v1627_v20 = vsub.f32 %v4348_v37, %v1547_v56  ;;  %v1575_v34 = vsel %vm1523_vm1, %v4543_v21, -inf }
 0x2b7   : > { %1732 = vadd.xlane.f32.xlu1 %v1731_v57 }
 0x2b8   : > { %v1666_v61 = vmul.f32 1.442695, %v1627_v20  ;;  %v4530_v9 = vpop.eup %3318 }
 0x2b9   : > { %v1212_v6 = vpop.f32.mrf.mxu1  ;;  %v1734_v17 = vsel %vm1523_vm1, %v4530_v9, 0.0 }
 0x2ba   : > { %3320 = vpow2.f32 %v1666_v61  ;;  %v4528_v1 = vsel %vm4484_vm7, %v1212_v6, -1e+30  ;;  %v1318_v6 = vpop.f32.mrf.mxu3 }
 0x2bb   : > { %v1569_v37 = vsel %vm1523_vm1, %v4528_v1, -inf  ;;  %v4581_v13 = vsel %vm4459_vm6, %v1318_v6, -1e+30 }
 0x2bc   : > { %v1262_v3 = vpop.f32.mrf.mxu2  ;;  %1570 = vmax.xlane.f32.xlu2 %v1569_v37  ;;  %1567 = vmax.xlane.f32.xlu0 %v1566_v45  ;;  %v1466_v37 = vperm.slane %v4391_v40, 0 }
 0x2bd   : > { %v4562_v52 = vsel %vm4500_vm8, %v1262_v3, -1e+30 }
 0x2be   : > { %v1578_v57 = vsel %vm1523_vm1, %v4562_v52, -inf  ;;  %vm4584_vm10 = vcmp.lt.s32.totalorder %v3736_v2, %v1466_v37 }
 0x2bf   : > { %1735 = vadd.xlane.f32.xlu1 %v1734_v17 }
 0x2c0   : > { %v4539_v29 = vpop.eup %3320 }
 0x2c1   : > { %v1362_v36 = vpop.f32.mrf.mxu1  ;;  %v1737_v42 = vsel %vm1523_vm1, %v4539_v29, 0.0 }
 0x2c2   : > { %v4552_v39 = vsel %vm4546_vm9, %v1362_v36, -1e+30 }
 0x2c3   : > { %v1596_v46 = vsel %vm1523_vm1, %v4552_v39, -inf }
 0x2c4   : > { %v1265_v41 = vpop.f32.mrf.mxu2  ;;  %1576 = vmax.xlane.f32.xlu0 %v1575_v34  ;;  %1738 = vadd.xlane.f32.xlu2 %v1737_v42  ;;  %v1593_v42 = vsel %vm1523_vm1, %v4581_v13, -inf }
 0x2c5   : > { %v4570_v20 = vsel %vm4500_vm8, %v1265_v41, -1e+30 }
 0x2c6   : > { %v1581_v3 = vsel %vm1523_vm1, %v4570_v20, -inf }
 0x2c7   : > { %1597 = vmax.xlane.f32.xlu1 %v1596_v46 }
 0x2c9   : > { %v1365_v53 = vpop.f32.mrf.mxu1 }
 0x2ca   : > { %v4566_v56 = vsel %vm4546_vm9, %v1365_v53, -1e+30 }
 0x2cb   : > { %v1599_v61 = vsel %vm1523_vm1, %v4566_v56, -inf }
 0x2cc   : > { %1579 = vmax.xlane.f32.xlu0 %v1578_v57  ;;  %1600 = vmax.xlane.f32.xlu2 %v1599_v61  ;;  %v1415_v45 = vpop.f32.mrf.mxu2 }
 0x2cd   : > { %v4594_v40 = vsel %vm4584_vm10, %v1415_v45, -1e+30 }
 0x2ce   : > { %v1608_v46 = vsel %vm1523_vm1, %v4594_v40, -inf }
 0x2cf   : > { %1582 = vmax.xlane.f32.xlu1 %v1581_v3 }
 0x2d1   : > { %v1368_v17 = vpop.f32.mrf.mxu1 }
 0x2d2   : > { %v4590_v34 = vsel %vm4546_vm9, %v1368_v17, -1e+30 }
 0x2d3   : > { %v1602_v41 = vsel %vm1523_vm1, %v4590_v34, -inf }
 0x2d4   : > { %1594 = vmax.xlane.f32.xlu0 %v1593_v42  ;;  %1603 = vmax.xlane.f32.xlu2 %v1602_v41  ;;  %v1418_v57 = vpop.f32.mrf.mxu2 }
 0x2d5   : > { %v4608_v37 = vsel %vm4584_vm10, %v1418_v57, -1e+30 }
 0x2d6   : > { %v1611_v41 = vsel %vm1523_vm1, %v4608_v37, -inf }
 0x2d7   : > { %1609 = vmax.xlane.f32.xlu1 %v1608_v46  ;;  %v1718_v53 = vpop.xlane.xlu2 %1717 }
 0x2d8   : > { %3322 = vrcp.f32 %v1718_v53 }
 0x2d9   : > { %v1371_v61 = vpop.f32.mrf.mxu1 }
 0x2da   : > { %v4604_v6 = vsel %vm4546_vm9, %v1371_v61, -1e+30 }
 0x2db   : > { %v1605_v45 = vsel %vm1523_vm1, %v4604_v6, -inf }
 0x2dc   : > { %1606 = vmax.xlane.f32.xlu0 %v1605_v45 }
 0x2dd   : > { %v1550_v3 = vpop.xlane.xlu0 %1549 }
 0x2de   : > { %v3323_v17 = vpop.eup %3322  ;;  %v1628_v42 = vsub.f32 %v4422_v49, %v1550_v3 }
 0x2df   : > { %v1844_v46 = vmul.f32 %v3323_v17, %v4410_v50  ;;  %1612 = vmax.xlane.f32.xlu1 %v1611_v41  ;;  %v1721_v53 = vpop.xlane.xlu2 %1720 }
 0x2e0   : > { %v1668_v61 = vmul.f32 1.442695, %v1628_v42  ;;  %3324 = vrcp.f32 %v1721_v53 }
 0x2e1   : > { %3142 = vmatmul.msk.f32.vlgmr.msrb.gmra.mxu3 %vm1523_vm1, %v1844_v46 }
 0x2e2   : > { %3326 = vpow2.f32 %v1668_v61  ;;  %2142 = vmatpush.msrb.mxu3 %v4147_v15 }
 0x2e4   : > { %2143 = vmatpush.msrb.mxu3 %v4133_v11 }
 0x2e6   : > { %v3325_v57 = vpop.eup %3324  ;;  %2144 = vmatpush.msrb.mxu3 %v4123_v8 }
 0x2e7   : > { %v1553_v49 = vpop.xlane.xlu2 %1552  ;;  %v1845_v45 = vmul.f32 %v3325_v57, %v4426_v58 }
 0x2e8   : > { %v4621_v3 = vpop.eup %3326  ;;  %2145 = vmatpush.msrb.mxu3 %v4115_v4  ;;  %v1629_v50 = vsub.f32 %v4433_v7, %v1553_v49 }
 0x2e9   : > { %3143 = vmatmul.msk.f32.gmra.mxu3 %vm1523_vm1, %v1845_v45  ;;  %v2592_v17 = vadd.f32 %v1845_v45, %v1844_v46  ;;  %v1740_v15 = vsel %vm1523_vm1, %v4621_v3, 0.0 }
 0x2ea   : > { %v1670_v42 = vmul.f32 1.442695, %v1629_v50  ;;  %2146 = vmatpush.msrb.mxu3 %v4103_v63  ;;  %1741 = vadd.xlane.f32.xlu2 %v1740_v15 }
 0x2ec   : > { %3328 = vpow2.f32 %v1670_v42  ;;  %2147 = vmatpush.msrb.mxu3 %v4091_v60 }
 0x2ed   : > { %v1556_v8 = vpop.xlane.xlu0 %1555 }
 0x2ee   : > { %2148 = vmatpush.msrb.mxu3 %v4268_v27  ;;  %v1630_v4 = vsub.f32 %v4442_v26, %v1556_v8 }
 0x2ef   : > { %v1724_v11 = vpop.xlane.xlu2 %1723 }
 0x2f0   : > { %v1672_v58 = vmul.f32 1.442695, %v1630_v4  ;;  %2149 = vmatpush.msrb.mxu3 %v4251_v23  ;;  %3330 = vrcp.f32 %v1724_v11 }
 0x2f2   : > { %v4633_v7 = vpop.eup %3328  ;;  %3332 = vpow2.f32 %v1672_v58  ;;  %v1421_v58 = vpop.f32.mrf.mxu2 }
 0x2f3   : > { %v1743_v63 = vsel %vm1523_vm1, %v4633_v7, 0.0 }
 0x2f4   : > { %1744 = vadd.xlane.f32.xlu0 %v1743_v63 }
 0x2f5   : > { %v1727_v41 = vpop.xlane.xlu0 %1726 }
 0x2f6   : > { %v3331_v46 = vpop.eup %3330  ;;  %3334 = vrcp.f32 %v1727_v41 }
 0x2f7   : > { %v1846_v60 = vmul.f32 %v3331_v46, %v4438_v18 }
 0x2f8   : > { %v4638_v27 = vpop.eup %3332 }
 0x2f9   : > { %3144 = vmatmul.msk.f32.gmra.mxu3 %vm1523_vm1, %v1846_v60  ;;  %v2600_v26 = vadd.f32 %v2592_v17, %v1846_v60  ;;  %v1746_v23 = vsel %vm1523_vm1, %v4638_v27, 0.0 }
 0x2fa   : > { %1747 = vadd.xlane.f32.xlu1 %v1746_v23 }
 0x2fc   : > { %v3335_v53 = vpop.eup %3334 }
 0x2fd   : > { %v1559_v61 = vpop.xlane.xlu0 %1558  ;;  %v1847_v57 = vmul.f32 %v3335_v53, %v4448_v33 }
 0x2ff   : > { %v4644_v49 = vadd.f32 %v2600_v26, %v1847_v57  ;;  %v4660_v26 = vsel %vm4584_vm10, %v1421_v58, -1e+30 }
 0x301   : > { %3145 = vmatmul.msk.f32.gmra.mxu3 %vm1523_vm1, %v1847_v57 }
 0x305   : > { %v1586_v45 = vpop.xlane.xlu0 %1585  ;;  %v4655_v46 = vpop.xlane.xlu2 %1588 }
 0x30d   : > { %v4647_v50 = vpop.xlane.xlu0 %1591 }
 0x317   : > { %v1562_v18 = vpop.xlane.xlu0 %1561 }
 0x318   : > { %v1632_v15 = vsub.f32 %v4490_v5, %v1562_v18  ;;  %v1640_v18 = vsub.f32 %v4465_v47, %v1586_v45 }
 0x31a   : > { %v1676_v42 = vmul.f32 1.442695, %v1632_v15 }
 0x31c   : > { %3336 = vpow2.f32 %v1676_v42  ;;  %v1424_v42 = vpop.f32.mrf.mxu2 }
 0x31f   : > { %v1730_v17 = vpop.xlane.xlu0 %1729 }
 0x320   : > { %3338 = vrcp.f32 %v1730_v17  ;;  %v1692_v17 = vmul.f32 1.442695, %v1640_v18 }
 0x322   : > { %v4650_v8 = vpop.eup %3336  ;;  %v1574_v4 = vpop.xlane.xlu1 %1573 }
 0x323   : > { %v1636_v11 = vsub.f32 %v4506_v19, %v1574_v4  ;;  %v1752_v33 = vsel %vm1523_vm1, %v4650_v8, 0.0  ;;  %v1631_v19 = vsub.f32 %v4454_v22, %v1559_v61 }
 0x324   : > { %1753 = vadd.xlane.f32.xlu2 %v1752_v33  ;;  %v4683_v33 = vsel %vm4584_vm10, %v1424_v42, -1e+30 }
 0x325   : > { %v1684_v63 = vmul.f32 1.442695, %v1636_v11 }
 0x326   : > { %v3339_v41 = vpop.eup %3338 }
 0x327   : > { %v1848_v5 = vmul.f32 %v3339_v41, %v4495_v31  ;;  %3340 = vpow2.f32 %v1684_v63  ;;  %v1565_v60 = vpop.xlane.xlu0 %1564  ;;  %v1614_v31 = vsel %vm1523_vm1, %v4660_v26, -inf }
 0x328   : > { %v1633_v23 = vsub.f32 %v4513_v43, %v1565_v60  ;;  %v1674_v43 = vmul.f32 1.442695, %v1631_v19 }
 0x329   : > { %3146 = vmatmul.msk.f32.vlgmr.msra.gmra.mxu1 %vm1523_vm1, %v1848_v5 }
 0x32a   : > { %v1678_v53 = vmul.f32 1.442695, %v1633_v23  ;;  %v1733_v57 = vpop.xlane.xlu1 %1732  ;;  %2183 = vmatpush.msra.mxu1 %v4278_v14 }
 0x32b   : > { %3342 = vrcp.f32 %v1733_v57 }
 0x32c   : > { %3344 = vpow2.f32 %v1678_v53  ;;  %2184 = vmatpush.msra.mxu1 %v4257_v10  ;;  %1615 = vmax.xlane.f32.xlu2 %v1614_v31 }
 0x32d   : > { %v4670_v15 = vpop.eup %3340  ;;  %3346 = vpow2.f32 %v1674_v43 }
 0x32e   : > { %2185 = vmatpush.msra.mxu1 %v4244_v30  ;;  %v1764_v22 = vsel %vm1523_vm1, %v4670_v15, 0.0 }
 0x32f   : > { %1765 = vadd.xlane.f32.xlu1 %v1764_v22  ;;  %v1571_v14 = vpop.xlane.xlu2 %1570  ;;  %v1568_v61 = vpop.xlane.xlu0 %1567 }
 0x330   : > { %2186 = vmatpush.msra.mxu1 %v4232_v28  ;;  %v1634_v47 = vsub.f32 %v4524_v59, %v1568_v61  ;;  %v1635_v58 = vsub.f32 %v4528_v1, %v1571_v14 }
 0x331   : > { %v3343_v45 = vpop.eup %3342 }
 0x332   : > { %v4677_v10 = vpop.eup %3344  ;;  %v1680_v4 = vmul.f32 1.442695, %v1634_v47  ;;  %v1736_v11 = vpop.xlane.xlu1 %1735  ;;  %2187 = vmatpush.msra.mxu1 %v4220_v16  ;;  %v1849_v30 = vmul.f32 %v3343_v45, %v4515_v51  ;;  %v1617_v16 = vsel %vm1523_vm1, %v4683_v33, -inf  ;;  %v1682_v51 = vmul.f32 1.442695, %v1635_v58 }
 0x333   : > { %3348 = vrcp.f32 %v1736_v11  ;;  %v1755_v28 = vsel %vm1523_vm1, %v4677_v10, 0.0  ;;  %v4693_v41 = vpop.eup %3346 }
 0x334   : > { %3350 = vpow2.f32 %v1692_v17  ;;  %3147 = vmatmul.msk.f32.gmra.mxu1 %vm1523_vm1, %v1849_v30  ;;  %v2593_v59 = vadd.f32 %v1849_v30, %v1848_v5  ;;  %1756 = vadd.xlane.f32.xlu0 %v1755_v28 }
 0x335   : > { %3352 = vpow2.f32 %v1680_v4  ;;  %2188 = vmatpush.msra.mxu1 %v4204_v32  ;;  %v1642_v4 = vsub.f32 %v4477_v55, %v4647_v50 }
 0x337   : > { %2189 = vmatpush.msra.mxu1 %v4182_v35  ;;  %1618 = vmax.xlane.f32.xlu1 %v1617_v16  ;;  %v1739_v1 = vpop.xlane.xlu2 %1738  ;;  %v1577_v63 = vpop.xlane.xlu0 %1576  ;;  %v1641_v35 = vsub.f32 %v4469_v48, %v4655_v46  ;;  %v1696_v55 = vmul.f32 1.442695, %v1642_v4 }
 0x338   : > { %3354 = vrcp.f32 %v1739_v1  ;;  %v1637_v60 = vsub.f32 %v4543_v21, %v1577_v63  ;;  %v1749_v21 = vsel %vm1523_vm1, %v4693_v41, 0.0 }
 0x339   : > { %v3349_v23 = vpop.eup %3348  ;;  %2190 = vmatpush.msra.mxu1 %v4159_v24  ;;  %3356 = vpow2.f32 %v1682_v51  ;;  %v1694_v46 = vmul.f32 1.442695, %v1641_v35 }
 0x33a   : > { %v4697_v5 = vpop.eup %3350  ;;  %v1686_v32 = vmul.f32 1.442695, %v1637_v60  ;;  %v1598_v19 = vpop.xlane.xlu1 %1597  ;;  %v1850_v53 = vmul.f32 %v3349_v23, %v4530_v9 }
 0x33b   : > { %v4700_v57 = vpop.eup %3352  ;;  %v1644_v31 = vsub.f32 %v4552_v39, %v1598_v19  ;;  %v1776_v48 = vsel %vm1523_vm1, %v4697_v5, 0.0 }
 0x33c   : > { %3358 = vpow2.f32 %v1686_v32  ;;  %3148 = vmatmul.msk.f32.gmra.mxu1 %vm1523_vm1, %v1850_v53  ;;  %v2601_v24 = vadd.f32 %v2593_v59, %v1850_v53  ;;  %1750 = vadd.xlane.f32.xlu0 %v1749_v21  ;;  %v1758_v18 = vsel %vm1523_vm1, %v4700_v57, 0.0 }
 0x33d   : > { %v1700_v9 = vmul.f32 1.442695, %v1644_v31  ;;  %1759 = vadd.xlane.f32.xlu2 %v1758_v18 }
 0x33e   : > { %v3355_v43 = vpop.eup %3354 }
 0x33f   : > { %3360 = vpow2.f32 %v1700_v9  ;;  %1777 = vadd.xlane.f32.xlu1 %v1776_v48  ;;  %v1601_v39 = vpop.xlane.xlu2 %1600  ;;  %v1580_v22 = vpop.xlane.xlu0 %1579  ;;  %v1851_v14 = vmul.f32 %v3355_v43, %v4539_v29 }
 0x340   : > { %v1645_v61 = vsub.f32 %v4566_v56, %v1601_v39  ;;  %v1638_v42 = vsub.f32 %v4562_v52, %v1580_v22  ;;  %v4715_v17 = vpop.eup %3356  ;;  %3362 = vpow2.f32 %v1694_v46 }
 0x341   : > { %v4717_v47 = vadd.f32 %v2601_v24, %v1851_v14  ;;  %v1761_v52 = vsel %vm1523_vm1, %v4715_v17, 0.0 }
 0x342   : > { %v4719_v45 = vpop.eup %3358  ;;  %v1702_v11 = vmul.f32 1.442695, %v1645_v61  ;;  %v1688_v30 = vmul.f32 1.442695, %v1638_v42  ;;  %v1583_v58 = vpop.xlane.xlu1 %1582 }
 0x343   : > { %v1639_v28 = vsub.f32 %v4570_v20, %v1583_v58  ;;  %v1767_v29 = vsel %vm1523_vm1, %v4719_v45, 0.0 }
 0x344   : > { %3364 = vpow2.f32 %v1702_v11  ;;  %3149 = vmatmul.msk.f32.gmra.mxu1 %vm1523_vm1, %v1851_v14  ;;  %1768 = vadd.xlane.f32.xlu0 %v1767_v29 }
 0x345   : > { %v4729_v56 = vpop.eup %3360  ;;  %3366 = vpow2.f32 %v1688_v30  ;;  %1762 = vadd.xlane.f32.xlu2 %v1761_v52  ;;  %v1690_v59 = vmul.f32 1.442695, %v1639_v28 }
 0x346   : > { %v1788_v50 = vsel %vm1523_vm1, %v4729_v56, 0.0  ;;  %v4734_v1 = vpop.eup %3362  ;;  %3368 = vpow2.f32 %v1696_v55 }
 0x347   : > { %1789 = vadd.xlane.f32.xlu1 %v1788_v50  ;;  %v1604_v20 = vpop.xlane.xlu2 %1603  ;;  %v1595_v16 = vpop.xlane.xlu0 %1594  ;;  %3370 = vpow2.f32 %v1690_v59  ;;  %v1779_v35 = vsel %vm1523_vm1, %v4734_v1, 0.0 }
 0x348   : > { %v1646_v51 = vsub.f32 %v4590_v34, %v1604_v20  ;;  %v1643_v23 = vsub.f32 %v4581_v13, %v1595_v16 }
 0x34a   : > { %v4736_v63 = vpop.eup %3364  ;;  %v1704_v60 = vmul.f32 1.442695, %v1646_v51  ;;  %v1610_v32 = vpop.xlane.xlu1 %1609  ;;  %v1698_v31 = vmul.f32 1.442695, %v1643_v23 }
 0x34b   : > { %v4739_v19 = vpop.eup %3366  ;;  %v1648_v53 = vsub.f32 %v4594_v40, %v1610_v32  ;;  %v1791_v21 = vsel %vm1523_vm1, %v4736_v63, 0.0 }
 0x34c   : > { %v1770_v34 = vsel %vm1523_vm1, %v4739_v19, 0.0  ;;  %3372 = vpow2.f32 %v1704_v60  ;;  %v4748_v18 = vpop.eup %3368 }
 0x34d   : > { %1780 = vadd.xlane.f32.xlu2 %v1779_v35  ;;  %1771 = vadd.xlane.f32.xlu0 %v1770_v34  ;;  %v1708_v13 = vmul.f32 1.442695, %v1648_v53  ;;  %v4750_v9 = vpop.eup %3370  ;;  %3374 = vpow2.f32 %v1698_v31  ;;  %v1782_v39 = vsel %vm1523_vm1, %v4748_v18, 0.0 }
 0x34e   : > { %v1773_v22 = vsel %vm1523_vm1, %v4750_v9, 0.0 }
 0x34f   : > { %1792 = vadd.xlane.f32.xlu1 %v1791_v21  ;;  %v1607_v24 = vpop.xlane.xlu0 %1606  ;;  %3376 = vpow2.f32 %v1708_v13 }
 0x350   : > { %v1647_v40 = vsub.f32 %v4604_v6, %v1607_v24 }
 0x352   : > { %v1613_v43 = vpop.xlane.xlu1 %1612  ;;  %v4753_v48 = vpop.eup %3372  ;;  %v1706_v14 = vmul.f32 1.442695, %v1647_v40 }
 0x353   : > { %v1649_v46 = vsub.f32 %v4608_v37, %v1613_v43  ;;  %v1794_v61 = vsel %vm1523_vm1, %v4753_v48, 0.0  ;;  %v4762_v6 = vpop.eup %3374 }
 0x354   : > { %3378 = vpow2.f32 %v1706_v14  ;;  %v1785_v11 = vsel %vm1523_vm1, %v4762_v6, 0.0 }
 0x355   : > { %1783 = vadd.xlane.f32.xlu2 %v1782_v39  ;;  %1774 = vadd.xlane.f32.xlu0 %v1773_v22  ;;  %v1710_v42 = vmul.f32 1.442695, %v1649_v46  ;;  %v4764_v4 = vpop.eup %3376 }
 0x356   : > { %v1800_v37 = vsel %vm1523_vm1, %v4764_v4, 0.0 }
 0x357   : > { %1795 = vadd.xlane.f32.xlu1 %v1794_v61  ;;  %3380 = vpow2.f32 %v1710_v42 }
 0x35a   : > { %v4770_v58 = vpop.eup %3378 }
 0x35b   : > { %v1797_v55 = vsel %vm1523_vm1, %v4770_v58, 0.0 }
 0x35d   : > { %1801 = vadd.xlane.f32.xlu0 %v1800_v37  ;;  %1786 = vadd.xlane.f32.xlu2 %v1785_v11  ;;  %v1742_v30 = vpop.xlane.xlu2 %1741  ;;  %v4772_v28 = vpop.eup %3380 }
 0x35e   : > { %3382 = vrcp.f32 %v1742_v30  ;;  %v1803_v52 = vsel %vm1523_vm1, %v4772_v28, 0.0 }
 0x364   : > { %v3383_v29 = vpop.eup %3382  ;;  %v4787_v24 = vpop.f32.mrf.mxu3 }
 0x365   : > { %v1852_v50 = vmul.f32 %v3383_v29, %v4621_v3  ;;  %1804 = vadd.xlane.f32.xlu0 %v1803_v52  ;;  %1798 = vadd.xlane.f32.xlu2 %v1797_v55 }
 0x367   : > { %3150 = vmatmul.msk.f32.vlgmr.msra.gmra.mxu2 %vm1523_vm1, %v1852_v50  ;;  %v1745_v59 = vpop.xlane.xlu0 %1744 }
 0x368   : > { %3384 = vrcp.f32 %v1745_v59 }
 0x36c   : > { %v1908_v30 = vpop.f32.mrf.mxu3 }
 0x36d   : > { %v1748_v20 = vpop.xlane.xlu1 %1747 }
 0x36e   : > { %v3385_v16 = vpop.eup %3384  ;;  %3386 = vrcp.f32 %v1748_v20 }
 0x36f   : > { %v1853_v51 = vmul.f32 %v3385_v16, %v4633_v7 }
 0x371   : > { %3151 = vmatmul.msk.f32.gmra.mxu2 %vm1523_vm1, %v1853_v51  ;;  %v2594_v60 = vadd.f32 %v1853_v51, %v1852_v50 }
 0x374   : > { %v3387_v23 = vpop.eup %3386 }
 0x375   : > { %v1854_v32 = vmul.f32 %v3387_v23, %v4638_v27 }
 0x377   : > { %v2602_v53 = vadd.f32 %v2594_v60, %v1854_v32 }
 0x379   : > { %3152 = vmatmul.msk.f32.gmra.mxu2 %vm1523_vm1, %v1854_v32 }
 0x397   : > { %v1754_v3 = vpop.xlane.xlu2 %1753 }
 0x398   : > { %3388 = vrcp.f32 %v1754_v3 }
 0x39e   : > { %v3389_v35 = vpop.eup %3388 }
 0x39f   : > { %v1856_v34 = vmul.f32 %v3389_v35, %v4650_v8  ;;  %v1616_v31 = vpop.xlane.xlu2 %1615 }
 0x3a0   : > { %v1650_v21 = vsub.f32 %v4660_v26, %v1616_v31  ;;  %v1911_v31 = vpop.f32.mrf.mxu3 }
 0x3a1   : > { %3154 = vmatmul.msk.f32.vlgmr.msra.gmra.mxu3 %vm1523_vm1, %v1856_v34 }
 0x3a2   : > { %v1712_v7 = vmul.f32 1.442695, %v1650_v21  ;;  %v1766_v13 = vpop.xlane.xlu1 %1765 }
 0x3a3   : > { %3390 = vrcp.f32 %v1766_v13 }
 0x3a4   : > { %3392 = vpow2.f32 %v1712_v7 }
 0x3a6   : > { %v4789_v43 = vpop.f32.mrf.mxu1 }
 0x3a7   : > { %v1757_v27 = vpop.xlane.xlu0 %1756 }
 0x3a8   : > { %3394 = vrcp.f32 %v1757_v27 }
 0x3a9   : > { %v3391_v40 = vpop.eup %3390 }
 0x3aa   : > { %v4791_v46 = vpop.eup %3392  ;;  %v1860_v8 = vmul.f32 %v3391_v40, %v4670_v15  ;;  %v1619_v39 = vpop.xlane.xlu1 %1618 }
 0x3ab   : > { %v1651_v26 = vsub.f32 %v4683_v33, %v1619_v39  ;;  %v1806_v22 = vsel %vm1523_vm1, %v4791_v46, 0.0 }
 0x3ac   : > { %3158 = vmatmul.msk.f32.vlgmr.msrb.gmra.mxu1 %vm1523_vm1, %v1860_v8  ;;  %1807 = vadd.xlane.f32.xlu1 %v1806_v22 }
 0x3ad   : > { %v1714_v14 = vmul.f32 1.442695, %v1651_v26 }
 0x3ae   : > { %v3395_v61 = vpop.eup %3394 }
 0x3af   : > { %3396 = vpow2.f32 %v1714_v14  ;;  %v1751_v42 = vpop.xlane.xlu0 %1750  ;;  %v1857_v37 = vmul.f32 %v3395_v61, %v4677_v10  ;;  %v1914_v14 = vpop.f32.mrf.mxu3 }
 0x3b0   : > { %v1760_v11 = vpop.xlane.xlu2 %1759  ;;  %3398 = vrcp.f32 %v1751_v42 }
 0x3b1   : > { %3400 = vrcp.f32 %v1760_v11  ;;  %v1949_v15 = vpop.f32.mrf.mxu1  ;;  %3155 = vmatmul.msk.f32.gmra.mxu3 %vm1523_vm1, %v1857_v37  ;;  %v2595_v33 = vadd.f32 %v1857_v37, %v1856_v34 }
 0x3b2   : > { %v3276_v29 = vpack.i.bf16 %v1949_v15, %v1908_v30  ;;  %v1778_v52 = vpop.xlane.xlu1 %1777 }
 0x3b3   : > { %3402 = vrcp.f32 %v1778_v52 }
 0x3b4   : > { %3277 = vrot.lane.b32.xlu2 %v3276_v29, %s3537_s23 }
 0x3b5   : > { %v4801_v55 = vpop.eup %3396 }
 0x3b6   : > { %v3399_v50 = vpop.eup %3398  ;;  %v1809_v10 = vsel %vm1523_vm1, %v4801_v55, 0.0 }
 0x3b7   : > { %v3401_v59 = vpop.eup %3400  ;;  %1810 = vadd.xlane.f32.xlu0 %v1809_v10  ;;  %v1769_v20 = vpop.xlane.xlu0 %1768  ;;  %v1855_v16 = vmul.f32 %v3399_v50, %v4693_v41 }
 0x3b8   : > { %v1763_v51 = vpop.xlane.xlu2 %1762  ;;  %3404 = vrcp.f32 %v1769_v20  ;;  %v1858_v60 = vmul.f32 %v3401_v59, %v4700_v57 }
 0x3b9   : > { %3406 = vrcp.f32 %v1763_v51  ;;  %3153 = vmatmul.msk.f32.gmra.mxu2 %vm1523_vm1, %v1855_v16  ;;  %v4808_v23 = vadd.f32 %v2602_v53, %v1855_v16  ;;  %v3403_v35 = vpop.eup %3402  ;;  %v1952_v34 = vpop.f32.mrf.mxu1 }
 0x3ba   : > { %v1790_v32 = vpop.xlane.xlu1 %1789  ;;  %3156 = vmatmul.msk.f32.gmra.mxu3 %vm1523_vm1, %v1858_v60  ;;  %v2603_v3 = vadd.f32 %v2595_v33, %v1858_v60  ;;  %v1864_v41 = vmul.f32 %v3403_v35, %v4697_v5  ;;  %v3281_v5 = vpack.i.bf16 %v1952_v34, %v1911_v31 }
 0x3bb   : > { %3408 = vrcp.f32 %v1790_v32 }
 0x3be   : > { %v3405_v21 = vpop.eup %3404 }
 0x3bf   : > { %v3407_v7 = vpop.eup %3406  ;;  %v1861_v13 = vmul.f32 %v3405_v21, %v4719_v45 }
 0x3c0   : > { %v1781_v57 = vpop.xlane.xlu2 %1780  ;;  %v1772_v27 = vpop.xlane.xlu0 %1771  ;;  %v1859_v40 = vmul.f32 %v3407_v7, %v4715_v17 }
 0x3c1   : > { %3410 = vrcp.f32 %v1781_v57  ;;  %3159 = vmatmul.msk.f32.gmra.mxu1 %vm1523_vm1, %v1861_v13  ;;  %v2596_v53 = vadd.f32 %v1861_v13, %v1860_v8  ;;  %3162 = vmatmul.msk.f32.vlgmr.msrb.gmra.mxu2 %vm1523_vm1, %v1864_v41  ;;  %v3409_v22 = vpop.eup %3408  ;;  %v1955_v45 = vpop.f32.mrf.mxu1 }
 0x3c2   : > { %3412 = vrcp.f32 %v1772_v27  ;;  %v1793_v39 = vpop.xlane.xlu1 %1792  ;;  %3157 = vmatmul.msk.f32.gmra.mxu3 %vm1523_vm1, %v1859_v40  ;;  %v4817_v26 = vadd.f32 %v2603_v3, %v1859_v40  ;;  %v1868_v8 = vmul.f32 %v3409_v22, %v4729_v56  ;;  %v3286_v15 = vpack.i.bf16 %v1955_v45, %v1914_v14  ;;  %v2340_v40 = vld [vmem:[%s5215_s4 + $0x78] sm:$0xff]  ;;  %v2334_v22 = vld [vmem:[%s5215_s4 + $0x48] sm:$0xff]  ;;  %v2333_v45 = vld [vmem:[%s5215_s4 + $0x40] sm:$0xff] }
 0x3c3   : > { %3414 = vrcp.f32 %v1793_v39  ;;  %2342 = vmatpush.msra.mxu2 %v2340_v40  ;;  %v2336_v39 = vld [vmem:[%s5215_s4 + $0x58] sm:$0xff]  ;;  %v2331_v14 = vld [vmem:[%s5215_s4 + $0x30] sm:$0xff] }
 0x3c5   : > { %3282 = vrot.lane.b32.xlu1 %v3281_v5, %s3538_s29  ;;  %v2335_v5 = vld [vmem:[%s5215_s4 + $0x50] sm:$0xff] }
 0x3c7   : > { %v3411_v17 = vpop.eup %3410 }
 0x3c8   : > { %v3413_v61 = vpop.eup %3412  ;;  %v1784_v42 = vpop.xlane.xlu2 %1783  ;;  %v1865_v11 = vmul.f32 %v3411_v17, %v4734_v1  ;;  %v2332_v17 = vld [vmem:[%s5215_s4 + $0x38] sm:$0xff] }
 0x3c9   : > { %v1775_v37 = vpop.xlane.xlu0 %1774  ;;  %v3415_v30 = vpop.eup %3414  ;;  %3416 = vrcp.f32 %v1784_v42  ;;  %v1862_v33 = vmul.f32 %v3413_v61, %v4739_v19  ;;  %v2330_v61 = vld [vmem:[%s5215_s4 + $0x28] sm:$0xff]  ;;  %v2328_v42 = vld [vmem:[%s5215_s4 + $0x18] sm:$0xff] }
 0x3ca   : > { %3418 = vrcp.f32 %v1775_v37  ;;  %v1796_v29 = vpop.xlane.xlu1 %1795  ;;  %3163 = vmatmul.msk.f32.gmra.mxu2 %vm1523_vm1, %v1865_v11  ;;  %v2597_v52 = vadd.f32 %v1865_v11, %v1864_v41  ;;  %3166 = vmatmul.msk.f32.vlgmr.msrb.gmra.mxu3 %vm1523_vm1, %v1868_v8  ;;  %v1869_v50 = vmul.f32 %v3415_v30, %v4736_v63  ;;  %v2327_v37 = vld [vmem:[%s5215_s4 + $0x10] sm:$0xff]  ;;  %v2326_v11 = vld [vmem:[%s5215_s4 + $0x8] sm:$0xff]  ;;  %v2325_v30 = vld [vmem:[%s5215_s4] sm:$0xff] }
 0x3cb   : > { %3420 = vrcp.f32 %v1796_v29  ;;  %3160 = vmatmul.msk.f32.gmra.mxu1 %vm1523_vm1, %v1862_v33  ;;  %v2604_v56 = vadd.f32 %v2596_v53, %v1862_v33  ;;  %3287 = vrot.lane.b32.xlu0 %v3286_v15, %s3539_s8  ;;  %v2339_v53 = vld [vmem:[%s5215_s4 + $0x70] sm:$0xff] }
 0x3cc   : > { %v2598_v1 = vadd.f32 %v1869_v50, %v1868_v8  ;;  %2343 = vmatpush.msra.mxu2 %v2339_v53  ;;  %v2329_v8 = vld [vmem:[%s5215_s4 + $0x20] sm:$0xff] }
 0x3cf   : > { %v3417_v10 = vpop.eup %3416 }
 0x3d0   : > { %v3419_v59 = vpop.eup %3418  ;;  %v1787_v19 = vpop.xlane.xlu2 %1786  ;;  %v1866_v16 = vmul.f32 %v3417_v10, %v4748_v18 }
 0x3d1   : > { %v1802_v20 = vpop.xlane.xlu0 %1801  ;;  %v3421_v51 = vpop.eup %3420  ;;  %3422 = vrcp.f32 %v1787_v19  ;;  %v1863_v60 = vmul.f32 %v3419_v59, %v4750_v9 }
 0x3d2   : > { %3424 = vrcp.f32 %v1802_v20  ;;  %3164 = vmatmul.msk.f32.gmra.mxu2 %vm1523_vm1, %v1866_v16  ;;  %v2605_v63 = vadd.f32 %v2597_v52, %v1866_v16  ;;  %3167 = vmatmul.msk.f32.gmra.mxu3 %vm1523_vm1, %v1869_v50  ;;  %v1870_v32 = vmul.f32 %v3421_v51, %v4753_v48 }
 0x3d3   : > { %3161 = vmatmul.msk.f32.gmra.mxu1 %vm1523_vm1, %v1863_v60  ;;  %v4834_v3 = vadd.f32 %v2604_v56, %v1863_v60 }
 0x3d4   : > { %v2606_v35 = vadd.f32 %v2598_v1, %v1870_v32 }
 0x3d7   : > { %v3423_v34 = vpop.eup %3422 }
 0x3d8   : > { %v3425_v31 = vpop.eup %3424  ;;  %v1799_v18 = vpop.xlane.xlu2 %1798  ;;  %v1867_v7 = vmul.f32 %v3423_v34, %v4762_v6 }
 0x3d9   : > { %v1805_v21 = vpop.xlane.xlu0 %1804  ;;  %v1872_v9 = vmul.f32 %v3425_v31, %v4764_v4  ;;  %3426 = vrcp.f32 %v1799_v18 }
 0x3da   : > { %3428 = vrcp.f32 %v1805_v21  ;;  %3165 = vmatmul.msk.f32.gmra.mxu2 %vm1523_vm1, %v1867_v7  ;;  %v4839_v41 = vadd.f32 %v2605_v63, %v1867_v7  ;;  %3168 = vmatmul.msk.f32.gmra.mxu3 %vm1523_vm1, %v1870_v32 }
 0x3db   : > { %3170 = vmatmul.msk.f32.vlgmr.msra.gmra.mxu1 %vm1523_vm1, %v1872_v9 }
 0x3df   : > { %v3427_v48 = vpop.eup %3426 }
 0x3e0   : > { %v3429_v13 = vpop.eup %3428  ;;  %v1871_v57 = vmul.f32 %v3427_v48, %v4770_v58  ;;  %v2338_v58 = vld [vmem:[%s5215_s4 + $0x68] sm:$0xff] }
 0x3e1   : > { %v1873_v27 = vmul.f32 %v3429_v13, %v4772_v28  ;;  %v2337_v28 = vld [vmem:[%s5215_s4 + $0x60] sm:$0xff]  ;;  %2344 = vmatpush.msra.mxu2 %v2338_v58 }
 0x3e2   : > { %3169 = vmatmul.msk.f32.gmra.mxu3 %vm1523_vm1, %v1871_v57  ;;  %v4846_v6 = vadd.f32 %v2606_v35, %v1871_v57 }
 0x3e3   : > { %3171 = vmatmul.msk.f32.gmra.mxu1 %vm1523_vm1, %v1873_v27  ;;  %v2599_v4 = vadd.f32 %v1873_v27, %v1872_v9  ;;  %2345 = vmatpush.msra.mxu2 %v2337_v28 }
 0x3e5   : > { %2346 = vmatpush.msra.mxu2 %v2336_v39 }
 0x3e7   : > { %2347 = vmatpush.msra.mxu2 %v2335_v5 }
 0x3e9   : > { %2348 = vmatpush.msra.mxu2 %v2334_v22 }
 0x3ea   : > { %v4897_v33 = vpop.f32.mrf.mxu2 }
 0x3eb   : > { %2349 = vmatpush.msra.mxu2 %v2333_v45 }
 0x3ed   : > { %2350 = vmatpush.msra.mxu2 %v2332_v17 }
 0x3ef   : > { %2351 = vmatpush.msra.mxu2 %v2331_v14 }
 0x3f1   : > { %2352 = vmatpush.msra.mxu2 %v2330_v61 }
 0x3f3   : > { %2353 = vmatpush.msra.mxu2 %v2329_v8 }
 0x3f4   : > { %v1990_v56 = vpop.f32.mrf.mxu2 }
 0x3f5   : > { %2354 = vmatpush.msra.mxu2 %v2328_v42 }
 0x3f7   : > { %2355 = vmatpush.msra.mxu2 %v2327_v37 }
 0x3f9   : > { %2356 = vmatpush.msra.mxu2 %v2326_v11 }
 0x3fb   : > { %2357 = vmatpush.msra.mxu2 %v2325_v30 }
 0x3fc   : > { %v1993_v20 = vpop.f32.mrf.mxu2 }
 0x41f   : > { %v1808_v15 = vpop.xlane.xlu1 %1807 }
 0x420   : > { %3430 = vrcp.f32 %v1808_v15 }
 0x424   : > { %v4901_v10 = vpop.f32.mrf.mxu3 }
 0x426   : > { %v3431_v29 = vpop.eup %3430 }
 0x427   : > { %v1874_v52 = vmul.f32 %v3431_v29, %v4791_v46  ;;  %v3278_v46 = vpop.permute.xlu2 %3277 }
 0x428   : > { %v3279_v35 = vunpack.i.l.bf16 %v3278_v46  ;;  %v3280_v27 = vunpack.i.h.bf16 %v3278_v46 }
 0x429   : > { %3172 = vmatmul.msk.f32.gmra.mxu1 %vm1523_vm1, %v1874_v52  ;;  %v2607_v50 = vadd.f32 %v2599_v4, %v1874_v52  ;;  %v4907_v63 = vpop.f32.mrf.mxu1 }
 0x42a   : > { %v1811_v1 = vpop.xlane.xlu0 %1810 }
 0x42b   : > { %3432 = vrcp.f32 %v1811_v1 }
 0x431   : > { %v3433_v59 = vpop.eup %3432 }
 0x432   : > { %v1875_v19 = vmul.f32 %v3433_v59, %v4801_v55  ;;  %v2300_v55 = vsel %vm990_vm4, %v4787_v24, %v3279_v35  ;;  %v2301_v24 = vsel %vm990_vm4, %v4789_v43, %v3280_v27 }
 0x434   : > { %3173 = vmatmul.msk.f32.gmra.mxu1 %vm1523_vm1, %v1875_v19  ;;  %v2031_v16 = vpop.f32.mrf.mxu3  ;;  %v4905_v51 = vadd.f32 %v2607_v50, %v1875_v19 }
 0x435   : > { %v3291_v60 = vpack.i.bf16 %v2031_v16, %v1990_v56 }
 0x437   : > { %3292 = vrot.lane.b32.xlu2 %v3291_v60, %s3537_s23  ;;  %v3283_v32 = vpop.permute.xlu1 %3282 }
 0x438   : > { %v3284_v34 = vunpack.i.l.bf16 %v3283_v32  ;;  %v3285_v4 = vunpack.i.h.bf16 %v3283_v32 }
 0x43a   : > { %v2308_v13 = vsel %vm1523_vm1, %v2300_v55, %v3284_v34  ;;  %v2309_v28 = vsel %vm1523_vm1, %v2301_v24, %v3285_v4 }
 0x43c   : > { %v1996_v31 = vpop.f32.mrf.mxu2 }
 0x43d   : > { %v2034_v18 = vpop.f32.mrf.mxu3  ;;  %v3288_v21 = vpop.permute.xlu0 %3287  ;;  %2280 = vrot.lane.b32.xlu1 %v1996_v31, %s3539_s8 }
 0x43e   : > { %v3296_v7 = vpack.i.bf16 %v2034_v18, %v1993_v20  ;;  %v3289_v9 = vunpack.i.l.bf16 %v3288_v21  ;;  %v2072_v48 = vpop.f32.mrf.mxu1  ;;  %v3290_v40 = vunpack.i.h.bf16 %v3288_v21 }
 0x440   : > { %3297 = vrot.lane.b32.xlu0 %v3296_v7, %s3538_s29  ;;  %v2317_v57 = vsel %vm2316_vm11, %v2308_v13, %v3289_v9  ;;  %v2318_v5 = vsel %vm2316_vm11, %v2309_v28, %v3290_v40 }
 0x441   : > { %2358 = vmatmul.f32.vlgmr.msra.gmra.mxu2 %v2317_v57 }
 0x444   : > { %v2110_v53 = vpop.f32.mrf.mxu2 }
 0x445   : > { %v2037_v58 = vpop.f32.mrf.mxu3 }
 0x446   : > { %2282 = vrot.lane.b32.xlu2 %v2037_v58, %s3539_s8 }
 0x448   : > { %v2075_v39 = vpop.f32.mrf.mxu1 }
 0x449   : > { %2252 = vrot.lane.b32.xlu1 %v2075_v39, %s3538_s29  ;;  %2361 = vmatmul.f32.gmra.mxu2 %v2318_v5 }
 0x44d   : > { %v2113_v22 = vpop.f32.mrf.mxu2  ;;  %v2151_v45 = vpop.f32.mrf.mxu3 }
 0x44e   : > { %v3301_v17 = vpack.i.bf16 %v2113_v22, %v2072_v48 }
 0x450   : > { %v2078_v14 = vpop.f32.mrf.mxu1  ;;  %3302 = vrot.lane.b32.xlu0 %v3301_v17, %s3537_s23 }
 0x451   : > { %2284 = vrot.lane.b32.xlu2 %v2078_v14, %s3539_s8 }
 0x455   : > { %v2116_v61 = vpop.f32.mrf.mxu2  ;;  %v2154_v8 = vpop.f32.mrf.mxu3 }
 0x458   : > { %v2192_v42 = vpop.f32.mrf.mxu1  ;;  %2254 = vrot.lane.b32.xlu0 %v2116_v61, %s3538_s29 }
 0x459   : > { %2224 = vrot.lane.b32.xlu2 %v2154_v8, %s3537_s23 }
 0x45d   : > { %v2119_v43 = vpop.f32.mrf.mxu2  ;;  %v2157_v37 = vpop.f32.mrf.mxu3 }
 0x45e   : > { %2286 = vrot.lane.b32.xlu1 %v2119_v43, %s3539_s8 }
 0x460   : > { %v2195_v11 = vpop.f32.mrf.mxu1  ;;  %2256 = vrot.lane.b32.xlu0 %v2157_v37, %s3538_s29 }
 0x461   : > { %2226 = vrot.lane.b32.xlu2 %v2195_v11, %s3537_s23 }
 0x465   : > { %v2160_v30 = vpop.f32.mrf.mxu3 }
 0x466   : > { %2288 = vrot.lane.b32.xlu1 %v2160_v30, %s3539_s8 }
 0x491   : > { %v3293_v29 = vpop.permute.xlu2 %3292 }
 0x492   : > { %v3294_v52 = vunpack.i.l.bf16 %v3293_v29  ;;  %v3295_v16 = vunpack.i.h.bf16 %v3293_v29 }
 0x494   : > { %v2302_v59 = vsel %vm990_vm4, %v4897_v33, %v3294_v52  ;;  %v2303_v32 = vsel %vm990_vm4, %v4901_v10, %v3295_v16 }
 0x4a0   : > { %v2283_v34 = vpop.permute.xlu2 %2282 }
 0x4a6   : > { %v2198_v15 = vpop.f32.mrf.mxu1 }
 0x4a7   : > { %2258 = vrot.lane.b32.xlu0 %v2198_v15, %s3538_s29  ;;  %v4956_v15 = vld [vmem:[%s5216_s5] sm:$0xff] }
 0x4a8   : > { %v2341_v29 = vperm.slane %v4956_v15, 0 }
 0x4ab   : > { %v2285_v7 = vpop.permute.xlu2 %2284 }
 0x4af   : > { %v2281_v19 = vpop.permute.xlu1 %2280 }
 0x4b1   : > { %v2201_v50 = vpop.f32.mrf.mxu1 }
 0x4b2   : > { %2290 = vrot.lane.b32.xlu1 %v2201_v50, %s3539_s8  ;;  %v3298_v56 = vpop.permute.xlu0 %3297  ;;  %s5069_s8 = sshll.u32 %s3603_s28, 3 }
 0x4b3   : > { %v3299_v1 = vunpack.i.l.bf16 %v3298_v56  ;;  %v3300_v46 = vunpack.i.h.bf16 %v3298_v56  ;;  %v2225_v58 = vpop.permute.xlu2 %2224  ;;  %p305_p12 = scmp.lt.s32.totalorder %s5069_s8, 15  ;;  %s2807_s22 = scalar_lea.hbm %s5218_s7, %s5069_s8 }
 0x4b4   : > { %s2811_s23 = sshll.u32 %s2807_s22, 4  ;;  %s2812_s23 = int_to_ptr.hbm [resolvable:$true] %s2811_s23 }
 0x4b5   : > { %v2310_v20 = vsel %vm1523_vm1, %v2302_v59, %v3299_v1  ;;  %v2311_v35 = vsel %vm1523_vm1, %v2303_v32, %v3300_v46  ;;  %s306_s17 = scalar_select %p305_p12, %s5069_s8, 15 }
 0x4b6   : > { %v2319_v60 = vsel %vm2316_vm11, %v2310_v20, %v2281_v19  ;;  %v2320_v31 = vsel %vm2316_vm11, %v2311_v35, %v2283_v34 }
 0x4b7   : > { %2364 = vmatmul.f32.gmra.mxu2 %v2319_v60  ;;  %s2917_s28 = sshll.u32 %s306_s17, 3  ;;  %s3485_s17 = sshra.s32 %s2812_s23, 4  ;;  %s3486_s17 = int_to_ptr.hbm [resolvable:$true] %s3485_s17 }
 0x4b8   : > { %s5086_s18 = scalar_lea.vmem %s5217_s6, %s2917_s28  ;;  %s3487_s8 = scalar_lea.hbm %s3486_s17, 8 }
 0x4b9   : > { %p3488_p13 = scmp.ne.s32.totalorder %s3486_s17, %s3487_s8  ;;  %p3492_p2 = scmp.lt.s32.totalorder %s3486_s17, %s5218_s7 }
 0x4ba   : > { %p3493_p3 = scmp.lt.s32.totalorder %s3491_s16, %s3487_s8 }
 0x4bb   : > { %v2253_v33 = vpop.permute.xlu1 %2252  ;;  %v2227_v22 = vpop.permute.xlu2 %2226  ;;  %p3489_p0 = pnand %p3488_p13, %p3620_p5 }
 0x4bc   : > { %p3494_p4 = por %p3493_p3, %p3492_p2 }
 0x4bd   : > { %p3490_p1 = pneg %p3489_p0 }
 0x4bf   : > { %2367 = vmatmul.f32.gmra.mxu2 %v2320_v31  ;;  %p3495_p7 = pnand %p3494_p4, %p3490_p1 }
 0x4c2   : > { %v3303_v18 = vpop.permute.xlu0 %3302 }
 0x4c3   : > { %v3304_v21 = vunpack.i.l.bf16 %v3303_v18  ;;  %v3305_v13 = vunpack.i.h.bf16 %v3303_v18 }
 0x4c4   : > { %v2359_v43 = vpop.f32.mrf.mxu2 }
 0x4c5   : > { %v2304_v55 = vsel %vm990_vm4, %v4907_v63, %v3304_v21  ;;  %v2305_v57 = vsel %vm990_vm4, %v2110_v53, %v3305_v13  ;;  %v2306_v63 = vsel %vm990_vm4, %v2151_v45, %v2225_v58  ;;  %v2307_v53 = vsel %vm990_vm4, %v2192_v42, %v2227_v22 }
 0x4c6   : > { %v2312_v9 = vsel %vm1523_vm1, %v2304_v55, %v2253_v33  ;;  %v4963_v46 = vadd.f32 %v2359_v43, %v2341_v29  ;;  %v3540_v21 = vmov 32.0  }
 0x4c7   : > { %v2321_v48 = vsel %vm2316_vm11, %v2312_v9, %v2285_v7  ;;  %3434 = vrcp.f32 %v3540_v21 }
 0x4c8   : > { %2370 = vmatmul.f32.gmra.mxu2 %v2321_v48  ;;  %v2383_v32 = vsel %vm990_vm4, %v4963_v46, 0.0 }
 0x4ca   : > { %v2255_v10 = vpop.permute.xlu0 %2254 }
 0x4cb   : > { %v2313_v27 = vsel %vm1523_vm1, %v2305_v57, %v2255_v10 }
 0x4cc   : > { %v2362_v37 = vpop.f32.mrf.mxu2 }
 0x4cd   : > { %v3435_v55 = vpop.eup %3434  ;;  %v4975_v7 = vadd.f32 %v2362_v37, %v2341_v29 }
 0x4ce   : > { %v2408_v9 = vmul.f32 32.0, %v3435_v55  ;;  %vm2412_vm12 = vweird.f32 %v3435_v55 }
 0x4cf   : > { %v2386_v48 = vsel %vm990_vm4, %v4975_v7, 0.0 }
 0x4d0   : > { %v2287_v4 = vpop.permute.xlu1 %2286  ;;  %v2409_v13 = vsub.f32 1.0, %v2408_v9 }
 0x4d1   : > { %v2322_v40 = vsel %vm2316_vm11, %v2313_v27, %v2287_v4  ;;  %v2616_v4 = vmul.f32 0.25, %v4644_v49 }
 0x4d2   : > { %2373 = vmatmul.f32.gmra.mxu2 %v2322_v40  ;;  %v2257_v24 = vpop.permute.xlu0 %2256  ;;  %v2410_v10 = vmul.f32 %v3435_v55, %v2409_v13 }
 0x4d3   : > { %v2314_v28 = vsel %vm1523_vm1, %v2306_v63, %v2257_v24  ;;  %v2624_v63 = vadd.f32 1e-08, %v2616_v4 }
 0x4d4   : > { %v2411_v57 = vadd.f32 %v3435_v55, %v2410_v10 }
 0x4d5   : > { %3436 = vlog2.f32 %v2624_v63 }
 0x4d6   : > { %v4979_v27 = vsel %vm2412_vm12, %v3435_v55, %v2411_v57 }
 0x4d8   : > { %v2289_v39 = vpop.permute.xlu1 %2288 }
 0x4d9   : > { %v2323_v5 = vsel %vm2316_vm11, %v2314_v28, %v2289_v39 }
 0x4da   : > { %2376 = vmatmul.f32.gmra.mxu2 %v2323_v5  ;;  %v2619_v5 = vmul.f32 0.25, %v4817_v26  ;;  %v2618_v26 = vmul.f32 0.25, %v4808_v23 }
 0x4db   : > { %v3437_v43 = vpop.eup %3436 }
 0x519   : > { %v2259_v17 = vpop.permute.xlu0 %2258 }
 0x51a   : > { %v2315_v14 = vsel %vm1523_vm1, %v2307_v53, %v2259_v17 }
 0x524   : > { %v2291_v61 = vpop.permute.xlu1 %2290 }
 0x525   : > { %v2324_v8 = vsel %vm2316_vm11, %v2315_v14, %v2291_v61 }
 0x526   : > { %2379 = vmatmul.f32.gmra.mxu2 %v2324_v8  ;;  %v2627_v8 = vadd.f32 1e-08, %v2619_v5 }
 0x528   : > { %3438 = vlog2.f32 %v2627_v8 }
 0x53a   : > { %v2365_v11 = vpop.f32.mrf.mxu2 }
 0x53b   : > { %v2366_v56 = vadd.f32 %v2365_v11, %v2341_v29 }
 0x53d   : > { %v2389_v20 = vsel %vm990_vm4, %v2366_v56, 0.0 }
 0x542   : > { %v2368_v45 = vpop.f32.mrf.mxu2 }
 0x543   : > { %v2369_v16 = vadd.f32 %v2368_v45, %v2341_v29 }
 0x545   : > { %v2392_v60 = vsel %vm990_vm4, %v2369_v16, 0.0 }
 0x54b   : > { %v2371_v30 = vpop.f32.mrf.mxu2 }
 0x54c   : > { %v4971_v18 = vadd.f32 %v2371_v30, %v2341_v29 }
 0x54e   : > { %v2395_v33 = vsel %vm990_vm4, %v4971_v18, 0.0 }
 0x555   : > { %v2374_v52 = vpop.f32.mrf.mxu2 }
 0x556   : > { %v2375_v42 = vadd.f32 %v2374_v52, %v2341_v29 }
 0x558   : > { %v2398_v50 = vsel %vm990_vm4, %v2375_v42, 0.0 }
 0x559   : > { %2399 = vadd.xlane.f32.xlu1 %v2398_v50 }
 0x55d   : > { %v2377_v1 = vpop.f32.mrf.mxu2 }
 0x55e   : > { %v2378_v59 = vadd.f32 %v2377_v1, %v2341_v29 }
 0x560   : > { %v2401_v19 = vsel %vm990_vm4, %v2378_v59, 0.0 }
 0x561   : > { %2402 = vadd.xlane.f32.xlu0 %v2401_v19  ;;  %2390 = vadd.xlane.f32.xlu1 %v2389_v20  ;;  %v3439_v19 = vpop.eup %3438 }
 0x569   : > { %2393 = vadd.xlane.f32.xlu0 %v2392_v60 }
 0x571   : > { %2384 = vadd.xlane.f32.xlu0 %v2383_v32 }
 0x5a9   : > { %v2380_v35 = vpop.f32.mrf.mxu2 }
 0x5aa   : > { %v4967_v34 = vadd.f32 %v2380_v35, %v2341_v29  ;;  %v2622_v29 = vmul.f32 0.25, %v4846_v6  ;;  %v2621_v6 = vmul.f32 0.25, %v4839_v41  ;;  %v2639_v35 = vmul.f32 0.6931472, %v3439_v19 }
 0x5ac   : > { %v2404_v31 = vsel %vm990_vm4, %v4967_v34, 0.0  ;;  %v2629_v21 = vadd.f32 1e-08, %v2621_v6  ;;  %v2651_v55 = vsel %vm4484_vm7, %v2639_v35, 0.0 }
 0x5ad   : > { %2405 = vadd.xlane.f32.xlu2 %v2404_v31 }
 0x5b5   : > { %2396 = vadd.xlane.f32.xlu2 %v2395_v33 }
 0x5bd   : > { %2387 = vadd.xlane.f32.xlu2 %v2386_v48  ;;  %v2665_v48 = vsel %vm1523_vm1, %v2651_v55, 0.0 }
 0x5cc   : > { %v2400_v40 = vpop.xlane.xlu1 %2399 }
 0x5cd   : > { %v2419_v58 = vmul.f32 %v4979_v27, %v2400_v40 }
 0x5cf   : > { %v4983_v24 = vsub.f32 %v2375_v42, %v2419_v58  ;;  %v2633_v42 = vmul.f32 0.6931472, %v3437_v43 }
 0x5d1   : > { %v2435_v28 = vmul.f32 %v4983_v24, %v4983_v24  ;;  %v2648_v23 = vsel %vm4162_vm2, %v2633_v42, 0.0  ;;  %v2623_v42 = vmul.f32 0.25, %v4905_v51 }
 0x5d2   : > { %v2656_v32 = vsel %vm1523_vm1, %v2648_v23, 0.0 }
 0x5d3   : > { %v2453_v39 = vsel %vm990_vm4, %v2435_v28, 0.0 }
 0x5d4   : > { %v2403_v22 = vpop.xlane.xlu0 %2402  ;;  %v2391_v17 = vpop.xlane.xlu1 %2390  ;;  %2454 = vadd.xlane.f32.xlu0 %v2453_v39 }
 0x5d5   : > { %v2420_v53 = vmul.f32 %v4979_v27, %v2403_v22  ;;  %v2416_v49 = vmul.f32 %v4979_v27, %v2391_v17 }
 0x5d7   : > { %v4991_v14 = vsub.f32 %v2378_v59, %v2420_v53  ;;  %v4993_v61 = vsub.f32 %v2366_v56, %v2416_v49  ;;  %v2626_v56 = vadd.f32 1e-08, %v2618_v26  ;;  %v2630_v59 = vadd.f32 1e-08, %v2622_v29 }
 0x5d8   : > { %v2617_v53 = vmul.f32 0.25, %v4717_v47 }
 0x5d9   : > { %v2436_v37 = vmul.f32 %v4991_v14, %v4991_v14  ;;  %v2432_v11 = vmul.f32 %v4993_v61, %v4993_v61  ;;  %3440 = vlog2.f32 %v2626_v56 }
 0x5da   : > { %3442 = vlog2.f32 %v2630_v59  ;;  %v2625_v43 = vadd.f32 1e-08, %v2617_v53 }
 0x5db   : > { %v2456_v45 = vsel %vm990_vm4, %v2436_v37, 0.0  ;;  %v2444_v30 = vsel %vm990_vm4, %v2432_v11, 0.0  ;;  %3444 = vlog2.f32 %v2629_v21  ;;  %v2620_v11 = vmul.f32 0.25, %v4834_v3 }
 0x5dc   : > { %v2394_v52 = vpop.xlane.xlu0 %2393  ;;  %2457 = vadd.xlane.f32.xlu2 %v2456_v45  ;;  %2445 = vadd.xlane.f32.xlu0 %v2444_v30  ;;  %3446 = vlog2.f32 %v2625_v43  ;;  %v2631_v3 = vadd.f32 1e-08, %v2623_v42 }
 0x5dd   : > { %v2417_v50 = vmul.f32 %v4979_v27, %v2394_v52  ;;  %v2628_v30 = vadd.f32 1e-08, %v2620_v11 }
 0x5df   : > { %v5004_v1 = vsub.f32 %v2369_v16, %v2417_v50  ;;  %v3441_v33 = vpop.eup %3440  ;;  %3448 = vlog2.f32 %v2628_v30 }
 0x5e0   : > { %v3443_v41 = vpop.eup %3442  ;;  %v2637_v57 = vmul.f32 0.6931472, %v3441_v33  ;;  %3450 = vlog2.f32 %v2631_v3 }
 0x5e1   : > { %v2433_v20 = vmul.f32 %v5004_v1, %v5004_v1  ;;  %v2645_v10 = vmul.f32 0.6931472, %v3443_v41  ;;  %v3445_v4 = vpop.eup %3444 }
 0x5e2   : > { %v2650_v0 = vsel %vm4416_vm5, %v2637_v57, 0.0  ;;  %v2643_v63 = vmul.f32 0.6931472, %v3445_v4  ;;  %v3447_v29 = vpop.eup %3446 }
 0x5e3   : > { %v2447_v60 = vsel %vm990_vm4, %v2433_v20, 0.0  ;;  %v2662_v58 = vsel %vm1523_vm1, %v2650_v0, 0.0  ;;  %v2635_v50 = vmul.f32 0.6931472, %v3447_v29 }
 0x5e4   : > { %2448 = vadd.xlane.f32.xlu2 %v2447_v60  ;;  %2657 = vadd.xlane.f32.xlu0 %v2656_v32  ;;  %v2385_v16 = vpop.xlane.xlu0 %2384  ;;  %v2653_v28 = vsel %vm4459_vm6, %v2643_v63, 0.0 }
 0x5e5   : > { %v2414_v31 = vmul.f32 %v4979_v27, %v2385_v16  ;;  %v2671_v39 = vsel %vm1523_vm1, %v2653_v28, 0.0  ;;  %v2649_v56 = vsel %vm4285_vm3, %v2635_v50, 0.0  ;;  %v3449_v59 = vpop.eup %3448 }
 0x5e6   : > { %v2641_v23 = vmul.f32 0.6931472, %v3449_v59  ;;  %v3451_v20 = vpop.eup %3450 }
 0x5e7   : > { %v5015_v25 = vsub.f32 %v4963_v46, %v2414_v31  ;;  %v2654_v46 = vsel %vm4546_vm9, %v2645_v10, 0.0  ;;  %v2647_v32 = vmul.f32 0.6931472, %v3451_v20 }
 0x5e8   : > { %v2674_v40 = vsel %vm1523_vm1, %v2654_v46, 0.0  ;;  %v2652_v19 = vsel %vm4500_vm8, %v2641_v23, 0.0 }
 0x5e9   : > { %v2430_v9 = vmul.f32 %v5015_v25, %v5015_v25  ;;  %v2668_v60 = vsel %vm1523_vm1, %v2652_v19, 0.0  ;;  %v2655_v16 = vsel %vm4584_vm10, %v2647_v32, 0.0 }
 0x5ea   : > { %v2677_v21 = vsel %vm1523_vm1, %v2655_v16, 0.0 }
 0x5eb   : > { %v2438_v13 = vsel %vm990_vm4, %v2430_v9, 0.0 }
 0x5ec   : > { %2666 = vadd.xlane.f32.xlu0 %v2665_v48  ;;  %2439 = vadd.xlane.f32.xlu2 %v2438_v13 }
 0x5f4   : > { %2675 = vadd.xlane.f32.xlu0 %v2674_v40  ;;  %2663 = vadd.xlane.f32.xlu2 %v2662_v58 }
 0x5fc   : > { %2672 = vadd.xlane.f32.xlu2 %v2671_v39  ;;  %v5075_v39 = vperm.slane %v4956_v15, 1 }
 0x620   : > { %v2406_v5 = vpop.xlane.xlu2 %2405 }
 0x621   : > { %v2421_v38 = vmul.f32 %v4979_v27, %v2406_v5 }
 0x623   : > { %v5034_v54 = vsub.f32 %v4967_v34, %v2421_v38 }
 0x625   : > { %v2437_v22 = vmul.f32 %v5034_v54, %v5034_v54 }
 0x627   : > { %v2459_v17 = vsel %vm990_vm4, %v2437_v22, 0.0 }
 0x628   : > { %v2397_v49 = vpop.xlane.xlu2 %2396  ;;  %2460 = vadd.xlane.f32.xlu1 %v2459_v17  ;;  %v5078_v17 = vperm.slane %v4956_v15, 2 }
 0x629   : > { %v2418_v44 = vmul.f32 %v4979_v27, %v2397_v49 }
 0x62b   : > { %v5042_v8 = vsub.f32 %v4971_v18, %v2418_v44 }
 0x62d   : > { %v2434_v37 = vmul.f32 %v5042_v8, %v5042_v8 }
 0x62f   : > { %v2450_v34 = vsel %vm990_vm4, %v2434_v37, 0.0 }
 0x630   : > { %2451 = vadd.xlane.f32.xlu1 %v2450_v34  ;;  %v2388_v26 = vpop.xlane.xlu2 %2387 }
 0x631   : > { %v2415_v47 = vmul.f32 %v4979_v27, %v2388_v26 }
 0x633   : > { %v5050_v45 = vsub.f32 %v4975_v7, %v2415_v47  ;;  %v2659_v7 = vsel %vm1523_vm1, %v2649_v56, 0.0 }
 0x635   : > { %v2431_v18 = vmul.f32 %v5050_v45, %v5050_v45 }
 0x637   : > { %v2441_v52 = vsel %vm990_vm4, %v2431_v18, 0.0 }
 0x638   : > { %2442 = vadd.xlane.f32.xlu1 %v2441_v52 }
 0x640   : > { %2660 = vadd.xlane.f32.xlu1 %v2659_v7 }
 0x647   : > { %v2455_v6 = vpop.xlane.xlu0 %2454 }
 0x648   : > { %v2467_v51 = vmul.f32 %v2455_v6, %v4979_v27  ;;  %2669 = vadd.xlane.f32.xlu1 %v2668_v60 }
 0x64a   : > { %v2475_v12 = vadd.f32 1e-05, %v2467_v51 }
 0x64c   : > { %3452 = vrsqrt.f32 %v2475_v12  ;;  %vm2534_vm14 = vweird.f32 %v2475_v12 }
 0x64f   : > { %v2458_v35 = vpop.xlane.xlu2 %2457  ;;  %v2446_v31 = vpop.xlane.xlu0 %2445 }
 0x650   : > { %v2468_v62 = vmul.f32 %v2458_v35, %v4979_v27  ;;  %v2464_v33 = vmul.f32 %v2446_v31, %v4979_v27  ;;  %2678 = vadd.xlane.f32.xlu1 %v2677_v21 }
 0x652   : > { %v3453_v55 = vpop.eup %3452  ;;  %v2476_v41 = vadd.f32 1e-05, %v2468_v62  ;;  %v2472_v9 = vadd.f32 1e-05, %v2464_v33 }
 0x653   : > { %v2529_v48 = vmul.f32 %v3453_v55, %v2475_v12  ;;  %vm2535_vm13 = vweird.f32 %v3453_v55 }
 0x654   : > { %3454 = vrsqrt.f32 %v2476_v41  ;;  %vm2536_vm15 = vmor %vm2534_vm14, %vm2535_vm13  ;;  %vm2544_vm3 = vweird.f32 %v2476_v41  ;;  %vm2504_vm6 = vweird.f32 %v2472_v9 }
 0x655   : > { %v2530_v36 = vmul.f32 %v3453_v55, %v2529_v48  ;;  %3456 = vrsqrt.f32 %v2472_v9 }
 0x657   : > { %v2531_v13 = vmul.f32 0.5, %v2530_v36  ;;  %v2449_v10 = vpop.xlane.xlu2 %2448 }
 0x658   : > { %v2465_v57 = vmul.f32 %v2449_v10, %v4979_v27 }
 0x659   : > { %v2532_v46 = vsub.f32 1.5, %v2531_v13 }
 0x65a   : > { %v3455_v0 = vpop.eup %3454  ;;  %v2473_v4 = vadd.f32 1e-05, %v2465_v57 }
 0x65b   : > { %v3457_v40 = vpop.eup %3456  ;;  %v2533_v58 = vmul.f32 %v3453_v55, %v2532_v46  ;;  %v2539_v63 = vmul.f32 %v3455_v0, %v2476_v41  ;;  %vm2545_vm0 = vweird.f32 %v3455_v0 }
 0x65c   : > { %v2499_v28 = vmul.f32 %v3457_v40, %v2472_v9  ;;  %3458 = vrsqrt.f32 %v2473_v4  ;;  %vm2505_vm2 = vweird.f32 %v3457_v40  ;;  %vm2546_vm5 = vmor %vm2544_vm3, %vm2545_vm0  ;;  %vm2514_vm9 = vweird.f32 %v2473_v4 }
 0x65d   : > { %v2537_v5 = vsel %vm2536_vm15, %v3453_v55, %v2533_v58  ;;  %v2540_v38 = vmul.f32 %v3455_v0, %v2539_v63  ;;  %vm2506_vm7 = vmor %vm2504_vm6, %vm2505_vm2  ;;  %v2658_v63 = vpop.xlane.xlu0 %2657  ;;  %vm2696_vm3 = vcmask 1041409  }
 0x65e   : > { %v2500_v22 = vmul.f32 %v3457_v40, %v2499_v28  ;;  %v2563_v53 = vmul.f32 %v2537_v5, %v4983_v24 }
 0x65f   : > { %v2541_v49 = vmul.f32 0.5, %v2540_v38  ;;  %v2440_v44 = vpop.xlane.xlu2 %2439 }
 0x660   : > { %v2501_v43 = vmul.f32 0.5, %v2500_v22  ;;  %v2462_v37 = vmul.f32 %v2440_v44, %v4979_v27  ;;  %v2572_v34 = vmul.f32 %v5075_v39, %v2563_v53 }
 0x661   : > { %v2542_v11 = vsub.f32 1.5, %v2541_v49 }
 0x662   : > { %v3459_v26 = vpop.eup %3458  ;;  %v2502_v47 = vsub.f32 1.5, %v2501_v43  ;;  %v2470_v24 = vadd.f32 1e-05, %v2462_v37  ;;  %v5089_v30 = vadd.f32 %v5078_v17, %v2572_v34 }
 0x663   : > { %v2543_v29 = vmul.f32 %v3455_v0, %v2542_v11  ;;  %v2509_v18 = vmul.f32 %v3459_v26, %v2473_v4  ;;  %vm2515_vm8 = vweird.f32 %v3459_v26 }
 0x664   : > { %v2503_v52 = vmul.f32 %v3457_v40, %v2502_v47  ;;  %3460 = vrsqrt.f32 %v2470_v24  ;;  %2589 = vst.msk [vmem:[%s5086_s18 + $0x28] sm:$0xff] %vm990_vm4, %v5089_v30  ;;  %vm2516_vm10 = vmor %vm2514_vm9, %vm2515_vm8  ;;  %vm2484_vm12 = vweird.f32 %v2470_v24  ;;  %vm2700_vm8 = vcmask 1043459  }
 0x665   : > { %v2547_v42 = vsel %vm2546_vm5, %v3455_v0, %v2543_v29  ;;  %v2510_v50 = vmul.f32 %v3459_v26, %v2509_v18  ;;  %v2688_v18 = vperm.slane %v2658_v63, %v3736_v2  ;;  %vm2702_vm9 = vcmask 1044484  }
 0x666   : > { %v2507_v3 = vsel %vm2506_vm7, %v3457_v40, %v2503_v52  ;;  %v2564_v56 = vmul.f32 %v2547_v42, %v4991_v14  ;;  %v2667_v52 = vpop.xlane.xlu0 %2666  ;;  %vm2698_vm7 = vcmask 1042434  }
 0x667   : > { %v2511_v59 = vmul.f32 0.5, %v2510_v50  ;;  %v2560_v7 = vmul.f32 %v2507_v3, %v4993_v61  ;;  %v2664_v34 = vpop.xlane.xlu2 %2663  ;;  %v5244_v50 = vlaneseq }
 0x668   : > { %v2573_v23 = vmul.f32 %v5075_v39, %v2564_v56 }
 0x669   : > { %v2512_v19 = vsub.f32 1.5, %v2511_v59  ;;  %v2569_v20 = vmul.f32 %v5075_v39, %v2560_v7  ;;  %v2733_v3 = vshrl.u32 %v5244_v50, 7  ;;  %v2690_v7 = vperm.slane %v2664_v34, %v3736_v2 }
 0x66a   : > { %v3461_v6 = vpop.eup %3460  ;;  %v5099_v60 = vadd.f32 %v5078_v17, %v2573_v23 }
 0x66b   : > { %v2513_v51 = vmul.f32 %v3459_v26, %v2512_v19  ;;  %v2479_v32 = vmul.f32 %v3461_v6, %v2470_v24  ;;  %v5102_v14 = vadd.f32 %v5078_v17, %v2569_v20  ;;  %vm2485_vm11 = vweird.f32 %v3461_v6 }
 0x66c   : > { %2590 = vst.msk [vmem:[%s5086_s18 + $0x30] sm:$0xff] %vm990_vm4, %v5099_v60  ;;  %vm2486_vm13 = vmor %vm2484_vm12, %vm2485_vm11  ;;  %vm2704_vm12 = vcmask 1045509  }
 0x66d   : > { %v2517_v61 = vsel %vm2516_vm10, %v3459_v26, %v2513_v51  ;;  %v2480_v12 = vmul.f32 %v3461_v6, %v2479_v32  ;;  %2586 = vst.msk [vmem:[%s5086_s18 + $0x10] sm:$0xff] %vm990_vm4, %v5102_v14 }
 0x66e   : > { %v2561_v16 = vmul.f32 %v2517_v61, %v5004_v1 }
 0x66f   : > { %v2481_v35 = vmul.f32 0.5, %v2480_v12  ;;  %v2691_v12 = vperm.slane %v2667_v52, %v3736_v2  ;;  %v2769_v52 = vperm.slane %v4956_v15, 4 }
 0x670   : > { %v2570_v31 = vmul.f32 %v5075_v39, %v2561_v16 }
 0x671   : > { %v2482_v21 = vsub.f32 1.5, %v2481_v35 }
 0x672   : > { %v5113_v62 = vadd.f32 %v5078_v17, %v2570_v31  ;;  %v2673_v31 = vpop.xlane.xlu2 %2672 }
 0x673   : > { %v2483_v33 = vmul.f32 %v3461_v6, %v2482_v21 }
 0x674   : > { %2587 = vst.msk [vmem:[%s5086_s18 + $0x18] sm:$0xff] %vm990_vm4, %v5113_v62 }
 0x675   : > { %v2487_v55 = vsel %vm2486_vm13, %v3461_v6, %v2483_v33  ;;  %v2736_v6 = vadd.s32 1, %v2733_v3  ;;  %v2734_v33 = vmul.u32 8, %v2733_v3 }
 0x676   : > { %v2558_v41 = vmul.f32 %v2487_v55, %v5015_v25 }
 0x677   : > { %v2737_v55 = vmul.u32 8, %v2736_v6 }
 0x678   : > { %v2567_v9 = vmul.f32 %v5075_v39, %v2558_v41 }
 0x67a   : > { %v5121_v1 = vadd.f32 %v5078_v17, %v2567_v9 }
 0x67c   : > { %2584 = vst.msk [vmem:[%s5086_s18] sm:$0xff] %vm990_vm4, %v5121_v1 }
 0x69b   : > { %v2461_v48 = vpop.xlane.xlu1 %2460 }
 0x69c   : > { %v2469_v36 = vmul.f32 %v2461_v48, %v4979_v27  ;;  %v2676_v48 = vpop.xlane.xlu0 %2675 }
 0x69e   : > { %v2477_v13 = vadd.f32 1e-05, %v2469_v36  ;;  %v2693_v36 = vperm.slane %v2673_v31, %v3736_v2 }
 0x6a0   : > { %3462 = vrsqrt.f32 %v2477_v13  ;;  %vm2554_vm15 = vweird.f32 %v2477_v13 }
 0x6a3   : > { %v2452_v10 = vpop.xlane.xlu1 %2451 }
 0x6a4   : > { %v2466_v57 = vmul.f32 %v2452_v10, %v4979_v27 }
 0x6a6   : > { %v3463_v46 = vpop.eup %3462  ;;  %v2474_v0 = vadd.f32 1e-05, %v2466_v57 }
 0x6a7   : > { %v2549_v4 = vmul.f32 %v3463_v46, %v2477_v13  ;;  %vm2555_vm14 = vweird.f32 %v3463_v46 }
 0x6a8   : > { %3464 = vrsqrt.f32 %v2474_v0  ;;  %vm2556_vm0 = vmor %vm2554_vm15, %vm2555_vm14  ;;  %vm2524_vm5 = vweird.f32 %v2474_v0  ;;  %vm2706_vm14 = vcmask 1046534   ;;  %vm5151_vm15 = vcmp.ge.s32.totalorder %v3736_v2, %v2734_v33 }
 0x6a9   : > { %v2550_v25 = vmul.f32 %v3463_v46, %v2549_v4 }
 0x6ab   : > { %v2551_v40 = vmul.f32 0.5, %v2550_v25  ;;  %v2443_v58 = vpop.xlane.xlu1 %2442 }
 0x6ac   : > { %v2463_v28 = vmul.f32 %v2443_v58, %v4979_v27 }
 0x6ad   : > { %v2552_v5 = vsub.f32 1.5, %v2551_v40 }
 0x6ae   : > { %v3465_v38 = vpop.eup %3464  ;;  %v2471_v22 = vadd.f32 1e-05, %v2463_v28  ;;  %v3541_v28 = vmov 0.0  }
 0x6af   : > { %v2553_v53 = vmul.f32 %v3463_v46, %v2552_v5  ;;  %v2519_v49 = vmul.f32 %v3465_v38, %v2474_v0  ;;  %vm2525_vm2 = vweird.f32 %v3465_v38  ;;  %v2694_v0 = vperm.slane %v2676_v48, %v3736_v2 }
 0x6b0   : > { %3466 = vrsqrt.f32 %v2471_v22  ;;  %vm2526_vm6 = vmor %vm2524_vm5, %vm2525_vm2  ;;  %vm2494_vm11 = vweird.f32 %v2471_v22  ;;  %vm2708_vm2 = vcmask 1047559  }
 0x6b1   : > { %v2557_v44 = vsel %vm2556_vm0, %v3463_v46, %v2553_v53  ;;  %v2520_v43 = vmul.f32 %v3465_v38, %v2519_v49  ;;  %vm5156_vm0 = vcmp.lt.s32.totalorder %v3736_v2, %v2737_v55 }
 0x6b2   : > { %v2565_v37 = vmul.f32 %v2557_v44, %v5034_v54  ;;  %vm2739_vm5 = vmand %vm5151_vm15, %vm5156_vm0 }
 0x6b3   : > { %v2521_v11 = vmul.f32 0.5, %v2520_v43  ;;  %v2661_v26 = vpop.xlane.xlu1 %2660  ;;  %v2740_v5 = vsel %vm2739_vm5, 0.125, %v3541_v28 }
 0x6b4   : > { %v2689_v47 = vperm.slane %v2661_v26, %v3736_v2  ;;  %v2574_v27 = vmul.f32 %v5075_v39, %v2565_v37 }
 0x6b5   : > { %v2522_v24 = vsub.f32 1.5, %v2521_v11 }
 0x6b6   : > { %v3467_v29 = vpop.eup %3466  ;;  %v2583_v42 = vadd.f32 %v5078_v17, %v2574_v27  ;;  %v2697_v59 = vsel %vm2696_vm3, %v2689_v47, %v2688_v18  ;;  %vm2711_vm3 = vcmask 64512   ;;  %v2764_v27 = vperm.slane %v4956_v15, 3 }
 0x6b7   : > { %v2523_v54 = vmul.f32 %v3465_v38, %v2522_v24  ;;  %v2489_v56 = vmul.f32 %v3467_v29, %v2471_v22  ;;  %v2699_v32 = vsel %vm2698_vm7, %v2690_v7, %v2697_v59  ;;  %vm2495_vm10 = vweird.f32 %v3467_v29 }
 0x6b8   : > { %2752 = vmatpush.msra.mxu3 %v2583_v42  ;;  %2591 = vst.msk [vmem:[%s5086_s18 + $0x38] sm:$0xff] %vm990_vm4, %v2583_v42  ;;  %vm2496_vm13 = vmor %vm2494_vm11, %vm2495_vm10  ;;  %vm2771_vm10 = vcmp.eq.s32.totalorder %v3736_v2, 0 }
 0x6b9   : > { %v2527_v23 = vsel %vm2526_vm6, %v3465_v38, %v2523_v54  ;;  %v2490_v19 = vmul.f32 %v3467_v29, %v2489_v56 }
 0x6ba   : > { %2753 = vmatpush.msra.mxu3 %v5099_v60  ;;  %v2562_v20 = vmul.f32 %v2527_v23, %v5042_v8  ;;  %v2701_v60 = vsel %vm2700_vm8, %v2691_v12, %v2699_v32 }
 0x6bb   : > { %v2491_v51 = vmul.f32 0.5, %v2490_v19  ;;  %v2670_v61 = vpop.xlane.xlu1 %2669 }
 0x6bc   : > { %v2692_v16 = vperm.slane %v2670_v61, %v3736_v2  ;;  %2754 = vmatpush.msra.mxu3 %v5089_v30  ;;  %v2571_v35 = vmul.f32 %v5075_v39, %v2562_v20 }
 0x6bd   : > { %v2492_v21 = vsub.f32 1.5, %v2491_v51 }
 0x6be   : > { %v2580_v8 = vadd.f32 %v5078_v17, %v2571_v35  ;;  %v2703_v9 = vsel %vm2702_vm9, %v2692_v16, %v2701_v60 }
 0x6bf   : > { %v2493_v41 = vmul.f32 %v3467_v29, %v2492_v21  ;;  %v2705_v10 = vsel %vm2704_vm12, %v2693_v36, %v2703_v9 }
 0x6c0   : > { %2755 = vmatpush.msra.mxu3 %v2580_v8  ;;  %2588 = vst.msk [vmem:[%s5086_s18 + $0x20] sm:$0xff] %vm990_vm4, %v2580_v8  ;;  %v2707_v25 = vsel %vm2706_vm14, %v2694_v0, %v2705_v10 }
 0x6c1   : > { %v2497_v30 = vsel %vm2496_vm13, %v3467_v29, %v2493_v41 }
 0x6c2   : > { %2756 = vmatpush.msra.mxu3 %v5113_v62  ;;  %v2559_v13 = vmul.f32 %v2497_v30, %v5050_v45 }
 0x6c3   : > { %v2679_v4 = vpop.xlane.xlu1 %2678 }
 0x6c4   : > { %v2695_v62 = vperm.slane %v2679_v4, %v3736_v2  ;;  %2757 = vmatpush.msra.mxu3 %v5102_v14  ;;  %v2568_v45 = vmul.f32 %v5075_v39, %v2559_v13  ;;  %v3470_v39 = vld [vmem:[%s3801_s14] sm:$0xff]  ;;  %s291_s14 = sand.u32 1, %s3525_s25  }
 0x6c5   : > { %v2715_v14 = vcvt.s32.f32 %v3470_v39  ;;  %s2912_s19 = sshll.u32 %s291_s14, 3  ;;  %s2793_s29 = scalar_lea.sflag [#allocation3], %s291_s14 }
 0x6c6   : > { %v2577_v40 = vadd.f32 %v5078_v17, %v2568_v45  ;;  %v2709_v58 = vsel %vm2708_vm2, %v2695_v62, %v2707_v25  ;;  %s293_s9 = scalar_lea.vmem [#allocation2], %s2912_s19 }
 0x6c7   : > { %v2712_v63 = vsel %vm2711_vm3, %v2709_v58, 0.0  ;;  %v2716_v38 = vmul.f32 8.0, %v2715_v14  ;;  %s2809_s13 = sshll.u32 %s293_s9, 4  ;;  %s2810_s13 = int_to_ptr.vmem [resolvable:$true] %s2809_s13 }
 0x6c8   : > { %2758 = vmatpush.msra.mxu3 %v2577_v40  ;;  %2713 = vadd.xlane.f32.xlu2 %v2712_v63  ;;  %2585 = vst.msk [vmem:[%s5086_s18 + $0x8] sm:$0xff] %vm990_vm4, %v2577_v40 }
 0x6c9   : > { %3468 = vrcp.f32 %v2716_v38  ;;  %vm2722_vm6 = vweird.f32 %v2716_v38  ;;  %v2728_v44 = vand.u32 2147483648, %v2716_v38  ;;  %v2726_v37 = vand.u32 2147483647, %v2716_v38 }
 0x6ca   : > { %2759 = vmatpush.msra.mxu3 %v5121_v1 }
 0x6cb   : > { %3174 = vmatmul.msk.f32.vlgmr.msra.gmra.mxu3 %vm1523_vm1, %v2740_v5  ;;  %v2729_v34 = vor.u32 1.1754944e-38, %v2728_v44  ;;  %vm2727_vm9 = vcmp.eq.f32.partialorder %v2726_v37, 8.507059e+37  ;;  %vm2778_vm1 = vcmp.eq.s32.totalorder %v3736_v2, 1 }
 0x6cf   : > { %v3469_v22 = vpop.eup %3468 }
 0x6d0   : > { %v2718_v53 = vmul.f32 %v3469_v22, %v2716_v38  ;;  %vm2723_vm7 = vweird.f32 %v3469_v22 }
 0x6d1   : > { %vm2724_vm8 = vmor %vm2722_vm6, %vm2723_vm7 }
 0x6d2   : > { %v2719_v49 = vsub.f32 1.0, %v2718_v53 }
 0x6d4   : > { %v2720_v17 = vmul.f32 %v3469_v22, %v2719_v49 }
 0x6d6   : > { %v2721_v43 = vadd.f32 %v3469_v22, %v2720_v17 }
 0x6d8   : > { %v2725_v11 = vsel %vm2724_vm8, %v3469_v22, %v2721_v43 }
 0x6d9   : > { %v2730_v1 = vsel %vm2727_vm9, %v2729_v34, %v2725_v11 }
 0x73b   : > { %v2714_v26 = vpop.xlane.xlu2 %2713 }
 0x73c   : > { %v2731_v47 = vmul.f32 %v2730_v1, %v2714_v26 }
 0x73e   : > { %2781 = vperm.xlu2 %3275, %v2731_v47  }
 0x74e   : > { %v2761_v24 = vpop.f32.mrf.mxu3 }
 0x74f   : > { %v2765_v29 = vmul.f32 %v2764_v27, %v2761_v24 }
 0x751   : > { %v2766_v18 = vsel %vm990_vm4, %v2765_v29, 0.0 }
 0x752   : > { %2767 = vadd.xlane.f32.xlu0 %v2766_v18 }
 0x798   : > { %v2782_v3 = vpop.permute.xlu2 %2781 }
 0x799   : > { %v2784_v15 = vsel %vm2778_vm1, %v2782_v3, 0.0 }
 0x7c5   : > { %v2768_v42 = vpop.xlane.xlu0 %2767 }
 0x7c6   : > { %v2770_v50 = vadd.f32 %v2769_v52, %v2768_v42 }
 0x7c8   : > { %2774 = vperm.xlu1 %3274, %v2770_v50  }
 0x83a   : > { %v2775_v54 = vpop.permute.xlu1 %2774 }
 0x83b   : > { %v2777_v56 = vsel %vm2771_vm10, %v2775_v54, 0.0 }
 0x83c   : > { %v2785_v59 = vadd.f32 %v2784_v15, %v2777_v56 }
 0x83e   : > { %2786 = vst [vmem:[%s293_s9] sm:$0xff] %v2785_v59 }
 0x83f   : > { %3498 = shalt.err (!%p3495_p7)
}
 0x840   : > { %3227 = dma.vmem_to_hbm [thread:$0]  (%p3620_p5), %s2810_s13, 128, %s2812_s23, %s2793_s29  }
 0x841 PF: > { %p3233_p8 = scmp.ge.s32.totalorder %s3533_s27, 2  ;;  %s2831_s14 = sand.u32 1, %s3521_s24  }
 0x842   : > { %s2832_s20 = scalar_lea.sflag [#allocation3], %s2831_s14 }
 0x843   : > { %p3230_p9 = pnand %p3233_p8, %p3624_p6 }
 0x845   : > { %p3231_p10 = pneg %p3230_p9 }
 0x847   : > { %3516 = dma.done.wait (%p3231_p10), %s2832_s20, 128  }
 0x848   : > { %3518 = vsyncadd (%p3231_p10), %s2832_s20, 4294967168  ;;  %p18_p11 = scmp.ge.s32.totalorder %s3607_s30, 4   ;;  %s5249_s24 = smov %s3525_s25 }
 0x849   : > { %s5250_s25 = smov %s3529_s26  ;;  %s5251_s26 = smov %s3618_s10 }
 0x84a   : > { %s5252_s27 = smov %s3607_s30  ;;  %20 = sbr.rel (!%p18_p11) target bundleno = 3 (0x3), region = 94 }
 0x84f   :  { %2838 = vsyncpa [#allocation3], 1 }
 0x850   :  { %2840 = vsyncpa [#allocation3 + $0x1], 1 }

</bundles_post_ra>
